<compile_context>
chip_gen: v6e
topology: v6e:2x2x1
jax: 0.10.0
libtpu: 0.0.40
codegen_flags: <defaults>
</compile_context>

<pallas_src>
import functools

import numpy as np
import jax
import jax.numpy as jnp
from jax.experimental import pallas as pl
from jax.experimental.pallas import tpu as pltpu


# ----------------------------------------------------------------------------
# generation-aware knobs
# ----------------------------------------------------------------------------
@functools.lru_cache(maxsize=1)
def _vmem_capacity_bytes():
    cap = 64 * 1024 * 1024
    try:
        cap = int(getattr(pltpu.get_tpu_info(), "vmem_capacity_bytes", cap))
    except Exception:
        pass
    return cap


@functools.lru_cache(maxsize=1)
def _vmem_limit_bytes():
    cap = _vmem_capacity_bytes()
    # leave headroom for double-buffered streams + compiler scratch
    return int(max(32 * 1024 * 1024, min(cap * 3 // 4, 100 * 1024 * 1024)))


def default_edge_tile():
    # wflat / x_rep / prod intermediates are ~12 KiB per edge row at W=32;
    # keep tiles smaller on 64 MiB (v7x) parts.
    return 1024 if _vmem_capacity_bytes() <= 64 * 1024 * 1024 else 2048


# ----------------------------------------------------------------------------
# BlockSpec helpers (1-D grid)
# ----------------------------------------------------------------------------
def _tile_spec(block_shape):
    nd = len(block_shape)
    return pl.BlockSpec(block_shape, lambda i, _nd=nd: (i,) + (0,) * (_nd - 1))


def _const_spec(shape):
    nd = len(shape)
    return pl.BlockSpec(shape, lambda i, _nd=nd: (0,) * _nd)


@functools.lru_cache(maxsize=None)
def _rep_fold_constants(width):
    """rep[c, c*W + o] = 1 (lane-repeat), fold[c*W + o, o] = 1 (channel sum)."""
    j = np.arange(width * width)
    rep = (np.arange(width)[:, None] == (j // width)[None, :]).astype(np.float32)
    fold = ((j % width)[:, None] == np.arange(width)[None, :]).astype(np.float32)
    return rep, fold


# ----------------------------------------------------------------------------
# Pallas kernel 1: per-edge message computation (edge-tiled, pipelined)
#   msg[e, o] = scale[e] * sum_c x_src[e, c] * wflat[e, c*W + o]
#   wflat recomputed per tile from edge_attr (k1 -> relu -> k2 -> relu -> k3)
# ----------------------------------------------------------------------------
def _msg_kernel(ea_ref, xs_ref, scale_ref,
                k1_w_ref, k1_b_ref, k2_w_ref, k2_b_ref, k3_w_ref, k3_b_ref,
                rep_ref, fold_ref, o_ref):
    f32 = jnp.float32
    e = jnp.dot(ea_ref[...], k1_w_ref[...], preferred_element_type=f32) + k1_b_ref[...]
    e = jnp.maximum(e, 0.0)
    e = jnp.dot(e, k2_w_ref[...], preferred_element_type=f32) + k2_b_ref[...]
    e = jnp.maximum(e, 0.0)
    wflat = jnp.dot(e, k3_w_ref[...], preferred_element_type=f32) + k3_b_ref[...]   # [T_E, W*W]

    x_rep = jnp.dot(xs_ref[...], rep_ref[...], preferred_element_type=f32)          # [T_E, W*W]
    prod = x_rep * wflat
    msg = jnp.dot(prod, fold_ref[...], preferred_element_type=f32)                  # [T_E, W]
    o_ref[...] = (msg * scale_ref[...]).astype(o_ref.dtype)


def _message_pallas(ea, x_src, edge_scale, k1_w, k1_b, k2_w, k2_b, k3_w, k3_b,
                    rep, fold, *, edge_tile):
    e_pad, k_pad = ea.shape
    width = x_src.shape[1]
    grid = (e_pad // edge_tile,)
    args = (ea, x_src, edge_scale, k1_w, k1_b, k2_w, k2_b, k3_w, k3_b, rep, fold)
    in_specs = [
        _tile_spec((edge_tile, k_pad)),
        _tile_spec((edge_tile, width)),
        _tile_spec((edge_tile, 1)),
        _const_spec(k1_w.shape), _const_spec(k1_b.shape),
        _const_spec(k2_w.shape), _const_spec(k2_b.shape),
        _const_spec(k3_w.shape), _const_spec(k3_b.shape),
        _const_spec(rep.shape), _const_spec(fold.shape),
    ]
    return pl.pallas_call(
        _msg_kernel,
        out_shape=jax.ShapeDtypeStruct((e_pad, width), jnp.float32),
        grid=grid,
        in_specs=in_specs,
        out_specs=_tile_spec((edge_tile, width)),
        compiler_params=pltpu.CompilerParams(
            dimension_semantics=("parallel",),
            vmem_limit_bytes=_vmem_limit_bytes(),
        ),
    )(*args)


# ----------------------------------------------------------------------------
# Pallas kernel 2: node update  h' = aggr + h @ root + bias  (optional relu)
# ----------------------------------------------------------------------------
def _node_kernel(apply_relu, aggr_ref, h_ref, root_ref, bias_ref, o_ref):
    h_new = aggr_ref[...] + jnp.dot(h_ref[...], root_ref[...],
                                    preferred_element_type=jnp.float32) + bias_ref[...]
    if apply_relu:
        h_new = jnp.maximum(h_new, 0.0)
    o_ref[...] = h_new.astype(o_ref.dtype)


def _node_update_pallas(aggr, h, root, bias2d, *, node_tile, apply_relu):
    n_pad, width = h.shape
    grid = (n_pad // node_tile,)
    return pl.pallas_call(
        functools.partial(_node_kernel, apply_relu),
        out_shape=jax.ShapeDtypeStruct((n_pad, width), jnp.float32),
        grid=grid,
        in_specs=[_tile_spec((node_tile, width)),
                  _tile_spec((node_tile, width)),
                  _const_spec(root.shape),
                  _const_spec(bias2d.shape)],
        out_specs=_tile_spec((node_tile, width)),
        compiler_params=pltpu.CompilerParams(
            dimension_semantics=("parallel",),
            vmem_limit_bytes=_vmem_limit_bytes(),
        ),
    )(aggr, h, root, bias2d)


# ----------------------------------------------------------------------------
# topology preprocessing (numpy, once per graph)
# ----------------------------------------------------------------------------
def prepare_graph(edge_index, edge_attr, num_nodes, *, edge_tile, node_tile):
    ei = np.asarray(edge_index, dtype=np.int32)
    ea = np.asarray(edge_attr, dtype=np.float32)
    e, ker_in = ea.shape
    src, tgt = ei[0], ei[1]

    deg = np.zeros((num_nodes,), np.float32)
    np.add.at(deg, tgt, 1.0)
    inv_deg = 1.0 / np.maximum(deg, 1.0)

    e_pad = max(edge_tile, ((e + edge_tile - 1) // edge_tile) * edge_tile)
    k_pad = max(8, ((ker_in + 7) // 8) * 8)          # sublane-align the k1 contraction
    n_pad = max(node_tile, ((num_nodes + node_tile - 1) // node_tile) * node_tile)

    ea_p = np.zeros((e_pad, k_pad), np.float32)
    ea_p[:e, :ker_in] = ea
    src_p = np.zeros((e_pad,), np.int32)
    src_p[:e] = src
    tgt_p = np.zeros((e_pad,), np.int32)
    tgt_p[:e] = tgt
    scale_p = np.zeros((e_pad, 1), np.float32)       # 0 for padded edges -> zero message
    scale_p[:e, 0] = inv_deg[tgt]

    return dict(ea=jnp.asarray(ea_p), src=jnp.asarray(src_p), tgt=jnp.asarray(tgt_p),
                scale=jnp.asarray(scale_p), n_pad=int(n_pad))


# ----------------------------------------------------------------------------
# KernelNN3 forward
# ----------------------------------------------------------------------------
@functools.partial(jax.jit, static_argnames=("depth", "edge_tile", "node_tile", "n_pad"))
def kernelnn3_forward(params, x, ea_pad, src_pad, tgt_pad, edge_scale,
                      *, depth, edge_tile, node_tile, n_pad):
    conv = params["conv"]
    width = params["fc1_w"].shape[1]
    in_width = params["fc1_w"].shape[0]
    ker_in = conv["k1_w"].shape[0]
    k_pad = ea_pad.shape[1]
    n = x.shape[0]

    # zero-pad k1's contraction dim to match padded edge_attr (identical result)
    k1_w = jnp.pad(conv["k1_w"], ((0, k_pad - ker_in), (0, 0)))
    k1_b = conv["k1_b"].reshape(1, -1)
    k2_w, k2_b = conv["k2_w"], conv["k2_b"].reshape(1, -1)
    k3_w, k3_b = conv["k3_w"], conv["k3_b"].reshape(1, -1)
    root = conv["root"]
    bias2d = conv["bias"].reshape(1, -1)

    # trace-time numpy constants (baked into the executable, not rebuilt per call)
    rep_np, fold_np = _rep_fold_constants(width)
    rep = jnp.asarray(rep_np)
    fold = jnp.asarray(fold_np)

    # fc1: in_width == 1 -> VPU broadcast multiply instead of a K=1 MXU dot
    if in_width == 1:
        h = x * params["fc1_w"][0][None, :] + params["fc1_b"][None, :]
    else:
        h = x @ params["fc1_w"] + params["fc1_b"][None, :]
    h = jnp.pad(h, ((0, n_pad - n), (0, 0)))          # [N_pad, W]; pad rows never feed real edges

    for k in range(depth):
        x_src = jnp.take(h, src_pad, axis=0)           # [E_pad, W] row gather (XLA)
        msg = _message_pallas(ea_pad, x_src, edge_scale,
                              k1_w, k1_b, k2_w, k2_b, k3_w, k3_b,
                              rep, fold, edge_tile=edge_tile)
        # mean aggregation: messages already scaled by 1/deg[tgt] (0 for padding)
        aggr = jax.ops.segment_sum(msg, tgt_pad, num_segments=n_pad)
        h = _node_update_pallas(aggr, h, root, bias2d,
                                node_tile=node_tile, apply_relu=(k != depth - 1))

    h = h[:n]
    return h @ params["fc2_w"] + params["fc2_b"][None, :]


# ----------------------------------------------------------------------------
# pure-JAX reference (semantics of the PyTorch module)
# ----------------------------------------------------------------------------
def ref_forward(params, x, edge_index, edge_attr, depth, width):
    src, tgt = edge_index[0], edge_index[1]
    n = x.shape[0]
    p = params["conv"]

    def conv(h):
        e = jax.nn.relu(edge_attr @ p["k1_w"] + p["k1_b"])
        e = jax.nn.relu(e @ p["k2_w"] + p["k2_b"])
        wflat = e @ p["k3_w"] + p["k3_b"]
        W = wflat.reshape(-1, width, width)
        msg = jnp.einsum("ec,eco->eo", h[src], W)
        summ = jax.ops.segment_sum(msg, tgt, num_segments=n)
        deg = jax.ops.segment_sum(jnp.ones_like(tgt, dtype=h.dtype), tgt, num_segments=n)
        aggr = summ / jnp.maximum(deg, 1.0)[:, None]
        return aggr + h @ p["root"] + p["bias"]

    h = x @ params["fc1_w"] + params["fc1_b"]
    for k in range(depth):
        h = conv(h)
        if k != depth - 1:
            h = jax.nn.relu(h)
    return h @ params["fc2_w"] + params["fc2_b"]


# ----------------------------------------------------------------------------
# deterministic parameter init (PyTorch-Linear-style uniform, synthetic)
# ----------------------------------------------------------------------------
def init_params(key, width_node, width_kernel, ker_in, in_width):
    def lin(k, fan_in, fan_out):
        k1, k2 = jax.random.split(k)
        bound = 1.0 / jnp.sqrt(float(fan_in))
        w = jax.random.uniform(k1, (fan_in, fan_out), jnp.float32, -bound, bound)
        b = jax.random.uniform(k2, (fan_out,), jnp.float32, -bound, bound)
        return w, b

    keys = jax.random.split(key, 8)
    fc1_w, fc1_b = lin(keys[0], in_width, width_node)
    k1_w, k1_b = lin(keys[1], ker_in, width_kernel // 2)
    k2_w, k2_b = lin(keys[2], width_kernel // 2, width_kernel)
    k3_w, k3_b = lin(keys[3], width_kernel, width_node * width_node)
    bound = 1.0 / jnp.sqrt(float(width_node))
    root = jax.random.uniform(keys[4], (width_node, width_node), jnp.float32, -bound, bound)
    bias = jax.random.uniform(keys[5], (width_node,), jnp.float32, -bound, bound)
    fc2_w, fc2_b = lin(keys[6], width_node, 1)
    return {
        "fc1_w": fc1_w, "fc1_b": fc1_b,
        "conv": {"k1_w": k1_w, "k1_b": k1_b,
                 "k2_w": k2_w, "k2_b": k2_b,
                 "k3_w": k3_w, "k3_b": k3_b,
                 "root": root, "bias": bias},
        "fc2_w": fc2_w, "fc2_b": fc2_b,
    }


# ----------------------------------------------------------------------------
if __name__ == "__main__":
    # small config consistent with KernelNN3(width_node=32, width_kernel=64,
    # depth=3, ker_in=6, in_width=1, out_width=1); N/E chosen to exercise padding
    WIDTH_NODE = 32
    WIDTH_KERNEL = 64
    DEPTH = 3
    KER_IN = 6
    IN_WIDTH = 1
    N_NODES = 60
    N_EDGES = 240

    # small demo tiles so the edge grid has >1 step; at Darcy scale use
    # default_edge_tile() (1024 on 64 MiB VMEM parts, 2048 on 128 MiB).
    EDGE_TILE = 128
    NODE_TILE = 32

    key = jax.random.PRNGKey(0)
    k_param, k_x, k_ei, k_ea = jax.random.split(key, 4)

    params = init_params(k_param, WIDTH_NODE, WIDTH_KERNEL, KER_IN, IN_WIDTH)

    x = jax.random.normal(k_x, (N_NODES, IN_WIDTH), jnp.float32)
    edge_index = jax.random.randint(k_ei, (2, N_EDGES), 0, N_NODES, jnp.int32)
    edge_attr = jax.random.normal(k_ea, (N_EDGES, KER_IN), jnp.float32)

    # topology-only preprocessing, built once and reused across forward calls
    graph = prepare_graph(edge_index, edge_attr, N_NODES,
                          edge_tile=EDGE_TILE, node_tile=NODE_TILE)

    out = kernelnn3_forward(params, x, graph["ea"], graph["src"], graph["tgt"],
                            graph["scale"], depth=DEPTH, edge_tile=EDGE_TILE,
                            node_tile=NODE_TILE, n_pad=graph["n_pad"])
    out = jax.block_until_ready(out)

    ref = ref_forward(params, x, edge_index, edge_attr, DEPTH, WIDTH_NODE)
    ref = jax.block_until_ready(ref)

    assert out.shape == (N_NODES, 1), out.shape
    err = float(jnp.max(jnp.abs(out - ref)))
    assert err < 1e-3, f"max abs error {err}"

    print("KERNEL_OK")
</pallas_src>

<mosaic_0001>
module attributes {stable_mosaic.version = 11 : i64} {
  func.func @_node_kernel(%arg0: i32, %arg1: memref<32x32xf32, #tpu.memory_space<vmem>>, %arg2: memref<32x32xf32, #tpu.memory_space<vmem>>, %arg3: memref<32x32xf32, #tpu.memory_space<vmem>>, %arg4: memref<1x32xf32, #tpu.memory_space<vmem>>, %arg5: memref<32x32xf32, #tpu.memory_space<vmem>>) attributes {dimension_semantics = [#tpu.dimension_semantics<parallel>], iteration_bounds = array<i64: 2>, scalar_prefetch = 0 : i64, scratch_operands = 0 : i64, tpu.core_type = #tpu.core_type<tc>, window_params = [{transform_indices = @transform_0, window_bounds = array<i64: 32, 32>}, {transform_indices = @transform_1, window_bounds = array<i64: 32, 32>}, {pipeline_mode = #tpu.pipeline_mode<synchronous>, transform_indices = @transform_2, window_bounds = array<i64: 32, 32>}, {pipeline_mode = #tpu.pipeline_mode<synchronous>, transform_indices = @transform_3, window_bounds = array<i64: 1, 32>}, {transform_indices = @transform_4, window_bounds = array<i64: 32, 32>}]} {
    %c0 = arith.constant 0 : index
    %c0_0 = arith.constant 0 : index
    %0 = vector.load %arg1[%c0, %c0_0] : memref<32x32xf32, #tpu.memory_space<vmem>>, vector<32x32xf32>
    %c0_1 = arith.constant 0 : index
    %c0_2 = arith.constant 0 : index
    %1 = vector.load %arg2[%c0_1, %c0_2] : memref<32x32xf32, #tpu.memory_space<vmem>>, vector<32x32xf32>
    %c0_3 = arith.constant 0 : index
    %c0_4 = arith.constant 0 : index
    %2 = vector.load %arg3[%c0_3, %c0_4] : memref<32x32xf32, #tpu.memory_space<vmem>>, vector<32x32xf32>
    %cst = arith.constant dense<0.000000e+00> : vector<32x32xf32>
    %3 = tpu.matmul %1, %2, %cst {dimension_numbers = #tpu.dot_dimension_numbers<[1], [0], [0], [1], [0, 0, 1, 1], [], []>} : vector<32x32xf32>, vector<32x32xf32>, vector<32x32xf32> -> vector<32x32xf32>
    %4 = arith.addf %0, %3 : vector<32x32xf32>
    %c0_5 = arith.constant 0 : index
    %c0_6 = arith.constant 0 : index
    %5 = vector.load %arg4[%c0_5, %c0_6] : memref<1x32xf32, #tpu.memory_space<vmem>>, vector<1x32xf32>
    %6 = vector.broadcast %5 : vector<1x32xf32> to vector<32x32xf32>
    %7 = arith.addf %4, %6 : vector<32x32xf32>
    %c0_7 = arith.constant 0 : index
    %c0_8 = arith.constant 0 : index
    %8 = vector.load %arg5[%c0_7, %c0_8] : memref<32x32xf32, #tpu.memory_space<vmem>>, vector<32x32xf32>
    tpu.vector_store %arg5[%c0_7, %c0_8], %7 {strides = array<i32>} : memref<32x32xf32, #tpu.memory_space<vmem>>, vector<32x32xf32>,
    return
  }
  func.func @transform_0(%arg0: i32) -> (i32, i32) {
    %c0_i32 = arith.constant 0 : i32
    %c0_i32_0 = arith.constant 0 : i32
    return %arg0, %c0_i32 : i32, i32
  }
  func.func @transform_1(%arg0: i32) -> (i32, i32) {
    %c0_i32 = arith.constant 0 : i32
    %c0_i32_0 = arith.constant 0 : i32
    return %arg0, %c0_i32 : i32, i32
  }
  func.func @transform_2(%arg0: i32) -> (i32, i32) {
    %c0_i32 = arith.constant 0 : i32
    %c0_i32_0 = arith.constant 0 : i32
    %c0_i32_1 = arith.constant 0 : i32
    return %c0_i32, %c0_i32_0 : i32, i32
  }
  func.func @transform_3(%arg0: i32) -> (i32, i32) {
    %c0_i32 = arith.constant 0 : i32
    %c0_i32_0 = arith.constant 0 : i32
    %c0_i32_1 = arith.constant 0 : i32
    return %c0_i32, %c0_i32_0 : i32, i32
  }
  func.func @transform_4(%arg0: i32) -> (i32, i32) {
    %c0_i32 = arith.constant 0 : i32
    %c0_i32_0 = arith.constant 0 : i32
    return %arg0, %c0_i32 : i32, i32
  }
}

module attributes {stable_mosaic.version = 11 : i64} {
  func.func @_node_kernel(%arg0: i32, %arg1: memref<32x32xf32, #tpu.memory_space<vmem>>, %arg2: memref<32x32xf32, #tpu.memory_space<vmem>>, %arg3: memref<32x32xf32, #tpu.memory_space<vmem>>, %arg4: memref<1x32xf32, #tpu.memory_space<vmem>>, %arg5: memref<32x32xf32, #tpu.memory_space<vmem>>) attributes {dimension_semantics = [#tpu.dimension_semantics<parallel>], iteration_bounds = array<i64: 2>, scalar_prefetch = 0 : i64, scratch_operands = 0 : i64, tpu.core_type = #tpu.core_type<tc>, window_params = [{transform_indices = @transform_0, window_bounds = array<i64: 32, 32>}, {transform_indices = @transform_1, window_bounds = array<i64: 32, 32>}, {pipeline_mode = #tpu.pipeline_mode<synchronous>, transform_indices = @transform_2, window_bounds = array<i64: 32, 32>}, {pipeline_mode = #tpu.pipeline_mode<synchronous>, transform_indices = @transform_3, window_bounds = array<i64: 1, 32>}, {transform_indices = @transform_4, window_bounds = array<i64: 32, 32>}]} {
    %c0 = arith.constant 0 : index
    %c0_0 = arith.constant 0 : index
    %0 = vector.load %arg1[%c0, %c0_0] : memref<32x32xf32, #tpu.memory_space<vmem>>, vector<32x32xf32>
    %c0_1 = arith.constant 0 : index
    %c0_2 = arith.constant 0 : index
    %1 = vector.load %arg2[%c0_1, %c0_2] : memref<32x32xf32, #tpu.memory_space<vmem>>, vector<32x32xf32>
    %c0_3 = arith.constant 0 : index
    %c0_4 = arith.constant 0 : index
    %2 = vector.load %arg3[%c0_3, %c0_4] : memref<32x32xf32, #tpu.memory_space<vmem>>, vector<32x32xf32>
    %cst = arith.constant dense<0.000000e+00> : vector<32x32xf32>
    %3 = tpu.matmul %1, %2, %cst {dimension_numbers = #tpu.dot_dimension_numbers<[1], [0], [0], [1], [0, 0, 1, 1], [], []>} : vector<32x32xf32>, vector<32x32xf32>, vector<32x32xf32> -> vector<32x32xf32>
    %4 = arith.addf %0, %3 : vector<32x32xf32>
    %c0_5 = arith.constant 0 : index
    %c0_6 = arith.constant 0 : index
    %5 = vector.load %arg4[%c0_5, %c0_6] : memref<1x32xf32, #tpu.memory_space<vmem>>, vector<1x32xf32>
    %6 = vector.broadcast %5 : vector<1x32xf32> to vector<32x32xf32>
    %7 = arith.addf %4, %6 : vector<32x32xf32>
    %cst_7 = arith.constant 0.000000e+00 : f32
    %8 = vector.broadcast %cst_7 : f32 to vector<32x32xf32>
    %9 = arith.maximumf %7, %8 : vector<32x32xf32>
    %c0_8 = arith.constant 0 : index
    %c0_9 = arith.constant 0 : index
    %10 = vector.load %arg5[%c0_8, %c0_9] : memref<32x32xf32, #tpu.memory_space<vmem>>, vector<32x32xf32>
    tpu.vector_store %arg5[%c0_8, %c0_9], %9 {strides = array<i32>} : memref<32x32xf32, #tpu.memory_space<vmem>>, vector<32x32xf32>,
    return
  }
  func.func @transform_0(%arg0: i32) -> (i32, i32) {
    %c0_i32 = arith.constant 0 : i32
    %c0_i32_0 = arith.constant 0 : i32
    return %arg0, %c0_i32 : i32, i32
  }
  func.func @transform_1(%arg0: i32) -> (i32, i32) {
    %c0_i32 = arith.constant 0 : i32
    %c0_i32_0 = arith.constant 0 : i32
    return %arg0, %c0_i32 : i32, i32
  }
  func.func @transform_2(%arg0: i32) -> (i32, i32) {
    %c0_i32 = arith.constant 0 : i32
    %c0_i32_0 = arith.constant 0 : i32
    %c0_i32_1 = arith.constant 0 : i32
    return %c0_i32, %c0_i32_0 : i32, i32
  }
  func.func @transform_3(%arg0: i32) -> (i32, i32) {
    %c0_i32 = arith.constant 0 : i32
    %c0_i32_0 = arith.constant 0 : i32
    %c0_i32_1 = arith.constant 0 : i32
    return %c0_i32, %c0_i32_0 : i32, i32
  }
  func.func @transform_4(%arg0: i32) -> (i32, i32) {
    %c0_i32 = arith.constant 0 : i32
    %c0_i32_0 = arith.constant 0 : i32
    return %arg0, %c0_i32 : i32, i32
  }
}

module attributes {stable_mosaic.version = 11 : i64} {
  func.func @_msg_kernel(%arg0: i32, %arg1: memref<128x8xf32, #tpu.memory_space<vmem>>, %arg2: memref<128x32xf32, #tpu.memory_space<vmem>>, %arg3: memref<128x1xf32, #tpu.memory_space<vmem>>, %arg4: memref<8x32xf32, #tpu.memory_space<vmem>>, %arg5: memref<1x32xf32, #tpu.memory_space<vmem>>, %arg6: memref<32x64xf32, #tpu.memory_space<vmem>>, %arg7: memref<1x64xf32, #tpu.memory_space<vmem>>, %arg8: memref<64x1024xf32, #tpu.memory_space<vmem>>, %arg9: memref<1x1024xf32, #tpu.memory_space<vmem>>, %arg10: memref<32x1024xf32, #tpu.memory_space<vmem>>, %arg11: memref<1024x32xf32, #tpu.memory_space<vmem>>, %arg12: memref<128x32xf32, #tpu.memory_space<vmem>>) attributes {dimension_semantics = [#tpu.dimension_semantics<parallel>], iteration_bounds = array<i64: 2>, scalar_prefetch = 0 : i64, scratch_operands = 0 : i64, tpu.core_type = #tpu.core_type<tc>, window_params = [{transform_indices = @transform_0, window_bounds = array<i64: 128, 8>}, {transform_indices = @transform_1, window_bounds = array<i64: 128, 32>}, {transform_indices = @transform_2, window_bounds = array<i64: 128, 1>}, {pipeline_mode = #tpu.pipeline_mode<synchronous>, transform_indices = @transform_3, window_bounds = array<i64: 8, 32>}, {pipeline_mode = #tpu.pipeline_mode<synchronous>, transform_indices = @transform_4, window_bounds = array<i64: 1, 32>}, {pipeline_mode = #tpu.pipeline_mode<synchronous>, transform_indices = @transform_5, window_bounds = array<i64: 32, 64>}, {pipeline_mode = #tpu.pipeline_mode<synchronous>, transform_indices = @transform_6, window_bounds = array<i64: 1, 64>}, {pipeline_mode = #tpu.pipeline_mode<synchronous>, transform_indices = @transform_7, window_bounds = array<i64: 64, 1024>}, {pipeline_mode = #tpu.pipeline_mode<synchronous>, transform_indices = @transform_8, window_bounds = array<i64: 1, 1024>}, {pipeline_mode = #tpu.pipeline_mode<synchronous>, transform_indices = @transform_9, window_bounds = array<i64: 32, 1024>}, {pipeline_mode = #tpu.pipeline_mode<synchronous>, transform_indices = @transform_10, window_bounds = array<i64: 1024, 32>}, {transform_indices = @transform_11, window_bounds = array<i64: 128, 32>}]} {
    %c0 = arith.constant 0 : index
    %c0_0 = arith.constant 0 : index
    %0 = vector.load %arg1[%c0, %c0_0] : memref<128x8xf32, #tpu.memory_space<vmem>>, vector<128x8xf32>
    %c0_1 = arith.constant 0 : index
    %c0_2 = arith.constant 0 : index
    %1 = vector.load %arg4[%c0_1, %c0_2] : memref<8x32xf32, #tpu.memory_space<vmem>>, vector<8x32xf32>
    %cst = arith.constant dense<0.000000e+00> : vector<128x32xf32>
    %2 = tpu.matmul %0, %1, %cst {dimension_numbers = #tpu.dot_dimension_numbers<[1], [0], [0], [1], [0, 0, 1, 1], [], []>} : vector<128x8xf32>, vector<8x32xf32>, vector<128x32xf32> -> vector<128x32xf32>
    %c0_3 = arith.constant 0 : index
    %c0_4 = arith.constant 0 : index
    %3 = vector.load %arg5[%c0_3, %c0_4] : memref<1x32xf32, #tpu.memory_space<vmem>>, vector<1x32xf32>
    %4 = vector.broadcast %3 : vector<1x32xf32> to vector<128x32xf32>
    %5 = arith.addf %2, %4 : vector<128x32xf32>
    %cst_5 = arith.constant 0.000000e+00 : f32
    %6 = vector.broadcast %cst_5 : f32 to vector<128x32xf32>
    %7 = arith.maximumf %5, %6 : vector<128x32xf32>
    %c0_6 = arith.constant 0 : index
    %c0_7 = arith.constant 0 : index
    %8 = vector.load %arg6[%c0_6, %c0_7] : memref<32x64xf32, #tpu.memory_space<vmem>>, vector<32x64xf32>
    %cst_8 = arith.constant dense<0.000000e+00> : vector<128x64xf32>
    %9 = tpu.matmul %7, %8, %cst_8 {dimension_numbers = #tpu.dot_dimension_numbers<[1], [0], [0], [1], [0, 0, 1, 1], [], []>} : vector<128x32xf32>, vector<32x64xf32>, vector<128x64xf32> -> vector<128x64xf32>
    %c0_9 = arith.constant 0 : index
    %c0_10 = arith.constant 0 : index
    %10 = vector.load %arg7[%c0_9, %c0_10] : memref<1x64xf32, #tpu.memory_space<vmem>>, vector<1x64xf32>
    %11 = vector.broadcast %10 : vector<1x64xf32> to vector<128x64xf32>
    %12 = arith.addf %9, %11 : vector<128x64xf32>
    %cst_11 = arith.constant 0.000000e+00 : f32
    %13 = vector.broadcast %cst_11 : f32 to vector<128x64xf32>
    %14 = arith.maximumf %12, %13 : vector<128x64xf32>
    %c0_12 = arith.constant 0 : index
    %c0_13 = arith.constant 0 : index
    %15 = vector.load %arg8[%c0_12, %c0_13] : memref<64x1024xf32, #tpu.memory_space<vmem>>, vector<64x1024xf32>
    %cst_14 = arith.constant dense<0.000000e+00> : vector<128x1024xf32>
    %16 = tpu.matmul %14, %15, %cst_14 {dimension_numbers = #tpu.dot_dimension_numbers<[1], [0], [0], [1], [0, 0, 1, 1], [], []>} : vector<128x64xf32>, vector<64x1024xf32>, vector<128x1024xf32> -> vector<128x1024xf32>
    %c0_15 = arith.constant 0 : index
    %c0_16 = arith.constant 0 : index
    %17 = vector.load %arg9[%c0_15, %c0_16] : memref<1x1024xf32, #tpu.memory_space<vmem>>, vector<1x1024xf32>
    %18 = vector.broadcast %17 : vector<1x1024xf32> to vector<128x1024xf32>
    %19 = arith.addf %16, %18 : vector<128x1024xf32>
    %c0_17 = arith.constant 0 : index
    %c0_18 = arith.constant 0 : index
    %20 = vector.load %arg2[%c0_17, %c0_18] : memref<128x32xf32, #tpu.memory_space<vmem>>, vector<128x32xf32>
    %c0_19 = arith.constant 0 : index
    %c0_20 = arith.constant 0 : index
    %21 = vector.load %arg10[%c0_19, %c0_20] : memref<32x1024xf32, #tpu.memory_space<vmem>>, vector<32x1024xf32>
    %cst_21 = arith.constant dense<0.000000e+00> : vector<128x1024xf32>
    %22 = tpu.matmul %20, %21, %cst_21 {dimension_numbers = #tpu.dot_dimension_numbers<[1], [0], [0], [1], [0, 0, 1, 1], [], []>} : vector<128x32xf32>, vector<32x1024xf32>, vector<128x1024xf32> -> vector<128x1024xf32>
    %23 = arith.mulf %22, %19 : vector<128x1024xf32>
    %c0_22 = arith.constant 0 : index
    %c0_23 = arith.constant 0 : index
    %24 = vector.load %arg11[%c0_22, %c0_23] : memref<1024x32xf32, #tpu.memory_space<vmem>>, vector<1024x32xf32>
    %cst_24 = arith.constant dense<0.000000e+00> : vector<128x32xf32>
    %25 = tpu.matmul %23, %24, %cst_24 {dimension_numbers = #tpu.dot_dimension_numbers<[1], [0], [0], [1], [0, 0, 1, 1], [], []>} : vector<128x1024xf32>, vector<1024x32xf32>, vector<128x32xf32> -> vector<128x32xf32>
    %c0_25 = arith.constant 0 : index
    %c0_26 = arith.constant 0 : index
    %26 = vector.load %arg3[%c0_25, %c0_26] : memref<128x1xf32, #tpu.memory_space<vmem>>, vector<128x1xf32>
    %27 = vector.broadcast %26 : vector<128x1xf32> to vector<128x32xf32>
    %28 = arith.mulf %25, %27 : vector<128x32xf32>
    %c0_27 = arith.constant 0 : index
    %c0_28 = arith.constant 0 : index
    %29 = vector.load %arg12[%c0_27, %c0_28] : memref<128x32xf32, #tpu.memory_space<vmem>>, vector<128x32xf32>
    tpu.vector_store %arg12[%c0_27, %c0_28], %28 {strides = array<i32>} : memref<128x32xf32, #tpu.memory_space<vmem>>, vector<128x32xf32>,
    return
  }
  func.func @transform_0(%arg0: i32) -> (i32, i32) {
    %c0_i32 = arith.constant 0 : i32
    %c0_i32_0 = arith.constant 0 : i32
    return %arg0, %c0_i32 : i32, i32
  }
  func.func @transform_1(%arg0: i32) -> (i32, i32) {
    %c0_i32 = arith.constant 0 : i32
    %c0_i32_0 = arith.constant 0 : i32
    return %arg0, %c0_i32 : i32, i32
  }
  func.func @transform_2(%arg0: i32) -> (i32, i32) {
    %c0_i32 = arith.constant 0 : i32
    %c0_i32_0 = arith.constant 0 : i32
    return %arg0, %c0_i32 : i32, i32
  }
  func.func @transform_3(%arg0: i32) -> (i32, i32) {
    %c0_i32 = arith.constant 0 : i32
    %c0_i32_0 = arith.constant 0 : i32
    %c0_i32_1 = arith.constant 0 : i32
    return %c0_i32, %c0_i32_0 : i32, i32
  }
  func.func @transform_4(%arg0: i32) -> (i32, i32) {
    %c0_i32 = arith.constant 0 : i32
    %c0_i32_0 = arith.constant 0 : i32
    %c0_i32_1 = arith.constant 0 : i32
    return %c0_i32, %c0_i32_0 : i32, i32
  }
  func.func @transform_5(%arg0: i32) -> (i32, i32) {
    %c0_i32 = arith.constant 0 : i32
    %c0_i32_0 = arith.constant 0 : i32
    %c0_i32_1 = arith.constant 0 : i32
    return %c0_i32, %c0_i32_0 : i32, i32
  }
  func.func @transform_6(%arg0: i32) -> (i32, i32) {
    %c0_i32 = arith.constant 0 : i32
    %c0_i32_0 = arith.constant 0 : i32
    %c0_i32_1 = arith.constant 0 : i32
    return %c0_i32, %c0_i32_0 : i32, i32
  }
  func.func @transform_7(%arg0: i32) -> (i32, i32) {
    %c0_i32 = arith.constant 0 : i32
    %c0_i32_0 = arith.constant 0 : i32
    %c0_i32_1 = arith.constant 0 : i32
    return %c0_i32, %c0_i32_0 : i32, i32
  }
  func.func @transform_8(%arg0: i32) -> (i32, i32) {
    %c0_i32 = arith.constant 0 : i32
    %c0_i32_0 = arith.constant 0 : i32
    %c0_i32_1 = arith.constant 0 : i32
    return %c0_i32, %c0_i32_0 : i32, i32
  }
  func.func @transform_9(%arg0: i32) -> (i32, i32) {
    %c0_i32 = arith.constant 0 : i32
    %c0_i32_0 = arith.constant 0 : i32
    %c0_i32_1 = arith.constant 0 : i32
    return %c0_i32, %c0_i32_0 : i32, i32
  }
  func.func @transform_10(%arg0: i32) -> (i32, i32) {
    %c0_i32 = arith.constant 0 : i32
    %c0_i32_0 = arith.constant 0 : i32
    %c0_i32_1 = arith.constant 0 : i32
    return %c0_i32, %c0_i32_0 : i32, i32
  }
  func.func @transform_11(%arg0: i32) -> (i32, i32) {
    %c0_i32 = arith.constant 0 : i32
    %c0_i32_0 = arith.constant 0 : i32
    return %arg0, %c0_i32 : i32, i32
  }
}

</mosaic_0001>

<bundles_post_ra>
// kernel: kernelnn3_forward.11
= control target key start
LH: loop header
LB: loop body
LE: loop exit
PB: predicated region body
PF: predicated region fallthrough
CT: control target
= control target key end

     0   :  { %s509_s15 = smov 0   ;;  %s557_s0 = inlined_call_operand.vmem [shape: f32[64,32], index: 0, kind: input, shape index: {}]   ;;  %s558_s1 = inlined_call_operand.vmem [shape: f32[64,32], index: 1, kind: input, shape index: {}]   ;;  %s559_s2 = inlined_call_operand.vmem [shape: f32[32,32], index: 2, kind: input, shape index: {}]   ;;  %s560_s3 = inlined_call_operand.vmem [shape: f32[1,32], index: 3, kind: input, shape index: {}]   ;;  %s561_s4 = inlined_call_operand.vmem [shape: f32[64,32], index: 4, kind: output, shape index: {}]  }
   0x1 LB: > { %s420_s16 = sadd.s32 4294967295, %s482_s15   ;;  %p424_p0 = scmp.ge.s32.totalorder %s482_s15, 1  ;;  %s482_s15 = sphi %s509_s15, %s14_s15  }
   0x2   : > { %p174_p1 = scmp.lt.s32.totalorder %s482_s15, 3 }
   0x4   : > { %p175_p2 = pnand %p424_p0, %p174_p1 }
   0x5   : > { %s425_s21 = sshll.u32 (!%p175_p2), %s420_s16, 2 }
   0x6   : > { %178 = sbr.rel (%p175_p2) target bundleno = 221 (0xdd), region = 36  ;;  %p206_p3 = scmp.lt.s32.totalorder (!%p175_p2), %s425_s21, 7 }
   0xb   : > { %v234_v0 = vld [vmem:[%s559_s2 + $0x18] sm:$0xff]  ;;  %v233_v1 = vld [vmem:[%s559_s2 + $0x10] sm:$0xff]  ;;  %v232_v2 = vld [vmem:[%s559_s2 + $0x8] sm:$0xff]  ;;  %s563_s21 = smov (!%p206_p3, %s425_s21), 7  ;;  %vm235_vm0 = vcmask 261120  }
   0xc   : > { %446 = vmatprep.subr.mxu0 %v234_v0  ;;  %460 = vmatprep.subr.mxu1 %v234_v0  ;;  %v231_v3 = vld [vmem:[%s559_s2] sm:$0xff]  ;;  %s529_s26 = sshll.u32 %s563_s21, 3 }
   0xd   : > { %447 = vmatpush3.msra.mxu0 %v234_v0  ;;  %464 = vmatpush3.msra.mxu1 %v234_v0  ;;  %s215_s29 = scalar_lea.vmem %s558_s1, %s529_s26  ;;  %s209_s6 = scalar_lea.vmem %s557_s0, %s529_s26  ;;  %v435_v17 = vld [vmem:[%s560_s3] ss:$0 sm:$0xff] }
   0xe   : > { %448 = vmatprep.subr.mxu0 %v233_v1  ;;  %461 = vmatprep.subr.mxu1 %v233_v1  ;;  %v227_v4 = vld [vmem:[%s215_s29] sm:$0xff]  ;;  %v229_v5 = vld [vmem:[%s215_s29 + $0x10] sm:$0xff]  ;;  %v228_v6 = vld [vmem:[%s215_s29 + $0x8] sm:$0xff]  ;;  %s221_s11 = scalar_lea.vmem %s561_s4, %s529_s26 }
   0xf   : > { %449 = vmatpush3.msra.mxu0 %v233_v1  ;;  %465 = vmatpush3.msra.mxu1 %v233_v1  ;;  %v230_v7 = vld [vmem:[%s215_s29 + $0x18] sm:$0xff]  ;;  %v224_v8 = vld [vmem:[%s209_s6 + $0x8] sm:$0xff]  ;;  %v223_v11 = vld [vmem:[%s209_s6] sm:$0xff] }
  0x10   : > { %450 = vmatprep.subr.mxu0 %v232_v2  ;;  %462 = vmatprep.subr.mxu1 %v232_v2  ;;  %v225_v12 = vld [vmem:[%s209_s6 + $0x10] sm:$0xff]  ;;  %v226_v13 = vld [vmem:[%s209_s6 + $0x18] sm:$0xff] }
  0x11   : > { %451 = vmatpush3.msra.mxu0 %v232_v2  ;;  %466 = vmatpush3.msra.mxu1 %v232_v2 }
  0x12   : > { %452 = vmatprep.subr.mxu0 %v231_v3  ;;  %463 = vmatprep.subr.mxu1 %v231_v3 }
  0x13   : > { %453 = vmatpush3.msra.mxu0 %v231_v3  ;;  %467 = vmatpush3.msra.mxu1 %v231_v3 }
  0x14   : > { %454 = vmatprep.mubr.msk.f32.mxu0 %vm235_vm0, %v227_v4  ;;  %457 = vmatprep.mubr.msk.f32.mxu1 %vm235_vm0, %v229_v5 }
  0x15   : > { %455 = vmatmul.mubr.msk.f32.vlgmr.msra.gmra.mxu0 %vm235_vm0, %v228_v6  ;;  %458 = vmatmul.mubr.msk.f32.vlgmr.msra.gmra.mxu1 %vm235_vm0, %v230_v7 }
  0xd5   : > { %v456_v9 = vpop.f32.mrf.mxu0  ;;  %v459_v10 = vpop.f32.mrf.mxu1 }
  0xd6   : > { %v334_v14 = vadd.f32 %v456_v9, %v224_v8  ;;  %v336_v20 = vadd.f32 %v459_v10, %v226_v13 }
  0xd7   : > { %v314_v15 = vpop.f32.mrf.mxu0  ;;  %v324_v16 = vpop.f32.mrf.mxu1 }
  0xd8   : > { %v333_v18 = vadd.f32 %v314_v15, %v223_v11  ;;  %v335_v19 = vadd.f32 %v324_v16, %v225_v12  ;;  %v345_v22 = vadd.f32 %v435_v17, %v334_v14  ;;  %v347_v24 = vadd.f32 %v435_v17, %v336_v20 }
  0xda   : > { %v344_v21 = vadd.f32 %v435_v17, %v333_v18  ;;  %v346_v23 = vadd.f32 %v435_v17, %v335_v19  ;;  %349 = vst.msk [vmem:[%s221_s11 + $0x8] sm:$0xff] %vm235_vm0, %v345_v22  ;;  %351 = vst.msk [vmem:[%s221_s11 + $0x18] sm:$0xff] %vm235_vm0, %v347_v24 }
  0xdc   : > { %348 = vst.msk [vmem:[%s221_s11] sm:$0xff] %vm235_vm0, %v344_v21  ;;  %350 = vst.msk [vmem:[%s221_s11 + $0x10] sm:$0xff] %vm235_vm0, %v346_v23 }
  0xdd PF: > { %s14_s15 = sadd.s32 1, %s482_s15  }
  0xde   : > { %p11_p4 = scmp.ge.s32.totalorder %s14_s15, 4  }
  0xe0   :  { %13 = sbr.rel (!%p11_p4) target bundleno = 1 (0x1), region = 69 }

// kernel: kernelnn3_forward.7
= control target key start
LH: loop header
LB: loop body
LE: loop exit
PB: predicated region body
PF: predicated region fallthrough
CT: control target
= control target key end

     0   :  { %s513_s15 = smov 0   ;;  %s561_s0 = inlined_call_operand.vmem [shape: f32[64,32], index: 0, kind: input, shape index: {}]   ;;  %s562_s1 = inlined_call_operand.vmem [shape: f32[64,32], index: 1, kind: input, shape index: {}]   ;;  %s563_s2 = inlined_call_operand.vmem [shape: f32[32,32], index: 2, kind: input, shape index: {}]   ;;  %s564_s3 = inlined_call_operand.vmem [shape: f32[1,32], index: 3, kind: input, shape index: {}]   ;;  %s565_s4 = inlined_call_operand.vmem [shape: f32[64,32], index: 4, kind: output, shape index: {}]  }
   0x1 LB: > { %s424_s16 = sadd.s32 4294967295, %s486_s15   ;;  %p428_p0 = scmp.ge.s32.totalorder %s486_s15, 1  ;;  %s486_s15 = sphi %s513_s15, %s14_s15  }
   0x2   : > { %p174_p1 = scmp.lt.s32.totalorder %s486_s15, 3 }
   0x4   : > { %p175_p2 = pnand %p428_p0, %p174_p1 }
   0x5   : > { %s429_s21 = sshll.u32 (!%p175_p2), %s424_s16, 2 }
   0x6   : > { %178 = sbr.rel (%p175_p2) target bundleno = 223 (0xdf), region = 36  ;;  %p206_p3 = scmp.lt.s32.totalorder (!%p175_p2), %s429_s21, 7 }
   0xb   : > { %v234_v0 = vld [vmem:[%s563_s2 + $0x18] sm:$0xff]  ;;  %v233_v1 = vld [vmem:[%s563_s2 + $0x10] sm:$0xff]  ;;  %v232_v2 = vld [vmem:[%s563_s2 + $0x8] sm:$0xff]  ;;  %s567_s21 = smov (!%p206_p3, %s429_s21), 7  ;;  %vm235_vm0 = vcmask 261120  }
   0xc   : > { %450 = vmatprep.subr.mxu0 %v234_v0  ;;  %464 = vmatprep.subr.mxu1 %v234_v0  ;;  %v231_v3 = vld [vmem:[%s563_s2] sm:$0xff]  ;;  %s533_s26 = sshll.u32 %s567_s21, 3 }
   0xd   : > { %451 = vmatpush3.msra.mxu0 %v234_v0  ;;  %468 = vmatpush3.msra.mxu1 %v234_v0  ;;  %s215_s29 = scalar_lea.vmem %s562_s1, %s533_s26  ;;  %s209_s6 = scalar_lea.vmem %s561_s0, %s533_s26  ;;  %v439_v15 = vld [vmem:[%s564_s3] ss:$0 sm:$0xff] }
   0xe   : > { %452 = vmatprep.subr.mxu0 %v233_v1  ;;  %465 = vmatprep.subr.mxu1 %v233_v1  ;;  %v227_v4 = vld [vmem:[%s215_s29] sm:$0xff]  ;;  %v229_v5 = vld [vmem:[%s215_s29 + $0x10] sm:$0xff]  ;;  %v228_v6 = vld [vmem:[%s215_s29 + $0x8] sm:$0xff]  ;;  %s221_s11 = scalar_lea.vmem %s565_s4, %s533_s26 }
   0xf   : > { %453 = vmatpush3.msra.mxu0 %v233_v1  ;;  %469 = vmatpush3.msra.mxu1 %v233_v1  ;;  %v230_v7 = vld [vmem:[%s215_s29 + $0x18] sm:$0xff]  ;;  %v224_v8 = vld [vmem:[%s209_s6 + $0x8] sm:$0xff]  ;;  %v223_v12 = vld [vmem:[%s209_s6] sm:$0xff] }
  0x10   : > { %454 = vmatprep.subr.mxu0 %v232_v2  ;;  %466 = vmatprep.subr.mxu1 %v232_v2  ;;  %v226_v9 = vld [vmem:[%s209_s6 + $0x18] sm:$0xff]  ;;  %v225_v13 = vld [vmem:[%s209_s6 + $0x10] sm:$0xff] }
  0x11   : > { %455 = vmatpush3.msra.mxu0 %v232_v2  ;;  %470 = vmatpush3.msra.mxu1 %v232_v2 }
  0x12   : > { %456 = vmatprep.subr.mxu0 %v231_v3  ;;  %467 = vmatprep.subr.mxu1 %v231_v3 }
  0x13   : > { %457 = vmatpush3.msra.mxu0 %v231_v3  ;;  %471 = vmatpush3.msra.mxu1 %v231_v3 }
  0x14   : > { %458 = vmatprep.mubr.msk.f32.mxu0 %vm235_vm0, %v227_v4  ;;  %461 = vmatprep.mubr.msk.f32.mxu1 %vm235_vm0, %v229_v5 }
  0x15   : > { %459 = vmatmul.mubr.msk.f32.vlgmr.msra.gmra.mxu0 %vm235_vm0, %v228_v6  ;;  %462 = vmatmul.mubr.msk.f32.vlgmr.msra.gmra.mxu1 %vm235_vm0, %v230_v7 }
  0xd5   : > { %v460_v10 = vpop.f32.mrf.mxu0  ;;  %v463_v11 = vpop.f32.mrf.mxu1 }
  0xd6   : > { %v334_v14 = vadd.f32 %v460_v10, %v224_v8  ;;  %v336_v16 = vadd.f32 %v463_v11, %v226_v9 }
  0xd7   : > { %v314_v17 = vpop.f32.mrf.mxu0  ;;  %v324_v18 = vpop.f32.mrf.mxu1 }
  0xd8   : > { %v333_v19 = vadd.f32 %v314_v17, %v223_v12  ;;  %v335_v20 = vadd.f32 %v324_v18, %v225_v13  ;;  %v345_v21 = vadd.f32 %v439_v15, %v334_v14  ;;  %v347_v24 = vadd.f32 %v439_v15, %v336_v16 }
  0xda   : > { %v344_v22 = vadd.f32 %v439_v15, %v333_v19  ;;  %v346_v23 = vadd.f32 %v439_v15, %v335_v20  ;;  %v349_v26 = vmax.f32 %v345_v21, 0.0  ;;  %v351_v28 = vmax.f32 %v347_v24, 0.0 }
  0xdc   : > { %v348_v25 = vmax.f32 %v344_v22, 0.0  ;;  %v350_v27 = vmax.f32 %v346_v23, 0.0  ;;  %353 = vst.msk [vmem:[%s221_s11 + $0x8] sm:$0xff] %vm235_vm0, %v349_v26  ;;  %355 = vst.msk [vmem:[%s221_s11 + $0x18] sm:$0xff] %vm235_vm0, %v351_v28 }
  0xde   : > { %352 = vst.msk [vmem:[%s221_s11] sm:$0xff] %vm235_vm0, %v348_v25  ;;  %354 = vst.msk [vmem:[%s221_s11 + $0x10] sm:$0xff] %vm235_vm0, %v350_v27 }
  0xdf PF: > { %s14_s15 = sadd.s32 1, %s486_s15  }
  0xe0   : > { %p11_p4 = scmp.ge.s32.totalorder %s14_s15, 4  }
  0xe2   :  { %13 = sbr.rel (!%p11_p4) target bundleno = 1 (0x1), region = 69 }

// kernel: kernelnn3_forward.6
= control target key start
LH: loop header
LB: loop body
LE: loop exit
PB: predicated region body
PF: predicated region fallthrough
CT: control target
= control target key end

     0   :  { %s4146_s17 = smov 0   ;;  %s6209_s0 = inlined_call_operand.vmem [shape: f32[256,8], index: 0, kind: input, shape index: {}]   ;;  %s6210_s1 = inlined_call_operand.vmem [shape: f32[256,32], index: 1, kind: input, shape index: {}]   ;;  %s6211_s2 = inlined_call_operand.vmem [shape: f32[256,1], index: 2, kind: input, shape index: {}]   ;;  %s6212_s3 = inlined_call_operand.vmem [shape: f32[8,32], index: 3, kind: input, shape index: {}]   ;;  %s6213_s4 = inlined_call_operand.vmem [shape: f32[1,32], index: 4, kind: input, shape index: {}]   ;;  %s6214_s5 = inlined_call_operand.vmem [shape: f32[32,64], index: 5, kind: input, shape index: {}]   ;;  %s6215_s6 = inlined_call_operand.vmem [shape: f32[1,64], index: 6, kind: input, shape index: {}]   ;;  %s6216_s7 = inlined_call_operand.vmem [shape: f32[64,1024], index: 7, kind: input, shape index: {}]   ;;  %s6217_s8 = inlined_call_operand.vmem [shape: f32[1,1024], index: 8, kind: input, shape index: {}]   ;;  %s6218_s9 = inlined_call_operand.vmem [shape: f32[32,1024], index: 9, kind: input, shape index: {}]   ;;  %s6219_s10 = inlined_call_operand.vmem [shape: f32[1024,32], index: 10, kind: input, shape index: {}]   ;;  %s6220_s11 = inlined_call_operand.vmem [shape: f32[256,32], index: 11, kind: output, shape index: {}]  }
   0x1 LB: > { %s3472_s18 = sadd.s32 4294967295, %s4082_s17   ;;  %p3476_p0 = scmp.ge.s32.totalorder %s4082_s17, 1  ;;  %s4082_s17 = sphi %s4146_s17, %s21_s17  }
   0x2   : > { %p360_p1 = scmp.lt.s32.totalorder %s4082_s17, 3 }
   0x4   : > { %p361_p2 = pnand %p3476_p0, %p360_p1 }
   0x6   : > { %364 = sbr.rel (%p361_p2) target bundleno = 1072 (0x430), region = 64 }
   0xb   : > { %v450_v0 = vld [vmem:[%s6212_s3] sm:$0xff]  ;;  %s3477_s21 = sshll.u32 %s3472_s18, 4  ;;  %vm458_vm0 = vcmask 64512   ;;  %v671_v17 = vld [vmem:[%s6214_s5 + $0x18] sm:$0xff]  ;;  %v670_v18 = vld [vmem:[%s6214_s5 + $0x10] sm:$0xff]  ;;  %vm679_vm1 = vcmask 261120  }
   0xc   : > { %4006 = vmatprep.subr.mxu0 %v450_v0  ;;  %p411_p3 = scmp.lt.s32.totalorder %s3477_s21, 31  ;;  %4032 = vmatprep.subr.mxu1 %v671_v17  ;;  %v669_v19 = vld [vmem:[%s6214_s5 + $0x8] sm:$0xff]  ;;  %v668_v20 = vld [vmem:[%s6214_s5] sm:$0xff]  ;;  %v948_v23 = vld [vmem:[%s6216_s7 + $0x1d8] sm:$0xff]  ;;  %vm995_vm2 = vcmask 523264  }
   0xd   : > { %4007 = vmatpush3.msra.mxu0 %v450_v0  ;;  %4033 = vmatpush3.msra.mxu1 %v671_v17  ;;  %v946_v21 = vld [vmem:[%s6216_s7 + $0x1c8] sm:$0xff]  ;;  %v945_v22 = vld [vmem:[%s6216_s7 + $0x1c0] sm:$0xff]  ;;  %v947_v46 = vld [vmem:[%s6216_s7 + $0x1d0] sm:$0xff] }
   0xe   : > { %s6426_s21 = smov (!%p411_p3, %s3477_s21), 31  ;;  %4034 = vmatprep.subr.mxu1 %v670_v18  ;;  %1060 = vmatprep.subr.mxu0 %v946_v21  ;;  %v938_v24 = vld [vmem:[%s6216_s7 + $0x188] sm:$0xff]  ;;  %v937_v25 = vld [vmem:[%s6216_s7 + $0x180] sm:$0xff]  ;;  %v940_v48 = vld [vmem:[%s6216_s7 + $0x198] sm:$0xff] }
   0xf   : > { %s4157_s22 = sshll.u32 %s6426_s21, 3  ;;  %4035 = vmatpush3.msra.mxu1 %v670_v18  ;;  %v930_v26 = vld [vmem:[%s6216_s7 + $0x148] sm:$0xff]  ;;  %v929_v27 = vld [vmem:[%s6216_s7 + $0x140] sm:$0xff]  ;;  %v939_v51 = vld [vmem:[%s6216_s7 + $0x190] sm:$0xff] }
  0x10   : > { %s4163_s25 = scalar_lea.vmem %s6209_s0, %s4157_s22  ;;  %4036 = vmatprep.subr.mxu1 %v669_v19  ;;  %v922_v28 = vld [vmem:[%s6216_s7 + $0x108] sm:$0xff]  ;;  %v921_v29 = vld [vmem:[%s6216_s7 + $0x100] sm:$0xff]  ;;  %v932_v54 = vld [vmem:[%s6216_s7 + $0x158] sm:$0xff]  ;;  %s4737_s15 = scalar_lea.vmem %s6210_s1, %s4157_s22 }
  0x11   : > { %v434_v1 = vld [vmem:[%s4163_s25] sm:$0xff]  ;;  %v435_v2 = vld [vmem:[%s4163_s25 + $0x8] sm:$0xff]  ;;  %v436_v3 = vld [vmem:[%s4163_s25 + $0x10] sm:$0xff]  ;;  %4037 = vmatpush3.msra.mxu1 %v669_v19  ;;  %s5514_s30 = scalar_lea.vmem %s6211_s2, %s4157_s22  ;;  %s6120_s27 = scalar_lea.vmem %s6220_s11, %s4157_s22 }
  0x12   : > { %4008 = vmatprep.mubr.msk.f32.mxu0 %vm458_vm0, %v434_v1  ;;  %v437_v4 = vld [vmem:[%s4163_s25 + $0x18] sm:$0xff]  ;;  %v438_v5 = vld [vmem:[%s4163_s25 + $0x20] sm:$0xff]  ;;  %v439_v6 = vld [vmem:[%s4163_s25 + $0x28] sm:$0xff]  ;;  %4038 = vmatprep.subr.mxu1 %v668_v20 }
  0x13   : > { %4009 = vmatmul.mubr.msk.f32.vlgmr.msra.gmra.mxu0 %vm458_vm0, %v435_v2  ;;  %v440_v7 = vld [vmem:[%s4163_s25 + $0x30] sm:$0xff]  ;;  %v441_v8 = vld [vmem:[%s4163_s25 + $0x38] sm:$0xff]  ;;  %v442_v9 = vld [vmem:[%s4163_s25 + $0x40] sm:$0xff]  ;;  %4039 = vmatpush3.msra.mxu1 %v668_v20 }
  0x14   : > { %4011 = vmatprep.mubr.msk.f32.mxu0 %vm458_vm0, %v436_v3  ;;  %v443_v10 = vld [vmem:[%s4163_s25 + $0x48] sm:$0xff]  ;;  %v444_v11 = vld [vmem:[%s4163_s25 + $0x50] sm:$0xff]  ;;  %v445_v12 = vld [vmem:[%s4163_s25 + $0x58] sm:$0xff]  ;;  %1221 = vmatprep.subr.mxu1 %v948_v23 }
  0x15   : > { %v446_v13 = vld [vmem:[%s4163_s25 + $0x60] sm:$0xff]  ;;  %v447_v14 = vld [vmem:[%s4163_s25 + $0x68] sm:$0xff]  ;;  %v448_v15 = vld [vmem:[%s4163_s25 + $0x70] sm:$0xff]  ;;  %1061 = vmatpush1.msra.mxu0 %v945_v22 }
  0x16   : > { %v449_v16 = vld [vmem:[%s4163_s25 + $0x78] sm:$0xff]  ;;  %1062 = vmatprep.subr.mxu0 %v938_v24  ;;  %v914_v30 = vld [vmem:[%s6216_s7 + $0xc8] sm:$0xff]  ;;  %v913_v31 = vld [vmem:[%s6216_s7 + $0xc0] sm:$0xff] }
  0x17   : > { %4012 = vmatmul.mubr.msk.f32.gmra.mxu0 %vm458_vm0, %v437_v4  ;;  %v906_v32 = vld [vmem:[%s6216_s7 + $0x88] sm:$0xff]  ;;  %v905_v33 = vld [vmem:[%s6216_s7 + $0x80] sm:$0xff]  ;;  %v931_v56 = vld [vmem:[%s6216_s7 + $0x150] sm:$0xff] }
  0x18   : > { %4014 = vmatprep.mubr.msk.f32.mxu0 %vm458_vm0, %v438_v5  ;;  %1063 = vmatpush1.msra.mxu0 %v937_v25  ;;  %v898_v34 = vld [vmem:[%s6216_s7 + $0x48] sm:$0xff]  ;;  %v897_v35 = vld [vmem:[%s6216_s7 + $0x40] sm:$0xff]  ;;  %v924_v58 = vld [vmem:[%s6216_s7 + $0x118] sm:$0xff] }
  0x19   : > { %1064 = vmatprep.subr.mxu0 %v930_v26  ;;  %v4257_v36 = vld [vmem:[%s6213_s4] ss:$0 sm:$0xff]  ;;  %v923_v61 = vld [vmem:[%s6216_s7 + $0x110] sm:$0xff]  ;;  %v916_v0 = vld [vmem:[%s6216_s7 + $0xd8] sm:$0xff] }
  0x1a   : > { %1065 = vmatpush1.msra.mxu0 %v929_v27  ;;  %v915_v2 = vld [vmem:[%s6216_s7 + $0xd0] sm:$0xff]  ;;  %v908_v4 = vld [vmem:[%s6216_s7 + $0x98] sm:$0xff] }
  0x1b   : > { %4015 = vmatmul.mubr.msk.f32.gmra.mxu0 %vm458_vm0, %v439_v6  ;;  %1066 = vmatprep.subr.mxu0 %v922_v28 }
  0x1c   : > { %4017 = vmatprep.mubr.msk.f32.mxu0 %vm458_vm0, %v440_v7  ;;  %1067 = vmatpush1.msra.mxu0 %v921_v29  ;;  %v907_v7 = vld [vmem:[%s6216_s7 + $0x90] sm:$0xff] }
  0x1d   : > { %1068 = vmatprep.subr.mxu0 %v914_v30 }
  0x1e   : > { %1069 = vmatpush1.msra.mxu0 %v913_v31 }
  0x1f   : > { %4018 = vmatmul.mubr.msk.f32.gmra.mxu0 %vm458_vm0, %v441_v8  ;;  %1070 = vmatprep.subr.mxu0 %v906_v32  ;;  %v900_v32 = vld [vmem:[%s6216_s7 + $0x58] sm:$0xff] }
  0x20   : > { %4020 = vmatprep.mubr.msk.f32.mxu0 %vm458_vm0, %v442_v9  ;;  %1071 = vmatpush1.msra.mxu0 %v905_v33  ;;  %v899_v33 = vld [vmem:[%s6216_s7 + $0x50] sm:$0xff] }
  0x21   : > { %1072 = vmatprep.subr.mxu0 %v898_v34  ;;  %v890_v34 = vld [vmem:[%s6216_s7 + $0x8] sm:$0xff] }
  0x22   : > { %1073 = vmatpush1.msra.mxu0 %v897_v35  ;;  %v892_v35 = vld [vmem:[%s6216_s7 + $0x18] sm:$0xff] }
  0x23   : > { %4021 = vmatmul.mubr.msk.f32.gmra.mxu0 %vm458_vm0, %v443_v10  ;;  %1074 = vmatprep.subr.mxu0 %v890_v34  ;;  %v893_v34 = vld [vmem:[%s6216_s7 + $0x20] sm:$0xff] }
  0x24   : > { %4023 = vmatprep.mubr.msk.f32.mxu0 %vm458_vm0, %v444_v11 }
  0x27   : > { %4024 = vmatmul.mubr.msk.f32.gmra.mxu0 %vm458_vm0, %v445_v12 }
  0x28   : > { %4026 = vmatprep.mubr.msk.f32.mxu0 %vm458_vm0, %v446_v13 }
  0x2b   : > { %4027 = vmatmul.mubr.msk.f32.gmra.mxu0 %vm458_vm0, %v447_v14 }
  0x2c   : > { %4029 = vmatprep.mubr.msk.f32.mxu0 %vm458_vm0, %v448_v15 }
  0x2f   : > { %4030 = vmatmul.mubr.msk.f32.gmra.mxu0 %vm458_vm0, %v449_v16 }
  0xd3   : > { %v4010_v37 = vpop.f32.mrf.mxu0 }
  0xd4   : > { %v579_v38 = vadd.f32 %v4010_v37, %v4257_v36  ;;  %v891_v37 = vld [vmem:[%s6216_s7 + $0x10] sm:$0xff] }
  0xd5   : > { %v573_v39 = vpop.f32.mrf.mxu0 }
  0xd6   : > { %v574_v40 = vadd.f32 %v4257_v36, %v573_v39  ;;  %v653_v44 = vmax.f32 %v579_v38, 0.0  ;;  %v4084_v38 = vmov 0.0   ;;  %v950_v39 = vld [vmem:[%s6216_s7 + $0x1e8] sm:$0xff] }
  0xd7   : > { %v4013_v41 = vpop.f32.mrf.mxu0  ;;  %1108 = vmatprep.mubr.f32.mxu0 %v4084_v38 }
  0xd8   : > { %v589_v42 = vadd.f32 %v4013_v41, %v4257_v36  ;;  %v652_v43 = vmax.f32 %v574_v40, 0.0  ;;  %v952_v40 = vld [vmem:[%s6216_s7 + $0x1f8] sm:$0xff] }
  0xd9   : > { %v583_v45 = vpop.f32.mrf.mxu0 }
  0xda   : > { %v584_v47 = vadd.f32 %v4257_v36, %v583_v45  ;;  %4040 = vmatprep.mubr.msk.f32.mxu1 %vm679_vm1, %v652_v43  ;;  %v655_v49 = vmax.f32 %v589_v42, 0.0  ;;  %v4353_v42 = vld [vmem:[%s6215_s6] ss:$0 sm:$0xff] }
  0xdb   : > { %4041 = vmatmul.mubr.msk.f32.vlgmr.msra.gmra.mxu1 %vm679_vm1, %v653_v44  ;;  %v4016_v50 = vpop.f32.mrf.mxu0 }
  0xdc   : > { %v654_v52 = vmax.f32 %v584_v47, 0.0  ;;  %v599_v53 = vadd.f32 %v4016_v50, %v4257_v36  ;;  %1222 = vmatpush1.msra.mxu1 %v947_v46 }
  0xdd   : > { %v593_v55 = vpop.f32.mrf.mxu0  ;;  %1223 = vmatprep.subr.mxu1 %v940_v48  ;;  %v949_v48 = vld [vmem:[%s6216_s7 + $0x1e0] sm:$0xff] }
  0xde   : > { %4043 = vmatprep.mubr.msk.f32.mxu1 %vm679_vm1, %v654_v52  ;;  %v594_v57 = vadd.f32 %v4257_v36, %v593_v55  ;;  %1224 = vmatpush1.msra.mxu1 %v939_v51  ;;  %v657_v59 = vmax.f32 %v599_v53, 0.0  ;;  %v942_v51 = vld [vmem:[%s6216_s7 + $0x1a8] sm:$0xff]  ;;  %v944_v52 = vld [vmem:[%s6216_s7 + $0x1b8] sm:$0xff] }
  0xdf   : > { %4044 = vmatmul.mubr.msk.f32.gmra.mxu1 %vm679_vm1, %v655_v49  ;;  %v4019_v60 = vpop.f32.mrf.mxu0  ;;  %1225 = vmatprep.subr.mxu1 %v932_v54  ;;  %v951_v49 = vld [vmem:[%s6216_s7 + $0x1f0] sm:$0xff] }
  0xe0   : > { %v656_v62 = vmax.f32 %v594_v57, 0.0  ;;  %v609_v63 = vadd.f32 %v4019_v60, %v4257_v36  ;;  %1226 = vmatpush1.msra.mxu1 %v931_v56  ;;  %v941_v56 = vld [vmem:[%s6216_s7 + $0x1a0] sm:$0xff]  ;;  %v943_v57 = vld [vmem:[%s6216_s7 + $0x1b0] sm:$0xff] }
  0xe1   : > { %v603_v1 = vpop.f32.mrf.mxu0  ;;  %1227 = vmatprep.subr.mxu1 %v924_v58  ;;  %v934_v58 = vld [vmem:[%s6216_s7 + $0x168] sm:$0xff] }
  0xe2   : > { %4046 = vmatprep.mubr.msk.f32.mxu1 %vm679_vm1, %v656_v62  ;;  %v604_v3 = vadd.f32 %v4257_v36, %v603_v1  ;;  %1228 = vmatpush1.msra.mxu1 %v923_v61  ;;  %v659_v5 = vmax.f32 %v609_v63, 0.0  ;;  %v933_v63 = vld [vmem:[%s6216_s7 + $0x160] sm:$0xff]  ;;  %v926_v1 = vld [vmem:[%s6216_s7 + $0x128] sm:$0xff] }
  0xe3   : > { %4047 = vmatmul.mubr.msk.f32.gmra.mxu1 %vm679_vm1, %v657_v59  ;;  %v4022_v6 = vpop.f32.mrf.mxu0  ;;  %1229 = vmatprep.subr.mxu1 %v916_v0  ;;  %v936_v59 = vld [vmem:[%s6216_s7 + $0x178] sm:$0xff]  ;;  %v935_v0 = vld [vmem:[%s6216_s7 + $0x170] sm:$0xff] }
  0xe4   : > { %v658_v8 = vmax.f32 %v604_v3, 0.0  ;;  %v619_v9 = vadd.f32 %v4022_v6, %v4257_v36  ;;  %1230 = vmatpush1.msra.mxu1 %v915_v2  ;;  %v928_v2 = vld [vmem:[%s6216_s7 + $0x138] sm:$0xff]  ;;  %v925_v6 = vld [vmem:[%s6216_s7 + $0x120] sm:$0xff] }
  0xe5   : > { %v613_v10 = vpop.f32.mrf.mxu0  ;;  %1231 = vmatprep.subr.mxu1 %v908_v4 }
  0xe6   : > { %4049 = vmatprep.mubr.msk.f32.mxu1 %vm679_vm1, %v658_v8  ;;  %v614_v11 = vadd.f32 %v4257_v36, %v613_v10  ;;  %1232 = vmatpush1.msra.mxu1 %v907_v7  ;;  %v661_v12 = vmax.f32 %v619_v9, 0.0  ;;  %v927_v7 = vld [vmem:[%s6216_s7 + $0x130] sm:$0xff]  ;;  %v918_v8 = vld [vmem:[%s6216_s7 + $0xe8] sm:$0xff]  ;;  %v920_v9 = vld [vmem:[%s6216_s7 + $0xf8] sm:$0xff] }
  0xe7   : > { %4050 = vmatmul.mubr.msk.f32.gmra.mxu1 %vm679_vm1, %v659_v5  ;;  %v4025_v13 = vpop.f32.mrf.mxu0  ;;  %1233 = vmatprep.subr.mxu1 %v900_v32 }
  0xe8   : > { %v660_v14 = vmax.f32 %v614_v11, 0.0  ;;  %v629_v15 = vadd.f32 %v4025_v13, %v4257_v36  ;;  %1234 = vmatpush1.msra.mxu1 %v899_v33  ;;  %v917_v13 = vld [vmem:[%s6216_s7 + $0xe0] sm:$0xff] }
  0xe9   : > { %v623_v16 = vpop.f32.mrf.mxu0  ;;  %1235 = vmatprep.subr.mxu1 %v892_v35  ;;  %v895_v35 = vld [vmem:[%s6216_s7 + $0x30] sm:$0xff] }
  0xea   : > { %4052 = vmatprep.mubr.msk.f32.mxu1 %vm679_vm1, %v660_v14  ;;  %v624_v17 = vadd.f32 %v4257_v36, %v623_v16  ;;  %v663_v18 = vmax.f32 %v629_v15, 0.0  ;;  %1236 = vmatpush1.msra.mxu1 %v891_v37  ;;  %v919_v14 = vld [vmem:[%s6216_s7 + $0xf0] sm:$0xff]  ;;  %v910_v15 = vld [vmem:[%s6216_s7 + $0xa8] sm:$0xff]  ;;  %v912_v16 = vld [vmem:[%s6216_s7 + $0xb8] sm:$0xff] }
  0xeb   : > { %4053 = vmatmul.mubr.msk.f32.gmra.mxu1 %vm679_vm1, %v661_v12  ;;  %v4028_v19 = vpop.f32.mrf.mxu0  ;;  %1543 = vmatprep.subr.mxu1 %v952_v40  ;;  %v1731_v37 = vld [vmem:[%s6218_s9 + $0xd8] sm:$0xff] }
  0xec   : > { %v662_v20 = vmax.f32 %v624_v17, 0.0  ;;  %v639_v21 = vadd.f32 %v4028_v19, %v4257_v36 }
  0xed   : > { %v633_v22 = vpop.f32.mrf.mxu0 }
  0xee   : > { %4055 = vmatprep.mubr.msk.f32.mxu1 %vm679_vm1, %v662_v20  ;;  %v634_v23 = vadd.f32 %v4257_v36, %v633_v22  ;;  %v665_v24 = vmax.f32 %v639_v21, 0.0  ;;  %v909_v20 = vld [vmem:[%s6216_s7 + $0xa0] sm:$0xff]  ;;  %v911_v21 = vld [vmem:[%s6216_s7 + $0xb0] sm:$0xff]  ;;  %v902_v22 = vld [vmem:[%s6216_s7 + $0x68] sm:$0xff] }
  0xef   : > { %4056 = vmatmul.mubr.msk.f32.gmra.mxu1 %vm679_vm1, %v663_v18  ;;  %v4031_v25 = vpop.f32.mrf.mxu0 }
  0xf0   : > { %v664_v26 = vmax.f32 %v634_v23, 0.0  ;;  %v649_v27 = vadd.f32 %v4031_v25, %v4257_v36  ;;  %v904_v23 = vld [vmem:[%s6216_s7 + $0x78] sm:$0xff] }
  0xf1   : > { %v643_v28 = vpop.f32.mrf.mxu0 }
  0xf2   : > { %4058 = vmatprep.mubr.msk.f32.mxu1 %vm679_vm1, %v664_v26  ;;  %v644_v29 = vadd.f32 %v4257_v36, %v643_v28  ;;  %v667_v30 = vmax.f32 %v649_v27, 0.0  ;;  %v889_v36 = vld [vmem:[%s6216_s7] sm:$0xff]  ;;  %v903_v28 = vld [vmem:[%s6216_s7 + $0x70] sm:$0xff] }
  0xf3   : > { %4059 = vmatmul.mubr.msk.f32.gmra.mxu1 %vm679_vm1, %v665_v24  ;;  %1075 = vmatpush1.msra.mxu0 %v889_v36  ;;  %v901_v27 = vld [vmem:[%s6216_s7 + $0x60] sm:$0xff]  ;;  %v1729_v36 = vld [vmem:[%s6218_s9 + $0xc8] sm:$0xff] }
  0xf4   : > { %v666_v31 = vmax.f32 %v644_v29, 0.0  ;;  %1382 = vmatprep.subr.mxu0 %v950_v39  ;;  %v894_v29 = vld [vmem:[%s6216_s7 + $0x28] sm:$0xff] }
  0xf6   : > { %4061 = vmatprep.mubr.msk.f32.mxu1 %vm679_vm1, %v666_v31 }
  0xf7   : > { %4062 = vmatmul.mubr.msk.f32.gmra.mxu1 %vm679_vm1, %v667_v30  ;;  %v896_v30 = vld [vmem:[%s6216_s7 + $0x38] sm:$0xff] }
  0xf8   : > { %1269 = vmatprep.mubr.f32.mxu1 %v4084_v38 }
 0x19b   : > { %v4042_v41 = vpop.f32.mrf.mxu1 }
 0x19c   : > { %v800_v46 = vadd.f32 %v4042_v41, %v4353_v42 }
 0x19d   : > { %v794_v43 = vpop.f32.mrf.mxu1 }
 0x19e   : > { %v795_v44 = vadd.f32 %v4353_v42, %v794_v43  ;;  %v4375_v53 = vmax.f32 %v800_v46, 0.0 }
 0x19f   : > { %v4045_v45 = vpop.f32.mrf.mxu1 }
 0x1a0   : > { %v4357_v47 = vmax.f32 %v795_v44, 0.0  ;;  %v810_v60 = vadd.f32 %v4045_v45, %v4353_v42 }
 0x1a1   : > { %v804_v50 = vpop.f32.mrf.mxu1 }
 0x1a2   : > { %3519 = vmatmul.mubr.msk.f32.vlgmr.msra.gmra.mxu0 %vm995_vm2, %v4357_v47  ;;  %3535 = vmatmul.mubr.msk.f32.vlgmr.msra.gmra.mxu1 %vm995_vm2, %v4357_v47  ;;  %v805_v54 = vadd.f32 %v4353_v42, %v804_v50  ;;  %v4419_v3 = vmax.f32 %v810_v60, 0.0 }
 0x1a3   : > { %1383 = vmatpush1.msra.mxu0 %v949_v48  ;;  %1544 = vmatpush1.msra.mxu1 %v951_v49  ;;  %v4048_v55 = vpop.f32.mrf.mxu1 }
 0x1a4   : > { %1114 = vmatprep.mubr.f32.mxu0 %v4084_v38  ;;  %1275 = vmatprep.mubr.f32.mxu1 %v4084_v38  ;;  %v4399_v61 = vmax.f32 %v805_v54, 0.0  ;;  %v820_v10 = vadd.f32 %v4048_v55, %v4353_v42 }
 0x1a5   : > { %1384 = vmatprep.subr.mxu0 %v942_v51  ;;  %1545 = vmatprep.subr.mxu1 %v944_v52  ;;  %v814_v62 = vpop.f32.mrf.mxu1 }
 0x1a6   : > { %3520 = vmatmul.mubr.msk.f32.gmra.mxu0 %vm995_vm2, %v4375_v53  ;;  %3536 = vmatmul.mubr.msk.f32.gmra.mxu1 %vm995_vm2, %v4375_v53  ;;  %v815_v4 = vadd.f32 %v4353_v42, %v814_v62  ;;  %v4461_v17 = vmax.f32 %v820_v10, 0.0  ;;  %v1733_v10 = vld [vmem:[%s6218_s9 + $0xe8] sm:$0xff] }
 0x1a7   : > { %1120 = vmatprep.mubr.f32.mxu0 %v4084_v38  ;;  %1281 = vmatprep.mubr.f32.mxu1 %v4084_v38  ;;  %v4051_v5 = vpop.f32.mrf.mxu1 }
 0x1a8   : > { %1385 = vmatpush1.msra.mxu0 %v941_v56  ;;  %1546 = vmatpush1.msra.mxu1 %v943_v57  ;;  %v4441_v11 = vmax.f32 %v815_v4, 0.0  ;;  %v830_v24 = vadd.f32 %v4051_v5, %v4353_v42  ;;  %v1713_v4 = vld [vmem:[%s6218_s9 + $0x48] sm:$0xff]  ;;  %v1715_v5 = vld [vmem:[%s6218_s9 + $0x58] sm:$0xff] }
 0x1a9   : > { %1386 = vmatprep.subr.mxu0 %v934_v58  ;;  %1547 = vmatprep.subr.mxu1 %v936_v59  ;;  %v824_v12 = vpop.f32.mrf.mxu1 }
 0x1aa   : > { %3521 = vmatmul.mubr.msk.f32.gmra.mxu0 %vm995_vm2, %v4399_v61  ;;  %3537 = vmatmul.mubr.msk.f32.gmra.mxu1 %vm995_vm2, %v4399_v61  ;;  %v825_v18 = vadd.f32 %v4353_v42, %v824_v12  ;;  %v4503_v31 = vmax.f32 %v830_v24, 0.0  ;;  %v1735_v12 = vld [vmem:[%s6218_s9 + $0xf8] sm:$0xff]  ;;  %v1709_v24 = vld [vmem:[%s6218_s9 + $0x28] sm:$0xff] }
 0x1ab   : > { %1126 = vmatprep.mubr.f32.mxu0 %v4084_v38  ;;  %1287 = vmatprep.mubr.f32.mxu1 %v4084_v38  ;;  %v4054_v19 = vpop.f32.mrf.mxu1 }
 0x1ac   : > { %1387 = vmatpush1.msra.mxu0 %v933_v63  ;;  %1548 = vmatpush1.msra.mxu1 %v935_v0  ;;  %v4483_v25 = vmax.f32 %v825_v18, 0.0  ;;  %v840_v39 = vadd.f32 %v4054_v19, %v4353_v42  ;;  %v1730_v63 = vld [vmem:[%s6218_s9 + $0xd0] sm:$0xff]  ;;  %v1721_v0 = vld [vmem:[%s6218_s9 + $0x88] sm:$0xff] }
 0x1ad   : > { %1388 = vmatprep.subr.mxu0 %v926_v1  ;;  %1549 = vmatprep.subr.mxu1 %v928_v2  ;;  %v834_v26 = vpop.f32.mrf.mxu1  ;;  %v1723_v1 = vld [vmem:[%s6218_s9 + $0x98] sm:$0xff]  ;;  %v1720_v2 = vld [vmem:[%s6218_s9 + $0x80] sm:$0xff]  ;;  %v1726_v18 = vld [vmem:[%s6218_s9 + $0xb0] sm:$0xff] }
 0x1ae   : > { %3522 = vmatmul.mubr.msk.f32.gmra.mxu0 %vm995_vm2, %v4419_v3  ;;  %3538 = vmatmul.mubr.msk.f32.gmra.mxu1 %vm995_vm2, %v4419_v3  ;;  %v835_v32 = vadd.f32 %v4353_v42, %v834_v26  ;;  %v4533_v43 = vmax.f32 %v840_v39, 0.0  ;;  %v1717_v19 = vld [vmem:[%s6218_s9 + $0x68] sm:$0xff]  ;;  %v4809_v26 = vld [vmem:[%s4737_s15 + $0x18] sm:$0xff] }
 0x1af   : > { %1132 = vmatprep.mubr.f32.mxu0 %v4084_v38  ;;  %1293 = vmatprep.mubr.f32.mxu1 %v4084_v38  ;;  %v4057_v33 = vpop.f32.mrf.mxu1  ;;  %v4893_v39 = vld [vmem:[%s4737_s15 + $0x58] sm:$0xff] }
 0x1b0   : > { %1389 = vmatpush1.msra.mxu0 %v925_v6  ;;  %1550 = vmatpush1.msra.mxu1 %v927_v7  ;;  %v4525_v40 = vmax.f32 %v835_v32, 0.0  ;;  %v850_v46 = vadd.f32 %v4057_v33, %v4353_v42  ;;  %v1712_v6 = vld [vmem:[%s6218_s9 + $0x40] sm:$0xff]  ;;  %v1705_v7 = vld [vmem:[%s6218_s9 + $0x8] sm:$0xff]  ;;  %v4848_v33 = vld [vmem:[%s4737_s15 + $0x30] sm:$0xff] }
 0x1b1   : > { %1390 = vmatprep.subr.mxu0 %v918_v8  ;;  %1551 = vmatprep.subr.mxu1 %v920_v9  ;;  %v844_v41 = vpop.f32.mrf.mxu1  ;;  %v1707_v8 = vld [vmem:[%s6218_s9 + $0x18] sm:$0xff]  ;;  %v1704_v9 = vld [vmem:[%s6218_s9] sm:$0xff]  ;;  %v4839_v32 = vld [vmem:[%s4737_s15 + $0x28] sm:$0xff] }
 0x1b2   : > { %3523 = vmatmul.mubr.msk.f32.gmra.mxu0 %vm995_vm2, %v4441_v11  ;;  %3539 = vmatmul.mubr.msk.f32.gmra.mxu1 %vm995_vm2, %v4441_v11  ;;  %v845_v44 = vadd.f32 %v4353_v42, %v844_v41  ;;  %v4551_v50 = vmax.f32 %v850_v46, 0.0  ;;  %v4911_v41 = vld [vmem:[%s4737_s15 + $0x68] sm:$0xff]  ;;  %v2603_v46 = vld [vmem:[%s6219_s10 + $0x178] sm:$0xff] }
 0x1b3   : > { %1138 = vmatprep.mubr.f32.mxu0 %v4084_v38  ;;  %1299 = vmatprep.mubr.f32.mxu1 %v4084_v38  ;;  %v4060_v45 = vpop.f32.mrf.mxu1 }
 0x1b4   : > { %1391 = vmatpush1.msra.mxu0 %v917_v13  ;;  %1552 = vmatpush1.msra.mxu1 %v919_v14  ;;  %v4543_v48 = vmax.f32 %v845_v44, 0.0  ;;  %v860_v54 = vadd.f32 %v4060_v45, %v4353_v42  ;;  %v1734_v13 = vld [vmem:[%s6218_s9 + $0xf0] sm:$0xff]  ;;  %v1725_v14 = vld [vmem:[%s6218_s9 + $0xa8] sm:$0xff]  ;;  %v4929_v44 = vld [vmem:[%s4737_s15 + $0x78] sm:$0xff] }
 0x1b5   : > { %1392 = vmatprep.subr.mxu0 %v910_v15  ;;  %1553 = vmatprep.subr.mxu1 %v912_v16  ;;  %v854_v49 = vpop.f32.mrf.mxu1  ;;  %v1727_v15 = vld [vmem:[%s6218_s9 + $0xb8] sm:$0xff]  ;;  %v4765_v16 = vld [vmem:[%s4737_s15 + $0x8] sm:$0xff] }
 0x1b6   : > { %3524 = vmatmul.mubr.msk.f32.gmra.mxu0 %vm995_vm2, %v4461_v17  ;;  %3540 = vmatmul.mubr.msk.f32.gmra.mxu1 %vm995_vm2, %v4461_v17  ;;  %v855_v51 = vadd.f32 %v4353_v42, %v854_v49  ;;  %v4569_v57 = vmax.f32 %v860_v54, 0.0  ;;  %v2571_v45 = vld [vmem:[%s6219_s10 + $0x78] sm:$0xff] }
 0x1b7   : > { %1144 = vmatprep.mubr.f32.mxu0 %v4084_v38  ;;  %1305 = vmatprep.mubr.f32.mxu1 %v4084_v38  ;;  %v4063_v52 = vpop.f32.mrf.mxu1 }
 0x1b8   : > { %1393 = vmatpush1.msra.mxu0 %v909_v20  ;;  %1554 = vmatpush1.msra.mxu1 %v911_v21  ;;  %v4561_v55 = vmax.f32 %v855_v51, 0.0  ;;  %v870_v59 = vadd.f32 %v4063_v52, %v4353_v42  ;;  %v1719_v20 = vld [vmem:[%s6218_s9 + $0x78] sm:$0xff]  ;;  %v4788_v21 = vld [vmem:[%s4737_s15 + $0x10] sm:$0xff] }
 0x1b9   : > { %1394 = vmatprep.subr.mxu0 %v902_v22  ;;  %1555 = vmatprep.subr.mxu1 %v904_v23  ;;  %v864_v56 = vpop.f32.mrf.mxu1  ;;  %v1716_v22 = vld [vmem:[%s6218_s9 + $0x60] sm:$0xff]  ;;  %v1718_v23 = vld [vmem:[%s6218_s9 + $0x70] sm:$0xff] }
 0x1ba   : > { %3525 = vmatmul.mubr.msk.f32.gmra.mxu0 %vm995_vm2, %v4483_v25  ;;  %3541 = vmatmul.mubr.msk.f32.gmra.mxu1 %vm995_vm2, %v4483_v25  ;;  %v865_v58 = vadd.f32 %v4353_v42, %v864_v56  ;;  %v4587_v62 = vmax.f32 %v870_v59, 0.0  ;;  %v1728_v42 = vld [vmem:[%s6218_s9 + $0xc0] sm:$0xff]  ;;  %v2618_v51 = vld [vmem:[%s6219_s10 + $0x1f0] sm:$0xff]  ;;  %v2585_v59 = vld [vmem:[%s6219_s10 + $0xe8] sm:$0xff] }
 0x1bb   : > { %1150 = vmatprep.mubr.f32.mxu0 %v4084_v38  ;;  %1311 = vmatprep.mubr.f32.mxu1 %v4084_v38  ;;  %v2602_v56 = vld [vmem:[%s6219_s10 + $0x170] sm:$0xff] }
 0x1bc   : > { %1395 = vmatpush1.msra.mxu0 %v901_v27  ;;  %1556 = vmatpush1.msra.mxu1 %v903_v28  ;;  %v4579_v60 = vmax.f32 %v865_v58, 0.0  ;;  %v1708_v27 = vld [vmem:[%s6218_s9 + $0x20] sm:$0xff]  ;;  %v1710_v28 = vld [vmem:[%s6218_s9 + $0x30] sm:$0xff] }
 0x1bd   : > { %1396 = vmatprep.subr.mxu0 %v894_v29  ;;  %1557 = vmatprep.subr.mxu1 %v896_v30  ;;  %v2587_v29 = vld [vmem:[%s6219_s10 + $0xf8] sm:$0xff] }
 0x1be   : > { %3526 = vmatmul.mubr.msk.f32.gmra.mxu0 %vm995_vm2, %v4503_v31  ;;  %3542 = vmatmul.mubr.msk.f32.gmra.mxu1 %vm995_vm2, %v4503_v31  ;;  %v2619_v30 = vld [vmem:[%s6219_s10 + $0x1f8] sm:$0xff] }
 0x1bf   : > { %1156 = vmatprep.mubr.f32.mxu0 %v4084_v38  ;;  %1317 = vmatprep.mubr.f32.mxu1 %v4084_v38 }
 0x1c0   : > { %1397 = vmatpush1.msra.mxu0 %v893_v34  ;;  %1558 = vmatpush1.msra.mxu1 %v895_v35  ;;  %v4857_v34 = vld [vmem:[%s4737_s15 + $0x38] sm:$0xff]  ;;  %v4866_v35 = vld [vmem:[%s4737_s15 + $0x40] sm:$0xff] }
 0x1c1   : > { %1808 = vmatprep.subr.mxu0 %v1729_v36  ;;  %1969 = vmatprep.subr.mxu1 %v1731_v37  ;;  %v4875_v36 = vld [vmem:[%s4737_s15 + $0x48] sm:$0xff]  ;;  %v4884_v37 = vld [vmem:[%s4737_s15 + $0x50] sm:$0xff] }
 0x1c2   : > { %3527 = vmatmul.mubr.msk.f32.gmra.mxu0 %vm995_vm2, %v4525_v40  ;;  %3543 = vmatmul.mubr.msk.f32.gmra.mxu1 %vm995_vm2, %v4525_v40 }
 0x1c3   : > { %1162 = vmatprep.mubr.f32.mxu0 %v4084_v38  ;;  %1323 = vmatprep.mubr.f32.mxu1 %v4084_v38 }
 0x1c6   : > { %3528 = vmatmul.mubr.msk.f32.gmra.mxu0 %vm995_vm2, %v4533_v43  ;;  %3544 = vmatmul.mubr.msk.f32.gmra.mxu1 %vm995_vm2, %v4533_v43 }
 0x1c7   : > { %1168 = vmatprep.mubr.f32.mxu0 %v4084_v38  ;;  %1329 = vmatprep.mubr.f32.mxu1 %v4084_v38 }
 0x1ca   : > { %3529 = vmatmul.mubr.msk.f32.gmra.mxu0 %vm995_vm2, %v4543_v48  ;;  %3545 = vmatmul.mubr.msk.f32.gmra.mxu1 %vm995_vm2, %v4543_v48 }
 0x1cb   : > { %1174 = vmatprep.mubr.f32.mxu0 %v4084_v38  ;;  %1335 = vmatprep.mubr.f32.mxu1 %v4084_v38 }
 0x1ce   : > { %3530 = vmatmul.mubr.msk.f32.gmra.mxu0 %vm995_vm2, %v4551_v50  ;;  %3546 = vmatmul.mubr.msk.f32.gmra.mxu1 %vm995_vm2, %v4551_v50 }
 0x1cf   : > { %1180 = vmatprep.mubr.f32.mxu0 %v4084_v38  ;;  %1341 = vmatprep.mubr.f32.mxu1 %v4084_v38 }
 0x1d2   : > { %3531 = vmatmul.mubr.msk.f32.gmra.mxu0 %vm995_vm2, %v4561_v55  ;;  %3547 = vmatmul.mubr.msk.f32.gmra.mxu1 %vm995_vm2, %v4561_v55 }
 0x1d3   : > { %1186 = vmatprep.mubr.f32.mxu0 %v4084_v38  ;;  %1347 = vmatprep.mubr.f32.mxu1 %v4084_v38 }
 0x1d6   : > { %3532 = vmatmul.mubr.msk.f32.gmra.mxu0 %vm995_vm2, %v4569_v57  ;;  %3548 = vmatmul.mubr.msk.f32.gmra.mxu1 %vm995_vm2, %v4569_v57 }
 0x1d7   : > { %1192 = vmatprep.mubr.f32.mxu0 %v4084_v38  ;;  %1353 = vmatprep.mubr.f32.mxu1 %v4084_v38 }
 0x1da   : > { %3533 = vmatmul.mubr.msk.f32.gmra.mxu0 %vm995_vm2, %v4579_v60  ;;  %3549 = vmatmul.mubr.msk.f32.gmra.mxu1 %vm995_vm2, %v4579_v60 }
 0x1db   : > { %1198 = vmatprep.mubr.f32.mxu0 %v4084_v38  ;;  %1359 = vmatprep.mubr.f32.mxu1 %v4084_v38 }
 0x1de   : > { %3534 = vmatmul.mubr.msk.f32.gmra.mxu0 %vm995_vm2, %v4587_v62  ;;  %3550 = vmatmul.mubr.msk.f32.gmra.mxu1 %vm995_vm2, %v4587_v62 }
 0x1df   : > { %1430 = vmatprep.mubr.f32.mxu0 %v4084_v38  ;;  %1591 = vmatprep.mubr.f32.mxu1 %v4084_v38 }
 0x1e2   : > { %3551 = vmatmul.mubr.msk.f32.vlgmr.msra.gmra.mxu0 %vm995_vm2, %v4357_v47  ;;  %3567 = vmatmul.mubr.msk.f32.vlgmr.msra.gmra.mxu1 %vm995_vm2, %v4357_v47  ;;  %v1722_v47 = vld [vmem:[%s6218_s9 + $0x90] sm:$0xff] }
 0x1e3   : > { %1809 = vmatpush1.msra.mxu0 %v1728_v42  ;;  %1970 = vmatpush1.msra.mxu1 %v1730_v63  ;;  %v2569_v63 = vld [vmem:[%s6219_s10 + $0x68] sm:$0xff] }
 0x1e4   : > { %1436 = vmatprep.mubr.f32.mxu0 %v4084_v38  ;;  %1597 = vmatprep.mubr.f32.mxu1 %v4084_v38 }
 0x1e5   : > { %1810 = vmatprep.subr.mxu0 %v1721_v0  ;;  %1971 = vmatprep.subr.mxu1 %v1723_v1  ;;  %v2601_v0 = vld [vmem:[%s6219_s10 + $0x168] sm:$0xff] }
 0x1e6   : > { %3552 = vmatmul.mubr.msk.f32.gmra.mxu0 %vm995_vm2, %v4375_v53  ;;  %3568 = vmatmul.mubr.msk.f32.gmra.mxu1 %vm995_vm2, %v4375_v53  ;;  %v1714_v53 = vld [vmem:[%s6218_s9 + $0x50] sm:$0xff] }
 0x1e7   : > { %1442 = vmatprep.mubr.f32.mxu0 %v4084_v38  ;;  %1603 = vmatprep.mubr.f32.mxu1 %v4084_v38 }
 0x1e8   : > { %1811 = vmatpush1.msra.mxu0 %v1720_v2  ;;  %1972 = vmatpush1.msra.mxu1 %v1722_v47  ;;  %v2584_v47 = vld [vmem:[%s6219_s10 + $0xe0] sm:$0xff] }
 0x1e9   : > { %1812 = vmatprep.subr.mxu0 %v1713_v4  ;;  %1973 = vmatprep.subr.mxu1 %v1715_v5  ;;  %v2616_v4 = vld [vmem:[%s6219_s10 + $0x1e0] sm:$0xff] }
 0x1ea   : > { %3553 = vmatmul.mubr.msk.f32.gmra.mxu0 %vm995_vm2, %v4399_v61  ;;  %3569 = vmatmul.mubr.msk.f32.gmra.mxu1 %vm995_vm2, %v4399_v61  ;;  %v1706_v61 = vld [vmem:[%s6218_s9 + $0x10] sm:$0xff] }
 0x1eb   : > { %1448 = vmatprep.mubr.f32.mxu0 %v4084_v38  ;;  %1609 = vmatprep.mubr.f32.mxu1 %v4084_v38 }
 0x1ec   : > { %1813 = vmatpush1.msra.mxu0 %v1712_v6  ;;  %1974 = vmatpush1.msra.mxu1 %v1714_v53  ;;  %v2568_v53 = vld [vmem:[%s6219_s10 + $0x60] sm:$0xff] }
 0x1ed   : > { %1814 = vmatprep.subr.mxu0 %v1705_v7  ;;  %1975 = vmatprep.subr.mxu1 %v1707_v8  ;;  %v2600_v7 = vld [vmem:[%s6219_s10 + $0x160] sm:$0xff] }
 0x1ee   : > { %3554 = vmatmul.mubr.msk.f32.gmra.mxu0 %vm995_vm2, %v4419_v3  ;;  %3570 = vmatmul.mubr.msk.f32.gmra.mxu1 %vm995_vm2, %v4419_v3  ;;  %v4746_v3 = vld [vmem:[%s4737_s15] sm:$0xff] }
 0x1ef   : > { %1454 = vmatprep.mubr.f32.mxu0 %v4084_v38  ;;  %1615 = vmatprep.mubr.f32.mxu1 %v4084_v38 }
 0x1f0   : > { %1815 = vmatpush1.msra.mxu0 %v1704_v9  ;;  %1976 = vmatpush1.msra.mxu1 %v1706_v61  ;;  %v2583_v61 = vld [vmem:[%s6219_s10 + $0xd8] sm:$0xff] }
 0x1f1   : > { %2130 = vmatprep.subr.mxu0 %v1733_v10  ;;  %2291 = vmatprep.subr.mxu1 %v1735_v12  ;;  %v2615_v10 = vld [vmem:[%s6219_s10 + $0x1d8] sm:$0xff] }
 0x1f2   : > { %3555 = vmatmul.mubr.msk.f32.gmra.mxu0 %vm995_vm2, %v4441_v11  ;;  %3571 = vmatmul.mubr.msk.f32.gmra.mxu1 %vm995_vm2, %v4441_v11  ;;  %v1732_v11 = vld [vmem:[%s6218_s9 + $0xe0] sm:$0xff] }
 0x1f3   : > { %1460 = vmatprep.mubr.f32.mxu0 %v4084_v38  ;;  %1621 = vmatprep.mubr.f32.mxu1 %v4084_v38 }
 0x1f6   : > { %3556 = vmatmul.mubr.msk.f32.gmra.mxu0 %vm995_vm2, %v4461_v17  ;;  %3572 = vmatmul.mubr.msk.f32.gmra.mxu1 %vm995_vm2, %v4461_v17  ;;  %v1724_v17 = vld [vmem:[%s6218_s9 + $0xa0] sm:$0xff] }
 0x1f7   : > { %1466 = vmatprep.mubr.f32.mxu0 %v4084_v38  ;;  %1627 = vmatprep.mubr.f32.mxu1 %v4084_v38 }
 0x1fa   : > { %3557 = vmatmul.mubr.msk.f32.gmra.mxu0 %vm995_vm2, %v4483_v25  ;;  %3573 = vmatmul.mubr.msk.f32.gmra.mxu1 %vm995_vm2, %v4483_v25  ;;  %v1711_v25 = vld [vmem:[%s6218_s9 + $0x38] sm:$0xff] }
 0x1fb   : > { %1472 = vmatprep.mubr.f32.mxu0 %v4084_v38  ;;  %1633 = vmatprep.mubr.f32.mxu1 %v4084_v38 }
 0x1fe   : > { %3558 = vmatmul.mubr.msk.f32.gmra.mxu0 %vm995_vm2, %v4503_v31  ;;  %3574 = vmatmul.mubr.msk.f32.gmra.mxu1 %vm995_vm2, %v4503_v31  ;;  %v4830_v31 = vld [vmem:[%s4737_s15 + $0x20] sm:$0xff] }
 0x1ff   : > { %1478 = vmatprep.mubr.f32.mxu0 %v4084_v38  ;;  %1639 = vmatprep.mubr.f32.mxu1 %v4084_v38 }
 0x202   : > { %3559 = vmatmul.mubr.msk.f32.gmra.mxu0 %vm995_vm2, %v4525_v40  ;;  %3575 = vmatmul.mubr.msk.f32.gmra.mxu1 %vm995_vm2, %v4525_v40  ;;  %v4902_v40 = vld [vmem:[%s4737_s15 + $0x60] sm:$0xff] }
 0x203   : > { %1484 = vmatprep.mubr.f32.mxu0 %v4084_v38  ;;  %1645 = vmatprep.mubr.f32.mxu1 %v4084_v38 }
 0x206   : > { %3560 = vmatmul.mubr.msk.f32.gmra.mxu0 %vm995_vm2, %v4533_v43  ;;  %3576 = vmatmul.mubr.msk.f32.gmra.mxu1 %vm995_vm2, %v4533_v43  ;;  %v4920_v43 = vld [vmem:[%s4737_s15 + $0x70] sm:$0xff] }
 0x207   : > { %1490 = vmatprep.mubr.f32.mxu0 %v4084_v38  ;;  %1651 = vmatprep.mubr.f32.mxu1 %v4084_v38 }
 0x20a   : > { %3561 = vmatmul.mubr.msk.f32.gmra.mxu0 %vm995_vm2, %v4543_v48  ;;  %3577 = vmatmul.mubr.msk.f32.gmra.mxu1 %vm995_vm2, %v4543_v48 }
 0x20b   : > { %1496 = vmatprep.mubr.f32.mxu0 %v4084_v38  ;;  %1657 = vmatprep.mubr.f32.mxu1 %v4084_v38 }
 0x20e   : > { %3562 = vmatmul.mubr.msk.f32.gmra.mxu0 %vm995_vm2, %v4551_v50  ;;  %3578 = vmatmul.mubr.msk.f32.gmra.mxu1 %vm995_vm2, %v4551_v50  ;;  %v2586_v50 = vld [vmem:[%s6219_s10 + $0xf0] sm:$0xff] }
 0x20f   : > { %1502 = vmatprep.mubr.f32.mxu0 %v4084_v38  ;;  %1663 = vmatprep.mubr.f32.mxu1 %v4084_v38 }
 0x212   : > { %3563 = vmatmul.mubr.msk.f32.gmra.mxu0 %vm995_vm2, %v4561_v55  ;;  %3579 = vmatmul.mubr.msk.f32.gmra.mxu1 %vm995_vm2, %v4561_v55  ;;  %v2570_v55 = vld [vmem:[%s6219_s10 + $0x70] sm:$0xff] }
 0x213   : > { %1508 = vmatprep.mubr.f32.mxu0 %v4084_v38  ;;  %1669 = vmatprep.mubr.f32.mxu1 %v4084_v38 }
 0x216   : > { %3564 = vmatmul.mubr.msk.f32.gmra.mxu0 %vm995_vm2, %v4569_v57  ;;  %3580 = vmatmul.mubr.msk.f32.gmra.mxu1 %vm995_vm2, %v4569_v57 }
 0x217   : > { %1514 = vmatprep.mubr.f32.mxu0 %v4084_v38  ;;  %1675 = vmatprep.mubr.f32.mxu1 %v4084_v38 }
 0x21a   : > { %3565 = vmatmul.mubr.msk.f32.gmra.mxu0 %vm995_vm2, %v4579_v60  ;;  %3581 = vmatmul.mubr.msk.f32.gmra.mxu1 %vm995_vm2, %v4579_v60  ;;  %v2617_v60 = vld [vmem:[%s6219_s10 + $0x1e8] sm:$0xff] }
 0x21b   : > { %1520 = vmatprep.mubr.f32.mxu0 %v4084_v38  ;;  %1681 = vmatprep.mubr.f32.mxu1 %v4084_v38 }
 0x21e   : > { %3566 = vmatmul.mubr.msk.f32.gmra.mxu0 %vm995_vm2, %v4587_v62  ;;  %3582 = vmatmul.mubr.msk.f32.gmra.mxu1 %vm995_vm2, %v4587_v62 }
 0x21f   : > { %1848 = vmatprep.mubr.f32.mxu0 %v4084_v38  ;;  %2009 = vmatprep.mubr.f32.mxu1 %v4084_v38 }
 0x222   : > { %3583 = vmatmul.mubr.msk.f32.vlgmr.msra.gmra.mxu0 %vm679_vm1, %v4746_v3  ;;  %3599 = vmatmul.mubr.msk.f32.vlgmr.msra.gmra.mxu1 %vm679_vm1, %v4746_v3 }
 0x223   : > { %2131 = vmatpush1.msra.mxu0 %v1732_v11  ;;  %2292 = vmatpush1.msra.mxu1 %v1734_v13  ;;  %v2567_v11 = vld [vmem:[%s6219_s10 + $0x58] sm:$0xff] }
 0x224   : > { %1854 = vmatprep.mubr.f32.mxu0 %v4084_v38  ;;  %2015 = vmatprep.mubr.f32.mxu1 %v4084_v38  ;;  %v2599_v13 = vld [vmem:[%s6219_s10 + $0x158] sm:$0xff] }
 0x225   : > { %2132 = vmatprep.subr.mxu0 %v1725_v14  ;;  %2293 = vmatprep.subr.mxu1 %v1727_v15 }
 0x226   : > { %3584 = vmatmul.mubr.msk.f32.gmra.mxu0 %vm679_vm1, %v4765_v16  ;;  %3600 = vmatmul.mubr.msk.f32.gmra.mxu1 %vm679_vm1, %v4765_v16 }
 0x227   : > { %1860 = vmatprep.mubr.f32.mxu0 %v4084_v38  ;;  %2021 = vmatprep.mubr.f32.mxu1 %v4084_v38 }
 0x228   : > { %2133 = vmatpush1.msra.mxu0 %v1724_v17  ;;  %2294 = vmatpush1.msra.mxu1 %v1726_v18  ;;  %v2614_v17 = vld [vmem:[%s6219_s10 + $0x1d0] sm:$0xff] }
 0x229   : > { %2134 = vmatprep.subr.mxu0 %v1717_v19  ;;  %2295 = vmatprep.subr.mxu1 %v1719_v20  ;;  %v2566_v20 = vld [vmem:[%s6219_s10 + $0x50] sm:$0xff] }
 0x22a   : > { %3585 = vmatmul.mubr.msk.f32.gmra.mxu0 %vm679_vm1, %v4788_v21  ;;  %3601 = vmatmul.mubr.msk.f32.gmra.mxu1 %vm679_vm1, %v4788_v21 }
 0x22b   : > { %1866 = vmatprep.mubr.f32.mxu0 %v4084_v38  ;;  %2027 = vmatprep.mubr.f32.mxu1 %v4084_v38 }
 0x22c   : > { %2135 = vmatpush1.msra.mxu0 %v1716_v22  ;;  %2296 = vmatpush1.msra.mxu1 %v1718_v23 }
 0x22d   : > { %2136 = vmatprep.subr.mxu0 %v1709_v24  ;;  %2297 = vmatprep.subr.mxu1 %v1711_v25  ;;  %v2581_v24 = vld [vmem:[%s6219_s10 + $0xc8] sm:$0xff] }
 0x22e   : > { %3586 = vmatmul.mubr.msk.f32.gmra.mxu0 %vm679_vm1, %v4809_v26  ;;  %3602 = vmatmul.mubr.msk.f32.gmra.mxu1 %vm679_vm1, %v4809_v26  ;;  %v2613_v25 = vld [vmem:[%s6219_s10 + $0x1c8] sm:$0xff] }
 0x22f   : > { %1872 = vmatprep.mubr.f32.mxu0 %v4084_v38  ;;  %2033 = vmatprep.mubr.f32.mxu1 %v4084_v38 }
 0x230   : > { %2137 = vmatpush1.msra.mxu0 %v1708_v27  ;;  %2298 = vmatpush1.msra.mxu1 %v1710_v28  ;;  %v2565_v28 = vld [vmem:[%s6219_s10 + $0x48] sm:$0xff] }
 0x231   : > { %3686 = vmatprep.subr.mxu0 %v2587_v29  ;;  %3766 = vmatprep.subr.mxu1 %v2619_v30  ;;  %v2597_v29 = vld [vmem:[%s6219_s10 + $0x148] sm:$0xff] }
 0x232   : > { %3587 = vmatmul.mubr.msk.f32.gmra.mxu0 %vm679_vm1, %v4830_v31  ;;  %3603 = vmatmul.mubr.msk.f32.gmra.mxu1 %vm679_vm1, %v4830_v31 }
 0x233   : > { %1878 = vmatprep.mubr.f32.mxu0 %v4084_v38  ;;  %2039 = vmatprep.mubr.f32.mxu1 %v4084_v38 }
 0x236   : > { %3588 = vmatmul.mubr.msk.f32.gmra.mxu0 %vm679_vm1, %v4839_v32  ;;  %3604 = vmatmul.mubr.msk.f32.gmra.mxu1 %vm679_vm1, %v4839_v32 }
 0x237   : > { %1884 = vmatprep.mubr.f32.mxu0 %v4084_v38  ;;  %2045 = vmatprep.mubr.f32.mxu1 %v4084_v38 }
 0x23a   : > { %3589 = vmatmul.mubr.msk.f32.gmra.mxu0 %vm679_vm1, %v4848_v33  ;;  %3605 = vmatmul.mubr.msk.f32.gmra.mxu1 %vm679_vm1, %v4848_v33 }
 0x23b   : > { %1890 = vmatprep.mubr.f32.mxu0 %v4084_v38  ;;  %2051 = vmatprep.mubr.f32.mxu1 %v4084_v38 }
 0x23e   : > { %3590 = vmatmul.mubr.msk.f32.gmra.mxu0 %vm679_vm1, %v4857_v34  ;;  %3606 = vmatmul.mubr.msk.f32.gmra.mxu1 %vm679_vm1, %v4857_v34 }
 0x23f   : > { %1896 = vmatprep.mubr.f32.mxu0 %v4084_v38  ;;  %2057 = vmatprep.mubr.f32.mxu1 %v4084_v38 }
 0x242   : > { %3591 = vmatmul.mubr.msk.f32.gmra.mxu0 %vm679_vm1, %v4866_v35  ;;  %3607 = vmatmul.mubr.msk.f32.gmra.mxu1 %vm679_vm1, %v4866_v35 }
 0x243   : > { %1902 = vmatprep.mubr.f32.mxu0 %v4084_v38  ;;  %2063 = vmatprep.mubr.f32.mxu1 %v4084_v38 }
 0x246   : > { %3592 = vmatmul.mubr.msk.f32.gmra.mxu0 %vm679_vm1, %v4875_v36  ;;  %3608 = vmatmul.mubr.msk.f32.gmra.mxu1 %vm679_vm1, %v4875_v36 }
 0x247   : > { %1908 = vmatprep.mubr.f32.mxu0 %v4084_v38  ;;  %2069 = vmatprep.mubr.f32.mxu1 %v4084_v38 }
 0x24a   : > { %3593 = vmatmul.mubr.msk.f32.gmra.mxu0 %vm679_vm1, %v4884_v37  ;;  %3609 = vmatmul.mubr.msk.f32.gmra.mxu1 %vm679_vm1, %v4884_v37 }
 0x24b   : > { %1914 = vmatprep.mubr.f32.mxu0 %v4084_v38  ;;  %2075 = vmatprep.mubr.f32.mxu1 %v4084_v38 }
 0x24e   : > { %3594 = vmatmul.mubr.msk.f32.gmra.mxu0 %vm679_vm1, %v4893_v39  ;;  %3610 = vmatmul.mubr.msk.f32.gmra.mxu1 %vm679_vm1, %v4893_v39 }
 0x24f   : > { %1920 = vmatprep.mubr.f32.mxu0 %v4084_v38  ;;  %2081 = vmatprep.mubr.f32.mxu1 %v4084_v38 }
 0x252   : > { %3595 = vmatmul.mubr.msk.f32.gmra.mxu0 %vm679_vm1, %v4902_v40  ;;  %3611 = vmatmul.mubr.msk.f32.gmra.mxu1 %vm679_vm1, %v4902_v40 }
 0x253   : > { %1926 = vmatprep.mubr.f32.mxu0 %v4084_v38  ;;  %2087 = vmatprep.mubr.f32.mxu1 %v4084_v38 }
 0x256   : > { %3596 = vmatmul.mubr.msk.f32.gmra.mxu0 %vm679_vm1, %v4911_v41  ;;  %3612 = vmatmul.mubr.msk.f32.gmra.mxu1 %vm679_vm1, %v4911_v41 }
 0x257   : > { %1932 = vmatprep.mubr.f32.mxu0 %v4084_v38  ;;  %2093 = vmatprep.mubr.f32.mxu1 %v4084_v38 }
 0x25a   : > { %3597 = vmatmul.mubr.msk.f32.gmra.mxu0 %vm679_vm1, %v4920_v43  ;;  %3613 = vmatmul.mubr.msk.f32.gmra.mxu1 %vm679_vm1, %v4920_v43 }
 0x25b   : > { %1938 = vmatprep.mubr.f32.mxu0 %v4084_v38  ;;  %2099 = vmatprep.mubr.f32.mxu1 %v4084_v38 }
 0x25e   : > { %3598 = vmatmul.mubr.msk.f32.gmra.mxu0 %vm679_vm1, %v4929_v44  ;;  %3614 = vmatmul.mubr.msk.f32.gmra.mxu1 %vm679_vm1, %v4929_v44 }
 0x25f   : > { %2170 = vmatprep.mubr.f32.mxu0 %v4084_v38  ;;  %2331 = vmatprep.mubr.f32.mxu1 %v4084_v38 }
 0x262   : > { %v4943_v48 = vpop.f32.mrf.mxu0  ;;  %v4945_v49 = vpop.f32.mrf.mxu1  ;;  %3615 = vmatmul.mubr.msk.f32.vlgmr.msra.gmra.mxu0 %vm679_vm1, %v4746_v3  ;;  %3631 = vmatmul.mubr.msk.f32.vlgmr.msra.gmra.mxu1 %vm679_vm1, %v4746_v3 }
 0x263   : > { %2176 = vmatprep.mubr.f32.mxu0 %v4084_v38  ;;  %2337 = vmatprep.mubr.f32.mxu1 %v4084_v38 }
 0x264   : > { %v4959_v52 = vpop.f32.mrf.mxu0  ;;  %v4961_v54 = vpop.f32.mrf.mxu1  ;;  %3687 = vmatpush3.msra.mxu0 %v2571_v45  ;;  %3767 = vmatpush3.msra.mxu1 %v2603_v46  ;;  %v2612_v45 = vld [vmem:[%s6219_s10 + $0x1c0] sm:$0xff] }
 0x265   : > { %3688 = vmatprep.subr.mxu0 %v2586_v50  ;;  %3768 = vmatprep.subr.mxu1 %v2618_v51  ;;  %v2596_v51 = vld [vmem:[%s6219_s10 + $0x140] sm:$0xff] }
 0x266   : > { %v4969_v57 = vpop.f32.mrf.mxu0  ;;  %v4971_v58 = vpop.f32.mrf.mxu1  ;;  %3616 = vmatmul.mubr.msk.f32.gmra.mxu0 %vm679_vm1, %v4765_v16  ;;  %3632 = vmatmul.mubr.msk.f32.gmra.mxu1 %vm679_vm1, %v4765_v16  ;;  %v2582_v16 = vld [vmem:[%s6219_s10 + $0xd0] sm:$0xff] }
 0x267   : > { %2182 = vmatprep.mubr.f32.mxu0 %v4084_v38  ;;  %2343 = vmatprep.mubr.f32.mxu1 %v4084_v38 }
 0x268   : > { %v4985_v62 = vpop.f32.mrf.mxu0  ;;  %v4987_v42 = vpop.f32.mrf.mxu1  ;;  %3689 = vmatpush3.msra.mxu0 %v2570_v55  ;;  %3769 = vmatpush3.msra.mxu1 %v2602_v56 }
 0x269   : > { %3690 = vmatprep.subr.mxu0 %v2585_v59  ;;  %3770 = vmatprep.subr.mxu1 %v2617_v60  ;;  %v2579_v59 = vld [vmem:[%s6219_s10 + $0xb8] sm:$0xff] }
 0x26a   : > { %v4995_v1 = vpop.f32.mrf.mxu0  ;;  %v4997_v2 = vpop.f32.mrf.mxu1  ;;  %3617 = vmatmul.mubr.msk.f32.gmra.mxu0 %vm679_vm1, %v4788_v21  ;;  %3633 = vmatmul.mubr.msk.f32.gmra.mxu1 %vm679_vm1, %v4788_v21  ;;  %v2598_v21 = vld [vmem:[%s6219_s10 + $0x150] sm:$0xff]  ;;  %v2611_v60 = vld [vmem:[%s6219_s10 + $0x1b8] sm:$0xff] }
 0x26b   : > { %2188 = vmatprep.mubr.f32.mxu0 %v4084_v38  ;;  %2349 = vmatprep.mubr.f32.mxu1 %v4084_v38 }
 0x26c   : > { %v5011_v5 = vpop.f32.mrf.mxu0  ;;  %v5013_v6 = vpop.f32.mrf.mxu1  ;;  %3691 = vmatpush3.msra.mxu0 %v2569_v63  ;;  %3771 = vmatpush3.msra.mxu1 %v2601_v0 }
 0x26d   : > { %3692 = vmatprep.subr.mxu0 %v2584_v47  ;;  %3772 = vmatprep.subr.mxu1 %v2616_v4  ;;  %v2595_v47 = vld [vmem:[%s6219_s10 + $0x138] sm:$0xff] }
 0x26e   : > { %v5021_v8 = vpop.f32.mrf.mxu0  ;;  %v5023_v9 = vpop.f32.mrf.mxu1  ;;  %3618 = vmatmul.mubr.msk.f32.gmra.mxu0 %vm679_vm1, %v4809_v26  ;;  %3634 = vmatmul.mubr.msk.f32.gmra.mxu1 %vm679_vm1, %v4809_v26 }
 0x26f   : > { %2194 = vmatprep.mubr.f32.mxu0 %v4084_v38  ;;  %2355 = vmatprep.mubr.f32.mxu1 %v4084_v38 }
 0x270   : > { %v5037_v12 = vpop.f32.mrf.mxu0  ;;  %v5039_v3 = vpop.f32.mrf.mxu1  ;;  %3693 = vmatpush3.msra.mxu0 %v2568_v53  ;;  %3773 = vmatpush3.msra.mxu1 %v2600_v7  ;;  %v2578_v7 = vld [vmem:[%s6219_s10 + $0xb0] sm:$0xff] }
 0x271   : > { %3694 = vmatprep.subr.mxu0 %v2583_v61  ;;  %3774 = vmatprep.subr.mxu1 %v2615_v10  ;;  %v2610_v61 = vld [vmem:[%s6219_s10 + $0x1b0] sm:$0xff] }
 0x272   : > { %v5047_v14 = vpop.f32.mrf.mxu0  ;;  %v5049_v15 = vpop.f32.mrf.mxu1  ;;  %3619 = vmatmul.mubr.msk.f32.gmra.mxu0 %vm679_vm1, %v4830_v31  ;;  %3635 = vmatmul.mubr.msk.f32.gmra.mxu1 %vm679_vm1, %v4830_v31 }
 0x273   : > { %2200 = vmatprep.mubr.f32.mxu0 %v4084_v38  ;;  %2361 = vmatprep.mubr.f32.mxu1 %v4084_v38 }
 0x274   : > { %v5063_v18 = vpop.f32.mrf.mxu0  ;;  %v5065_v19 = vpop.f32.mrf.mxu1  ;;  %3695 = vmatpush3.msra.mxu0 %v2567_v11  ;;  %3775 = vmatpush3.msra.mxu1 %v2599_v13  ;;  %v2594_v13 = vld [vmem:[%s6219_s10 + $0x130] sm:$0xff] }
 0x275   : > { %3696 = vmatprep.subr.mxu0 %v2582_v16  ;;  %3776 = vmatprep.subr.mxu1 %v2614_v17 }
 0x276   : > { %v5073_v22 = vpop.f32.mrf.mxu0  ;;  %v5075_v23 = vpop.f32.mrf.mxu1  ;;  %3620 = vmatmul.mubr.msk.f32.gmra.mxu0 %vm679_vm1, %v4839_v32  ;;  %3636 = vmatmul.mubr.msk.f32.gmra.mxu1 %vm679_vm1, %v4839_v32  ;;  %v2580_v32 = vld [vmem:[%s6219_s10 + $0xc0] sm:$0xff] }
 0x277   : > { %2206 = vmatprep.mubr.f32.mxu0 %v4084_v38  ;;  %2367 = vmatprep.mubr.f32.mxu1 %v4084_v38 }
 0x278   : > { %v5089_v26 = vpop.f32.mrf.mxu0  ;;  %v5091_v27 = vpop.f32.mrf.mxu1  ;;  %3697 = vmatpush3.msra.mxu0 %v2566_v20  ;;  %3777 = vmatpush3.msra.mxu1 %v2598_v21  ;;  %v2577_v20 = vld [vmem:[%s6219_s10 + $0xa8] sm:$0xff] }
 0x279   : > { %3698 = vmatprep.subr.mxu0 %v2581_v24  ;;  %3778 = vmatprep.subr.mxu1 %v2613_v25  ;;  %v2609_v21 = vld [vmem:[%s6219_s10 + $0x1a8] sm:$0xff] }
 0x27a   : > { %v5099_v30 = vpop.f32.mrf.mxu0  ;;  %v5101_v31 = vpop.f32.mrf.mxu1  ;;  %3621 = vmatmul.mubr.msk.f32.gmra.mxu0 %vm679_vm1, %v4848_v33  ;;  %3637 = vmatmul.mubr.msk.f32.gmra.mxu1 %vm679_vm1, %v4848_v33  ;;  %v2564_v33 = vld [vmem:[%s6219_s10 + $0x40] sm:$0xff] }
 0x27b   : > { %2212 = vmatprep.mubr.f32.mxu0 %v4084_v38  ;;  %2373 = vmatprep.mubr.f32.mxu1 %v4084_v38 }
 0x27c   : > { %v5115_v46 = vpop.f32.mrf.mxu0  ;;  %v5117_v50 = vpop.f32.mrf.mxu1  ;;  %3699 = vmatpush3.msra.mxu0 %v2565_v28  ;;  %3779 = vmatpush3.msra.mxu1 %v2597_v29  ;;  %v2593_v28 = vld [vmem:[%s6219_s10 + $0x128] sm:$0xff] }
 0x27d   : > { %3700 = vmatprep.subr.mxu0 %v2580_v32  ;;  %3780 = vmatprep.subr.mxu1 %v2612_v45  ;;  %v2576_v45 = vld [vmem:[%s6219_s10 + $0xa0] sm:$0xff] }
 0x27e   : > { %v5125_v55 = vpop.f32.mrf.mxu0  ;;  %v5127_v56 = vpop.f32.mrf.mxu1  ;;  %3622 = vmatmul.mubr.msk.f32.gmra.mxu0 %vm679_vm1, %v4857_v34  ;;  %3638 = vmatmul.mubr.msk.f32.gmra.mxu1 %vm679_vm1, %v4857_v34  ;;  %v2563_v34 = vld [vmem:[%s6219_s10 + $0x38] sm:$0xff] }
 0x27f   : > { %2218 = vmatprep.mubr.f32.mxu0 %v4084_v38  ;;  %2379 = vmatprep.mubr.f32.mxu1 %v4084_v38 }
 0x280   : > { %v5141_v63 = vpop.f32.mrf.mxu0  ;;  %v5143_v0 = vpop.f32.mrf.mxu1  ;;  %3701 = vmatpush3.msra.mxu0 %v2564_v33  ;;  %3781 = vmatpush3.msra.mxu1 %v2596_v51  ;;  %v2608_v33 = vld [vmem:[%s6219_s10 + $0x1a0] sm:$0xff] }
 0x281   : > { %3702 = vmatprep.subr.mxu0 %v2579_v59  ;;  %3782 = vmatprep.subr.mxu1 %v2611_v60  ;;  %v2592_v60 = vld [vmem:[%s6219_s10 + $0x120] sm:$0xff] }
 0x282   : > { %v5151_v4 = vpop.f32.mrf.mxu0  ;;  %v5153_v53 = vpop.f32.mrf.mxu1  ;;  %3623 = vmatmul.mubr.msk.f32.gmra.mxu0 %vm679_vm1, %v4866_v35  ;;  %3639 = vmatmul.mubr.msk.f32.gmra.mxu1 %vm679_vm1, %v4866_v35  ;;  %v2562_v35 = vld [vmem:[%s6219_s10 + $0x30] sm:$0xff] }
 0x283   : > { %2224 = vmatprep.mubr.f32.mxu0 %v4084_v38  ;;  %2385 = vmatprep.mubr.f32.mxu1 %v4084_v38 }
 0x284   : > { %v5167_v10 = vpop.f32.mrf.mxu0  ;;  %v5169_v11 = vpop.f32.mrf.mxu1  ;;  %3703 = vmatpush3.msra.mxu0 %v2563_v34  ;;  %3783 = vmatpush3.msra.mxu1 %v2595_v47 }
 0x285   : > { %3704 = vmatprep.subr.mxu0 %v2578_v7  ;;  %3784 = vmatprep.subr.mxu1 %v2610_v61  ;;  %v2575_v7 = vld [vmem:[%s6219_s10 + $0x98] sm:$0xff] }
 0x286   : > { %v5177_v16 = vpop.f32.mrf.mxu0  ;;  %v5179_v17 = vpop.f32.mrf.mxu1  ;;  %3624 = vmatmul.mubr.msk.f32.gmra.mxu0 %vm679_vm1, %v4875_v36  ;;  %3640 = vmatmul.mubr.msk.f32.gmra.mxu1 %vm679_vm1, %v4875_v36  ;;  %v2561_v36 = vld [vmem:[%s6219_s10 + $0x28] sm:$0xff]  ;;  %v2607_v61 = vld [vmem:[%s6219_s10 + $0x198] sm:$0xff] }
 0x287   : > { %2230 = vmatprep.mubr.f32.mxu0 %v4084_v38  ;;  %2391 = vmatprep.mubr.f32.mxu1 %v4084_v38 }
 0x288   : > { %v5193_v24 = vpop.f32.mrf.mxu0  ;;  %v5195_v25 = vpop.f32.mrf.mxu1  ;;  %3705 = vmatpush3.msra.mxu0 %v2562_v35  ;;  %3785 = vmatpush3.msra.mxu1 %v2594_v13 }
 0x289   : > { %3706 = vmatprep.subr.mxu0 %v2577_v20  ;;  %3786 = vmatprep.subr.mxu1 %v2609_v21  ;;  %v2591_v20 = vld [vmem:[%s6219_s10 + $0x118] sm:$0xff] }
 0x28a   : > { %v5203_v29 = vpop.f32.mrf.mxu0  ;;  %v5205_v32 = vpop.f32.mrf.mxu1  ;;  %3625 = vmatmul.mubr.msk.f32.gmra.mxu0 %vm679_vm1, %v4884_v37  ;;  %3641 = vmatmul.mubr.msk.f32.gmra.mxu1 %vm679_vm1, %v4884_v37  ;;  %v2560_v37 = vld [vmem:[%s6219_s10 + $0x20] sm:$0xff] }
 0x28b   : > { %2236 = vmatprep.mubr.f32.mxu0 %v4084_v38  ;;  %2397 = vmatprep.mubr.f32.mxu1 %v4084_v38 }
 0x28c   : > { %v5219_v51 = vpop.f32.mrf.mxu0  ;;  %v5221_v59 = vpop.f32.mrf.mxu1  ;;  %3707 = vmatpush3.msra.mxu0 %v2561_v36  ;;  %3787 = vmatpush3.msra.mxu1 %v2593_v28  ;;  %v2574_v28 = vld [vmem:[%s6219_s10 + $0x90] sm:$0xff] }
 0x28d   : > { %3708 = vmatprep.subr.mxu0 %v2576_v45  ;;  %3788 = vmatprep.subr.mxu1 %v2608_v33  ;;  %v2606_v45 = vld [vmem:[%s6219_s10 + $0x190] sm:$0xff] }
 0x28e   : > { %v5229_v34 = vpop.f32.mrf.mxu0  ;;  %v5231_v47 = vpop.f32.mrf.mxu1  ;;  %3626 = vmatmul.mubr.msk.f32.gmra.mxu0 %vm679_vm1, %v4893_v39  ;;  %3642 = vmatmul.mubr.msk.f32.gmra.mxu1 %vm679_vm1, %v4893_v39  ;;  %v2559_v39 = vld [vmem:[%s6219_s10 + $0x18] sm:$0xff] }
 0x28f   : > { %6225 = vst [vmem:[#allocation2_spill] sm:$0xff] %v5229_v34  ;;  %6226 = vst [vmem:[#allocation3_spill] sm:$0xff] %v5231_v47  ;;  %2242 = vmatprep.mubr.f32.mxu0 %v4084_v38  ;;  %2403 = vmatprep.mubr.f32.mxu1 %v4084_v38  ;;  %v2635_v34 = vld [vmem:[%s6219_s10 + $0x278] sm:$0xff] }
 0x290   : > { %v5245_v35 = vpop.f32.mrf.mxu0  ;;  %v5247_v13 = vpop.f32.mrf.mxu1  ;;  %3709 = vmatpush3.msra.mxu0 %v2560_v37  ;;  %3789 = vmatpush3.msra.mxu1 %v2592_v60  ;;  %v2590_v60 = vld [vmem:[%s6219_s10 + $0x110] sm:$0xff] }
 0x291   : > { %6227 = vst [vmem:[#allocation4_spill] sm:$0xff] %v5247_v13  ;;  %3710 = vmatprep.subr.mxu0 %v2575_v7  ;;  %3790 = vmatprep.subr.mxu1 %v2607_v61  ;;  %v2667_v13 = vld [vmem:[%s6219_s10 + $0x378] sm:$0xff] }
 0x292   : > { %v5255_v21 = vpop.f32.mrf.mxu0  ;;  %v5257_v36 = vpop.f32.mrf.mxu1  ;;  %3627 = vmatmul.mubr.msk.f32.gmra.mxu0 %vm679_vm1, %v4902_v40  ;;  %3643 = vmatmul.mubr.msk.f32.gmra.mxu1 %vm679_vm1, %v4902_v40  ;;  %v2558_v40 = vld [vmem:[%s6219_s10 + $0x10] sm:$0xff] }
 0x293   : > { %6228 = vst [vmem:[#allocation5_spill] sm:$0xff] %v5255_v21  ;;  %6229 = vst [vmem:[#allocation6_spill] sm:$0xff] %v5257_v36  ;;  %2248 = vmatprep.mubr.f32.mxu0 %v4084_v38  ;;  %2409 = vmatprep.mubr.f32.mxu1 %v4084_v38 }
 0x294   : > { %v5271_v33 = vpop.f32.mrf.mxu0  ;;  %v5273_v37 = vpop.f32.mrf.mxu1  ;;  %3711 = vmatpush3.msra.mxu0 %v2559_v39  ;;  %3791 = vmatpush3.msra.mxu1 %v2591_v20  ;;  %v2573_v39 = vld [vmem:[%s6219_s10 + $0x88] sm:$0xff] }
 0x295   : > { %6230 = vst [vmem:[#allocation7_spill] sm:$0xff] %v5271_v33  ;;  %6231 = vst [vmem:[#allocation8_spill] sm:$0xff] %v5273_v37  ;;  %3712 = vmatprep.subr.mxu0 %v2574_v28  ;;  %3792 = vmatprep.subr.mxu1 %v2606_v45  ;;  %v2605_v20 = vld [vmem:[%s6219_s10 + $0x188] sm:$0xff]  ;;  %v3266_v37 = vld [vmem:[%s5514_s30 + $0x10] sm:$0xff] }
 0x296   : > { %v5281_v7 = vpop.f32.mrf.mxu0  ;;  %v5283_v61 = vpop.f32.mrf.mxu1  ;;  %3628 = vmatmul.mubr.msk.f32.gmra.mxu0 %vm679_vm1, %v4911_v41  ;;  %3644 = vmatmul.mubr.msk.f32.gmra.mxu1 %vm679_vm1, %v4911_v41  ;;  %v2557_v41 = vld [vmem:[%s6219_s10 + $0x8] sm:$0xff] }
 0x297   : > { %6232 = vst [vmem:[#allocation9_spill] sm:$0xff] %v5281_v7  ;;  %6233 = vst [vmem:[#allocation10_spill] sm:$0xff] %v5283_v61  ;;  %2254 = vmatprep.mubr.f32.mxu0 %v4084_v38  ;;  %2415 = vmatprep.mubr.f32.mxu1 %v4084_v38  ;;  %v2589_v61 = vld [vmem:[%s6219_s10 + $0x108] sm:$0xff] }
 0x298   : > { %v5297_v28 = vpop.f32.mrf.mxu0  ;;  %v5299_v45 = vpop.f32.mrf.mxu1  ;;  %3713 = vmatpush3.msra.mxu0 %v2558_v40  ;;  %3793 = vmatpush3.msra.mxu1 %v2590_v60  ;;  %v2572_v40 = vld [vmem:[%s6219_s10 + $0x80] sm:$0xff] }
 0x299   : > { %6234 = vst [vmem:[#allocation11_spill] sm:$0xff] %v5297_v28  ;;  %6235 = vst [vmem:[#allocation12_spill] sm:$0xff] %v5299_v45  ;;  %3714 = vmatprep.subr.mxu0 %v2573_v39  ;;  %3794 = vmatprep.subr.mxu1 %v2605_v20  ;;  %v2604_v60 = vld [vmem:[%s6219_s10 + $0x180] sm:$0xff] }
 0x29a   : > { %v5307_v7 = vpop.f32.mrf.mxu0  ;;  %v5309_v36 = vpop.f32.mrf.mxu1  ;;  %3629 = vmatmul.mubr.msk.f32.gmra.mxu0 %vm679_vm1, %v4920_v43  ;;  %3645 = vmatmul.mubr.msk.f32.gmra.mxu1 %vm679_vm1, %v4920_v43  ;;  %v2556_v43 = vld [vmem:[%s6219_s10] sm:$0xff] }
 0x29b   : > { %6236 = vst [vmem:[#allocation13_spill] sm:$0xff] %v5307_v7  ;;  %6237 = vst [vmem:[#allocation14_spill] sm:$0xff] %v5309_v36  ;;  %2260 = vmatprep.mubr.f32.mxu0 %v4084_v38  ;;  %2421 = vmatprep.mubr.f32.mxu1 %v4084_v38  ;;  %v2588_v36 = vld [vmem:[%s6219_s10 + $0x100] sm:$0xff]  ;;  %v2651_v38 = vld [vmem:[%s6219_s10 + $0x2f8] sm:$0xff] }
 0x29c   : > { %v5323_v39 = vpop.f32.mrf.mxu0  ;;  %v5325_v20 = vpop.f32.mrf.mxu1  ;;  %3715 = vmatpush3.msra.mxu0 %v2557_v41  ;;  %3795 = vmatpush3.msra.mxu1 %v2589_v61  ;;  %v2683_v7 = vld [vmem:[%s6219_s10 + $0x3f8] sm:$0xff] }
 0x29d   : > { %6238 = vst [vmem:[#allocation15_spill] sm:$0xff] %v5323_v39  ;;  %6239 = vst [vmem:[#allocation16_spill] sm:$0xff] %v5325_v20  ;;  %3716 = vmatprep.subr.mxu0 %v2572_v40  ;;  %3796 = vmatprep.subr.mxu1 %v2604_v60 }
 0x29e   : > { %v5339_v41 = vpop.f32.mrf.mxu0  ;;  %v5341_v61 = vpop.f32.mrf.mxu1  ;;  %3630 = vmatmul.mubr.msk.f32.gmra.mxu0 %vm679_vm1, %v4929_v44  ;;  %3646 = vmatmul.mubr.msk.f32.gmra.mxu1 %vm679_vm1, %v4929_v44 }
 0x29f   : > { %6240 = vst [vmem:[#allocation17_spill] sm:$0xff] %v5339_v41  ;;  %6241 = vst [vmem:[#allocation18_spill] sm:$0xff] %v5341_v61  ;;  %3717 = vmatpush3.msra.mxu0 %v2556_v43  ;;  %3797 = vmatpush3.msra.mxu1 %v2588_v36 }
 0x2a0   : > { %v5347_v40 = vpop.f32.mrf.mxu0  ;;  %v5349_v60 = vpop.f32.mrf.mxu1  ;;  %3846 = vmatprep.subr.mxu0 %v2651_v38  ;;  %3926 = vmatprep.subr.mxu1 %v2683_v7 }
 0x2a1   : > { %6242 = vst [vmem:[#allocation19_spill] sm:$0xff] %v5347_v40  ;;  %6243 = vst [vmem:[#allocation20_spill] sm:$0xff] %v5349_v60 }
 0x2a2   : > { %v5351_v20 = vpop.f32.mrf.mxu0  ;;  %v5353_v39 = vpop.f32.mrf.mxu1 }
 0x2a3   : > { %6244 = vst [vmem:[#allocation21_spill] sm:$0xff] %v5351_v20  ;;  %6245 = vst [vmem:[#allocation22_spill] sm:$0xff] %v5353_v39 }
 0x2a4   : > { %v5355_v41 = vpop.f32.mrf.mxu0  ;;  %v5357_v61 = vpop.f32.mrf.mxu1 }
 0x2a5   : > { %6246 = vst [vmem:[#allocation23_spill] sm:$0xff] %v5355_v41  ;;  %6247 = vst [vmem:[#allocation24_spill] sm:$0xff] %v5357_v61 }
 0x2a6   : > { %v5359_v45 = vpop.f32.mrf.mxu0  ;;  %v5361_v28 = vpop.f32.mrf.mxu1 }
 0x2a7   : > { %6248 = vst [vmem:[#allocation25_spill] sm:$0xff] %v5359_v45  ;;  %6249 = vst [vmem:[#allocation26_spill] sm:$0xff] %v5361_v28 }
 0x2a8   : > { %v5363_v44 = vpop.f32.mrf.mxu0  ;;  %v5365_v36 = vpop.f32.mrf.mxu1 }
 0x2a9   : > { %6250 = vst [vmem:[#allocation27_spill] sm:$0xff] %v5363_v44  ;;  %6251 = vst [vmem:[#allocation28_spill] sm:$0xff] %v5365_v36 }
 0x2aa   : > { %v5367_v43 = vpop.f32.mrf.mxu0  ;;  %v5369_v38 = vpop.f32.mrf.mxu1 }
 0x2ab   : > { %6252 = vst [vmem:[#allocation29_spill] sm:$0xff] %v5367_v43  ;;  %6253 = vst [vmem:[#allocation30_spill] sm:$0xff] %v5369_v38 }
 0x2ac   : > { %v5371_v7 = vpop.f32.mrf.mxu0  ;;  %v5373_v20 = vpop.f32.mrf.mxu1 }
 0x2ad   : > { %6254 = vst [vmem:[#allocation31_spill] sm:$0xff] %v5371_v7  ;;  %6255 = vst [vmem:[#allocation32_spill] sm:$0xff] %v5373_v20 }
 0x2ae   : > { %v5375_v39 = vpop.f32.mrf.mxu0  ;;  %v5377_v41 = vpop.f32.mrf.mxu1 }
 0x2af   : > { %6256 = vst [vmem:[#allocation33_spill] sm:$0xff] %v5375_v39  ;;  %6257 = vst [vmem:[#allocation34_spill] sm:$0xff] %v5377_v41 }
 0x2b0   : > { %v5379_v61 = vpop.f32.mrf.mxu0  ;;  %v5381_v45 = vpop.f32.mrf.mxu1 }
 0x2b1   : > { %6258 = vst [vmem:[#allocation35_spill] sm:$0xff] %v5379_v61  ;;  %6259 = vst [vmem:[#allocation36_spill] sm:$0xff] %v5381_v45 }
 0x2b2   : > { %v5383_v28 = vpop.f32.mrf.mxu0  ;;  %v5385_v44 = vpop.f32.mrf.mxu1 }
 0x2b3   : > { %6260 = vst [vmem:[#allocation37_spill] sm:$0xff] %v5383_v28  ;;  %6261 = vst [vmem:[#allocation38_spill] sm:$0xff] %v5385_v44 }
 0x2b4   : > { %v5387_v36 = vpop.f32.mrf.mxu0  ;;  %v5389_v43 = vpop.f32.mrf.mxu1 }
 0x2b5   : > { %6262 = vst [vmem:[#allocation39_spill] sm:$0xff] %v5387_v36  ;;  %6263 = vst [vmem:[#allocation40_spill] sm:$0xff] %v5389_v43 }
 0x2b6   : > { %v5391_v38 = vpop.f32.mrf.mxu0  ;;  %v5393_v7 = vpop.f32.mrf.mxu1 }
 0x2b7   : > { %6264 = vst [vmem:[#allocation41_spill] sm:$0xff] %v5391_v38  ;;  %6265 = vst [vmem:[#allocation42_spill] sm:$0xff] %v5393_v7 }
 0x2b8   : > { %v5395_v20 = vpop.f32.mrf.mxu0  ;;  %v5397_v39 = vpop.f32.mrf.mxu1 }
 0x2b9   : > { %6266 = vst [vmem:[#allocation43_spill] sm:$0xff] %v5395_v20  ;;  %6267 = vst [vmem:[#allocation44_spill] sm:$0xff] %v5397_v39 }
 0x2ba   : > { %v5399_v41 = vpop.f32.mrf.mxu0  ;;  %v5401_v61 = vpop.f32.mrf.mxu1 }
 0x2bb   : > { %6268 = vst [vmem:[#allocation45_spill] sm:$0xff] %v5399_v41  ;;  %6269 = vst [vmem:[#allocation46_spill] sm:$0xff] %v5401_v61 }
 0x2bc   : > { %v5403_v45 = vpop.f32.mrf.mxu0  ;;  %v5405_v28 = vpop.f32.mrf.mxu1 }
 0x2bd   : > { %6270 = vst [vmem:[#allocation47_spill] sm:$0xff] %v5403_v45  ;;  %6271 = vst [vmem:[#allocation48_spill] sm:$0xff] %v5405_v28 }
 0x2be   : > { %v5407_v44 = vpop.f32.mrf.mxu0  ;;  %v5409_v36 = vpop.f32.mrf.mxu1 }
 0x2bf   : > { %6272 = vst [vmem:[#allocation49_spill] sm:$0xff] %v5407_v44  ;;  %6273 = vst [vmem:[#allocation50_spill] sm:$0xff] %v5409_v36 }
 0x2c0   : > { %v5411_v43 = vpop.f32.mrf.mxu0  ;;  %v5413_v38 = vpop.f32.mrf.mxu1 }
 0x2c1   : > { %6274 = vst [vmem:[#allocation51_spill] sm:$0xff] %v5411_v43  ;;  %6275 = vst [vmem:[#allocation52_spill] sm:$0xff] %v5413_v38 }
 0x2c2   : > { %v5415_v7 = vpop.f32.mrf.mxu0  ;;  %v5417_v20 = vpop.f32.mrf.mxu1 }
 0x2c3   : > { %6276 = vst [vmem:[#allocation53_spill] sm:$0xff] %v5415_v7  ;;  %6277 = vst [vmem:[#allocation54_spill] sm:$0xff] %v5417_v20 }
 0x2c4   : > { %v5419_v39 = vpop.f32.mrf.mxu0  ;;  %v5421_v41 = vpop.f32.mrf.mxu1 }
 0x2c5   : > { %6278 = vst [vmem:[#allocation55_spill] sm:$0xff] %v5419_v39  ;;  %6279 = vst [vmem:[#allocation56_spill] sm:$0xff] %v5421_v41 }
 0x2c6   : > { %v5423_v61 = vpop.f32.mrf.mxu0  ;;  %v5425_v45 = vpop.f32.mrf.mxu1 }
 0x2c7   : > { %6280 = vst [vmem:[#allocation57_spill] sm:$0xff] %v5423_v61  ;;  %6281 = vst [vmem:[#allocation58_spill] sm:$0xff] %v5425_v45 }
 0x2c8   : > { %v5427_v28 = vpop.f32.mrf.mxu0  ;;  %v5429_v44 = vpop.f32.mrf.mxu1 }
 0x2c9   : > { %6282 = vst [vmem:[#allocation59_spill] sm:$0xff] %v5427_v28  ;;  %6283 = vst [vmem:[#allocation60_spill] sm:$0xff] %v5429_v44  ;;  %v955_v44 = vlaneseq }
 0x2ca   : > { %v5431_v36 = vpop.f32.mrf.mxu0  ;;  %v5433_v43 = vpop.f32.mrf.mxu1 }
 0x2cb   : > { %6284 = vst [vmem:[#allocation61_spill] sm:$0xff] %v5431_v36  ;;  %6285 = vst [vmem:[#allocation62_spill] sm:$0xff] %v5433_v43 }
 0x2cc   : > { %v5435_v38 = vpop.f32.mrf.mxu0  ;;  %v5437_v7 = vpop.f32.mrf.mxu1 }
 0x2cd   : > { %6286 = vst [vmem:[#allocation63_spill] sm:$0xff] %v5435_v38  ;;  %6287 = vst [vmem:[#allocation64_spill] sm:$0xff] %v5437_v7 }
 0x2ce   : > { %v5439_v20 = vpop.f32.mrf.mxu0  ;;  %v5441_v39 = vpop.f32.mrf.mxu1 }
 0x2cf   : > { %6288 = vst [vmem:[#allocation65_spill] sm:$0xff] %v5439_v20  ;;  %6289 = vst [vmem:[#allocation66_spill] sm:$0xff] %v5441_v39  ;;  %v5459_v20 = vshrl.u32 %v955_v44, 7 }
 0x2d0   : > { %v5443_v41 = vpop.f32.mrf.mxu0  ;;  %v5445_v61 = vpop.f32.mrf.mxu1 }
 0x2d1   : > { %6290 = vst [vmem:[#allocation67_spill] sm:$0xff] %v5443_v41  ;;  %6291 = vst [vmem:[#allocation68_spill] sm:$0xff] %v5445_v61 }
 0x2d2   : > { %v5447_v45 = vpop.f32.mrf.mxu0  ;;  %v5449_v28 = vpop.f32.mrf.mxu1  ;;  %6298 = vst [vmem:[#allocation75_spill] sm:$0xff] %v5459_v20 }
 0x2d3   : > { %6292 = vst [vmem:[#allocation69_spill] sm:$0xff] %v5447_v45  ;;  %6293 = vst [vmem:[#allocation70_spill] sm:$0xff] %v5449_v28  ;;  %v961_v28 = vsub.s32 1, %v5459_v20 }
 0x2d4   : > { %v5451_v36 = vpop.f32.mrf.mxu0  ;;  %v5453_v43 = vpop.f32.mrf.mxu1 }
 0x2d5   : > { %6294 = vst [vmem:[#allocation71_spill] sm:$0xff] %v5451_v36  ;;  %6295 = vst [vmem:[#allocation72_spill] sm:$0xff] %v5453_v43  ;;  %v969_v36 = vsub.s32 3, %v5459_v20  ;;  %v957_v43 = vsub.s32 0, %v5459_v20 }
 0x2d6   : > { %v5455_v38 = vpop.f32.mrf.mxu0  ;;  %v5457_v7 = vpop.f32.mrf.mxu1 }
 0x2d7   : > { %6296 = vst [vmem:[#allocation73_spill] sm:$0xff] %v5455_v38  ;;  %6297 = vst [vmem:[#allocation74_spill] sm:$0xff] %v5457_v7  ;;  %v965_v38 = vsub.s32 2, %v5459_v20  ;;  %v5480_v7 = vld [vmem:[%s6217_s8] sm:$0xff] }
 0x2d8   : > { %v5461_v39 = vpop.f32.mrf.mxu0  ;;  %v5463_v41 = vpop.f32.mrf.mxu1  ;;  %6305 = vst [vmem:[#allocation82_spill] sm:$0xff] %v5480_v7 }
 0x2d9   : > { %6299 = vst [vmem:[#allocation76_spill] sm:$0xff] %v5461_v39  ;;  %6300 = vst [vmem:[#allocation77_spill] sm:$0xff] %v5463_v41  ;;  %v5487_v41 = vrot.slane %v5480_v7, %v961_v28  ;;  %v5490_v39 = vrot.slane %v5480_v7, %v969_v36 }
 0x2da   : > { %v5465_v61 = vpop.f32.mrf.mxu0  ;;  %v5467_v45 = vpop.f32.mrf.mxu1 }
 0x2db   : > { %6301 = vst [vmem:[#allocation78_spill] sm:$0xff] %v5465_v61  ;;  %6302 = vst [vmem:[#allocation79_spill] sm:$0xff] %v5467_v45  ;;  %v1274_v28 = vadd.f32 %v4961_v54, %v5490_v39  ;;  %v3264_v54 = vld [vmem:[%s5514_s30] sm:$0xff] }
 0x2dc   : > { %v5473_v60 = vpop.f32.mrf.mxu0  ;;  %v5475_v44 = vpop.f32.mrf.mxu1 }
 0x2dd   : > { %6303 = vst [vmem:[#allocation80_spill] sm:$0xff] %v5473_v60  ;;  %6304 = vst [vmem:[#allocation81_spill] sm:$0xff] %v5475_v44  ;;  %v5493_v60 = vrot.slane %v5480_v7, %v957_v43  ;;  %v5496_v44 = vrot.slane %v5480_v7, %v965_v38 }
 0x2de   : > { %v5482_v61 = vpop.f32.mrf.mxu0  ;;  %v5484_v45 = vpop.f32.mrf.mxu1 }
 0x2df   : > { %6306 = vst [vmem:[#allocation83_spill] sm:$0xff] %v5482_v61  ;;  %6307 = vst [vmem:[#allocation84_spill] sm:$0xff] %v5484_v45  ;;  %v1113_v45 = vadd.f32 %v4959_v52, %v5487_v41  ;;  %v1111_v36 = vadd.f32 %v4943_v48, %v5493_v60  ;;  %v1272_v43 = vadd.f32 %v4945_v49, %v5496_v44 }
 0x2e0   : > { %v5498_v40 = vpop.f32.mrf.mxu0  ;;  %v5500_v20 = vpop.f32.mrf.mxu1 }
 0x2e1   : > { %6308 = vst [vmem:[#allocation85_spill] sm:$0xff] %v5498_v40  ;;  %6309 = vst [vmem:[#allocation86_spill] sm:$0xff] %v5500_v20  ;;  %v4085_v40 = vmov 0  }
 0x2e2   : > { %v1850_v61 = vpop.f32.mrf.mxu0  ;;  %v2011_v21 = vpop.f32.mrf.mxu1  ;;  %4074 = vset.pattern.permute.xlu0 %v4085_v40  ;;  %4075 = vset.pattern.permute.xlu1 %v4085_v40  ;;  %v1280_v40 = vadd.f32 %v4987_v42, %v5490_v39 }
 0x2e3   : > { %v2428_v48 = vmul.f32 %v1850_v61, %v1111_v36  ;;  %v2430_v33 = vmul.f32 %v2011_v21, %v1272_v43  ;;  %3282 = vperm.xlu0 %4074, %v3264_v54   ;;  %3292 = vperm.xlu1 %4075, %v3266_v37   ;;  %v2650_v21 = vld [vmem:[%s6219_s10 + $0x2f0] sm:$0xff]  ;;  %v1278_v37 = vadd.f32 %v4971_v58, %v5496_v44 }
 0x2e4   : > { %v1852_v38 = vpop.f32.mrf.mxu0  ;;  %v2013_v7 = vpop.f32.mrf.mxu1  ;;  %v2682_v61 = vld [vmem:[%s6219_s10 + $0x3f0] sm:$0xff]  ;;  %v1123_v54 = vadd.f32 %v4995_v1, %v5493_v60  ;;  %v2633_v1 = vld [vmem:[%s6219_s10 + $0x268] sm:$0xff] }
 0x2e5   : > { %v2429_v20 = vmul.f32 %v1852_v38, %v1113_v45  ;;  %v2431_v52 = vmul.f32 %v2013_v7, %v1274_v28  ;;  %v1119_v45 = vadd.f32 %v4985_v62, %v5487_v41  ;;  %v1117_v7 = vadd.f32 %v4969_v57, %v5493_v60  ;;  %v2634_v57 = vld [vmem:[%s6219_s10 + $0x270] sm:$0xff] }
 0x2e6   : > { %v1856_v47 = vpop.f32.mrf.mxu0  ;;  %v2017_v49 = vpop.f32.mrf.mxu1  ;;  %v2666_v58 = vld [vmem:[%s6219_s10 + $0x370] sm:$0xff] }
 0x2e7   : > { %2748 = vmatprep.mubr.f32.mxu0 %v2429_v20  ;;  %2893 = vmatprep.mubr.f32.mxu1 %v2431_v52  ;;  %v2436_v36 = vmul.f32 %v1856_v47, %v1117_v7  ;;  %v2438_v43 = vmul.f32 %v2017_v49, %v1278_v37  ;;  %v2649_v47 = vld [vmem:[%s6219_s10 + $0x2e8] sm:$0xff]  ;;  %v1131_v37 = vadd.f32 %v5037_v12, %v5487_v41 }
 0x2e8   : > { %v1858_v62 = vpop.f32.mrf.mxu0  ;;  %v2019_v28 = vpop.f32.mrf.mxu1  ;;  %2749 = vmatmul.mubr.f32.vlgmr.msra.gmra.mxu0 %v2428_v48  ;;  %2894 = vmatmul.mubr.f32.vlgmr.msra.gmra.mxu1 %v2430_v33  ;;  %v1125_v33 = vadd.f32 %v5011_v5, %v5487_v41  ;;  %v1284_v48 = vadd.f32 %v4997_v2, %v5496_v44  ;;  %v2665_v2 = vld [vmem:[%s6219_s10 + $0x368] sm:$0xff] }
 0x2e9   : > { %v2437_v42 = vmul.f32 %v1858_v62, %v1119_v45  ;;  %v2439_v20 = vmul.f32 %v2019_v28, %v1280_v40  ;;  %3847 = vmatpush3.msra.mxu0 %v2635_v34  ;;  %3927 = vmatpush3.msra.mxu1 %v2667_v13  ;;  %v1286_v34 = vadd.f32 %v5013_v6, %v5490_v39  ;;  %v2681_v13 = vld [vmem:[%s6219_s10 + $0x3e8] sm:$0xff]  ;;  %v2648_v28 = vld [vmem:[%s6219_s10 + $0x2e0] sm:$0xff] }
 0x2ea   : > { %v1862_v38 = vpop.f32.mrf.mxu0  ;;  %v2023_v52 = vpop.f32.mrf.mxu1  ;;  %3848 = vmatprep.subr.mxu0 %v2650_v21  ;;  %3928 = vmatprep.subr.mxu1 %v2682_v61  ;;  %v1292_v62 = vadd.f32 %v5039_v3, %v5490_v39 }
 0x2eb   : > { %2753 = vmatprep.mubr.f32.mxu0 %v2437_v42  ;;  %2898 = vmatprep.mubr.f32.mxu1 %v2439_v20  ;;  %v2444_v40 = vmul.f32 %v1862_v38, %v1123_v54  ;;  %v2446_v21 = vmul.f32 %v2023_v52, %v1284_v48  ;;  %v2680_v42 = vld [vmem:[%s6219_s10 + $0x3e0] sm:$0xff]  ;;  %v1129_v20 = vadd.f32 %v5021_v8, %v5493_v60  ;;  %v2679_v54 = vld [vmem:[%s6219_s10 + $0x3d8] sm:$0xff] }
 0x2ec   : > { %v1864_v5 = vpop.f32.mrf.mxu0  ;;  %v2025_v49 = vpop.f32.mrf.mxu1  ;;  %2754 = vmatmul.mubr.f32.gmra.mxu0 %v2436_v36  ;;  %2899 = vmatmul.mubr.f32.gmra.mxu1 %v2438_v43  ;;  %v1290_v36 = vadd.f32 %v5023_v9, %v5496_v44  ;;  %v2632_v8 = vld [vmem:[%s6219_s10 + $0x260] sm:$0xff]  ;;  %v1135_v48 = vadd.f32 %v5047_v14, %v5493_v60  ;;  %v2631_v14 = vld [vmem:[%s6219_s10 + $0x258] sm:$0xff] }
 0x2ed   : > { %v2445_v6 = vmul.f32 %v1864_v5, %v1125_v33  ;;  %v2447_v45 = vmul.f32 %v2025_v49, %v1286_v34  ;;  %3849 = vmatpush3.msra.mxu0 %v2634_v57  ;;  %3929 = vmatpush3.msra.mxu1 %v2666_v58  ;;  %v2664_v9 = vld [vmem:[%s6219_s10 + $0x360] sm:$0xff]  ;;  %v1137_v34 = vadd.f32 %v5063_v18, %v5487_v41 }
 0x2ee   : > { %v1868_v61 = vpop.f32.mrf.mxu0  ;;  %v2029_v7 = vpop.f32.mrf.mxu1  ;;  %3850 = vmatprep.subr.mxu0 %v2649_v47  ;;  %3930 = vmatprep.subr.mxu1 %v2681_v13  ;;  %v1298_v47 = vadd.f32 %v5065_v19, %v5490_v39  ;;  %v2647_v13 = vld [vmem:[%s6219_s10 + $0x2d8] sm:$0xff]  ;;  %v1296_v5 = vadd.f32 %v5049_v15, %v5496_v44 }
 0x2ef   : > { %2758 = vmatprep.mubr.f32.mxu0 %v2445_v6  ;;  %2903 = vmatprep.mubr.f32.mxu1 %v2447_v45  ;;  %v2452_v52 = vmul.f32 %v1868_v61, %v1129_v20  ;;  %v2454_v57 = vmul.f32 %v2029_v7, %v1290_v36  ;;  %v2663_v15 = vld [vmem:[%s6219_s10 + $0x358] sm:$0xff]  ;;  %v1143_v7 = vadd.f32 %v5089_v26, %v5487_v41 }
 0x2f0   : > { %v1870_v12 = vpop.f32.mrf.mxu0  ;;  %v2031_v43 = vpop.f32.mrf.mxu1  ;;  %2759 = vmatmul.mubr.f32.gmra.mxu0 %v2444_v40  ;;  %2904 = vmatmul.mubr.f32.gmra.mxu1 %v2446_v21 }
 0x2f1   : > { %v2453_v3 = vmul.f32 %v1870_v12, %v1131_v37  ;;  %v2455_v38 = vmul.f32 %v2031_v43, %v1292_v62  ;;  %3851 = vmatpush3.msra.mxu0 %v2633_v1  ;;  %3931 = vmatpush3.msra.mxu1 %v2665_v2  ;;  %v1304_v1 = vadd.f32 %v5091_v27, %v5490_v39  ;;  %v2646_v2 = vld [vmem:[%s6219_s10 + $0x2d0] sm:$0xff] }
 0x2f2   : > { %v1874_v58 = vpop.f32.mrf.mxu0  ;;  %v2035_v33 = vpop.f32.mrf.mxu1  ;;  %3852 = vmatprep.subr.mxu0 %v2648_v28  ;;  %3932 = vmatprep.subr.mxu1 %v2680_v42  ;;  %v2678_v37 = vld [vmem:[%s6219_s10 + $0x3d0] sm:$0xff]  ;;  %v1141_v62 = vadd.f32 %v5073_v22, %v5493_v60  ;;  %v1302_v28 = vadd.f32 %v5075_v23, %v5496_v44 }
 0x2f3   : > { %2763 = vmatprep.mubr.f32.mxu0 %v2453_v3  ;;  %2908 = vmatprep.mubr.f32.mxu1 %v2455_v38  ;;  %v2460_v45 = vmul.f32 %v1874_v58, %v1135_v48  ;;  %v2462_v40 = vmul.f32 %v2035_v33, %v1296_v5  ;;  %v2630_v22 = vld [vmem:[%s6219_s10 + $0x250] sm:$0xff]  ;;  %v1149_v38 = vadd.f32 %v5115_v46, %v5487_v41  ;;  %v2677_v58 = vld [vmem:[%s6219_s10 + $0x3c8] sm:$0xff] }
 0x2f4   : > { %v1876_v18 = vpop.f32.mrf.mxu0  ;;  %v2037_v49 = vpop.f32.mrf.mxu1  ;;  %2764 = vmatmul.mubr.f32.gmra.mxu0 %v2452_v52  ;;  %2909 = vmatmul.mubr.f32.gmra.mxu1 %v2454_v57  ;;  %v2662_v23 = vld [vmem:[%s6219_s10 + $0x350] sm:$0xff]  ;;  %v1310_v52 = vadd.f32 %v5117_v50, %v5490_v39  ;;  %v2645_v57 = vld [vmem:[%s6219_s10 + $0x2c8] sm:$0xff]  ;;  %v1147_v33 = vadd.f32 %v5099_v30, %v5493_v60  ;;  %v1155_v5 = vadd.f32 %v5141_v63, %v5487_v41 }
 0x2f5   : > { %v2461_v19 = vmul.f32 %v1876_v18, %v1137_v34  ;;  %v2463_v6 = vmul.f32 %v2037_v49, %v1298_v47  ;;  %3853 = vmatpush3.msra.mxu0 %v2632_v8  ;;  %3933 = vmatpush3.msra.mxu1 %v2664_v9  ;;  %v1308_v8 = vadd.f32 %v5101_v31, %v5496_v44  ;;  %v2629_v30 = vld [vmem:[%s6219_s10 + $0x248] sm:$0xff]  ;;  %v2644_v49 = vld [vmem:[%s6219_s10 + $0x2c0] sm:$0xff] }
 0x2f6   : > { %v1880_v21 = vpop.f32.mrf.mxu0  ;;  %v2041_v61 = vpop.f32.mrf.mxu1  ;;  %3854 = vmatprep.subr.mxu0 %v2647_v13  ;;  %3934 = vmatprep.subr.mxu1 %v2679_v54  ;;  %v2661_v31 = vld [vmem:[%s6219_s10 + $0x348] sm:$0xff]  ;;  %v1316_v18 = vadd.f32 %v5143_v0, %v5490_v39 }
 0x2f7   : > { %2768 = vmatprep.mubr.f32.mxu0 %v2461_v19  ;;  %2913 = vmatprep.mubr.f32.mxu1 %v2463_v6  ;;  %v2468_v36 = vmul.f32 %v1880_v21, %v1141_v62  ;;  %v2470_v12 = vmul.f32 %v2041_v61, %v1302_v28  ;;  %v2676_v19 = vld [vmem:[%s6219_s10 + $0x3c0] sm:$0xff]  ;;  %v1153_v6 = vadd.f32 %v5125_v55, %v5493_v60  ;;  %v2675_v62 = vld [vmem:[%s6219_s10 + $0x3b8] sm:$0xff] }
 0x2f8   : > { %v1882_v26 = vpop.f32.mrf.mxu0  ;;  %v2043_v42 = vpop.f32.mrf.mxu1  ;;  %2769 = vmatmul.mubr.f32.gmra.mxu0 %v2460_v45  ;;  %2914 = vmatmul.mubr.f32.gmra.mxu1 %v2462_v40  ;;  %v1314_v45 = vadd.f32 %v5127_v56, %v5496_v44  ;;  %v2628_v55 = vld [vmem:[%s6219_s10 + $0x240] sm:$0xff]  ;;  %v1159_v28 = vadd.f32 %v5151_v4, %v5493_v60  ;;  %v2627_v4 = vld [vmem:[%s6219_s10 + $0x238] sm:$0xff] }
 0x2f9   : > { %v2469_v27 = vmul.f32 %v1882_v26, %v1143_v7  ;;  %v2471_v20 = vmul.f32 %v2043_v42, %v1304_v1  ;;  %3855 = vmatpush3.msra.mxu0 %v2631_v14  ;;  %3935 = vmatpush3.msra.mxu1 %v2663_v15  ;;  %v2660_v56 = vld [vmem:[%s6219_s10 + $0x340] sm:$0xff]  ;;  %v1161_v1 = vadd.f32 %v5167_v10, %v5487_v41 }
 0x2fa   : > { %v1886_v43 = vpop.f32.mrf.mxu0  ;;  %v2047_v3 = vpop.f32.mrf.mxu1  ;;  %3856 = vmatprep.subr.mxu0 %v2646_v2  ;;  %3936 = vmatprep.subr.mxu1 %v2678_v37  ;;  %v1322_v2 = vadd.f32 %v5169_v11, %v5490_v39  ;;  %v2643_v37 = vld [vmem:[%s6219_s10 + $0x2b8] sm:$0xff]  ;;  %v1320_v26 = vadd.f32 %v5153_v53, %v5496_v44 }
 0x2fb   : > { %2773 = vmatprep.mubr.f32.mxu0 %v2469_v27  ;;  %2918 = vmatprep.mubr.f32.mxu1 %v2471_v20  ;;  %v2476_v47 = vmul.f32 %v1886_v43, %v1147_v33  ;;  %v2478_v13 = vmul.f32 %v2047_v3, %v1308_v8  ;;  %v2659_v53 = vld [vmem:[%s6219_s10 + $0x338] sm:$0xff]  ;;  %v1167_v3 = vadd.f32 %v5193_v24, %v5487_v41 }
 0x2fc   : > { %v1888_v46 = vpop.f32.mrf.mxu0  ;;  %v2049_v9 = vpop.f32.mrf.mxu1  ;;  %2774 = vmatmul.mubr.f32.gmra.mxu0 %v2468_v36  ;;  %2919 = vmatmul.mubr.f32.gmra.mxu1 %v2470_v12 }
 0x2fd   : > { %v2477_v50 = vmul.f32 %v1888_v46, %v1149_v38  ;;  %v2479_v34 = vmul.f32 %v2049_v9, %v1310_v52  ;;  %3857 = vmatpush3.msra.mxu0 %v2630_v22  ;;  %3937 = vmatpush3.msra.mxu1 %v2662_v23  ;;  %v1328_v22 = vadd.f32 %v5195_v25, %v5490_v39  ;;  %v2642_v23 = vld [vmem:[%s6219_s10 + $0x2b0] sm:$0xff] }
 0x2fe   : > { %v1892_v54 = vpop.f32.mrf.mxu0  ;;  %v2053_v48 = vpop.f32.mrf.mxu1  ;;  %3858 = vmatprep.subr.mxu0 %v2645_v57  ;;  %3938 = vmatprep.subr.mxu1 %v2677_v58  ;;  %v2674_v38 = vld [vmem:[%s6219_s10 + $0x3b0] sm:$0xff]  ;;  %v1165_v52 = vadd.f32 %v5177_v16, %v5493_v60  ;;  %v1326_v57 = vadd.f32 %v5179_v17, %v5496_v44 }
 0x2ff   : > { %2778 = vmatprep.mubr.f32.mxu0 %v2477_v50  ;;  %2923 = vmatprep.mubr.f32.mxu1 %v2479_v34  ;;  %v2484_v61 = vmul.f32 %v1892_v54, %v1153_v6  ;;  %v2486_v14 = vmul.f32 %v2053_v48, %v1314_v45  ;;  %v2626_v16 = vld [vmem:[%s6219_s10 + $0x230] sm:$0xff]  ;;  %v1173_v34 = vadd.f32 %v5219_v51, %v5487_v41  ;;  %v2673_v54 = vld [vmem:[%s6219_s10 + $0x3a8] sm:$0xff] }
 0x300   : > { %v1894_v63 = vpop.f32.mrf.mxu0  ;;  %v2055_v40 = vpop.f32.mrf.mxu1  ;;  %2779 = vmatmul.mubr.f32.gmra.mxu0 %v2476_v47  ;;  %2924 = vmatmul.mubr.f32.gmra.mxu1 %v2478_v13  ;;  %v2658_v17 = vld [vmem:[%s6219_s10 + $0x330] sm:$0xff]  ;;  %v1334_v47 = vadd.f32 %v5221_v59, %v5490_v39  ;;  %v2641_v13 = vld [vmem:[%s6219_s10 + $0x2a8] sm:$0xff]  ;;  %v1171_v48 = vadd.f32 %v5203_v29, %v5493_v60  ;;  %v1179_v45 = vadd.f32 %v5245_v35, %v5487_v41 }
 0x301   : > { %v2485_v0 = vmul.f32 %v1894_v63, %v1155_v5  ;;  %v2487_v21 = vmul.f32 %v2055_v40, %v1316_v18  ;;  %3859 = vmatpush3.msra.mxu0 %v2629_v30  ;;  %3939 = vmatpush3.msra.mxu1 %v2661_v31  ;;  %v1332_v30 = vadd.f32 %v5205_v32, %v5496_v44  ;;  %v2625_v29 = vld [vmem:[%s6219_s10 + $0x228] sm:$0xff]  ;;  %v6310_v63 = vld [vmem:[#allocation4_spill] sm:$0xff] }
 0x302   : > { %v1898_v15 = vpop.f32.mrf.mxu0  ;;  %v2059_v7 = vpop.f32.mrf.mxu1  ;;  %3860 = vmatprep.subr.mxu0 %v2644_v49  ;;  %3940 = vmatprep.subr.mxu1 %v2676_v19  ;;  %v2657_v32 = vld [vmem:[%s6219_s10 + $0x328] sm:$0xff]  ;;  %v1340_v40 = vadd.f32 %v6310_v63, %v5490_v39  ;;  %v2654_v63 = vld [vmem:[%s6219_s10 + $0x310] sm:$0xff] }
 0x303   : > { %2783 = vmatprep.mubr.f32.mxu0 %v2485_v0  ;;  %2928 = vmatprep.mubr.f32.mxu1 %v2487_v21  ;;  %v2492_v20 = vmul.f32 %v1898_v15, %v1159_v28  ;;  %v2494_v36 = vmul.f32 %v2059_v7, %v1320_v26  ;;  %v2640_v0 = vld [vmem:[%s6219_s10 + $0x2a0] sm:$0xff]  ;;  %v6312_v15 = vld [vmem:[#allocation3_spill] sm:$0xff] }
 0x304   : > { %v1900_v10 = vpop.f32.mrf.mxu0  ;;  %v2061_v42 = vpop.f32.mrf.mxu1  ;;  %2784 = vmatmul.mubr.f32.gmra.mxu0 %v2484_v61  ;;  %2929 = vmatmul.mubr.f32.gmra.mxu1 %v2486_v14  ;;  %v2672_v21 = vld [vmem:[%s6219_s10 + $0x3a0] sm:$0xff]  ;;  %v1338_v7 = vadd.f32 %v6312_v15, %v5496_v44  ;;  %v2637_v15 = vld [vmem:[%s6219_s10 + $0x288] sm:$0xff] }
 0x305   : > { %v2493_v11 = vmul.f32 %v1900_v10, %v1161_v1  ;;  %v2495_v27 = vmul.f32 %v2061_v42, %v1322_v2  ;;  %3861 = vmatpush3.msra.mxu0 %v2628_v55  ;;  %3941 = vmatpush3.msra.mxu1 %v2660_v56  ;;  %v6311_v61 = vld [vmem:[#allocation2_spill] sm:$0xff]  ;;  %v6313_v42 = vld [vmem:[#allocation7_spill] sm:$0xff] }
 0x306   : > { %v1904_v12 = vpop.f32.mrf.mxu0  ;;  %v2065_v43 = vpop.f32.mrf.mxu1  ;;  %3862 = vmatprep.subr.mxu0 %v2643_v37  ;;  %3942 = vmatprep.subr.mxu1 %v2675_v62  ;;  %v1177_v14 = vadd.f32 %v6311_v61, %v5493_v60  ;;  %v2624_v26 = vld [vmem:[%s6219_s10 + $0x220] sm:$0xff] }
 0x307   : > { %2788 = vmatprep.mubr.f32.mxu0 %v2493_v11  ;;  %2933 = vmatprep.mubr.f32.mxu1 %v2495_v27  ;;  %v2500_v8 = vmul.f32 %v1904_v12, %v1165_v52  ;;  %v2502_v46 = vmul.f32 %v2065_v43, %v1326_v57  ;;  %v2656_v10 = vld [vmem:[%s6219_s10 + $0x320] sm:$0xff]  ;;  %v1185_v11 = vadd.f32 %v6313_v42, %v5487_v41  ;;  %v6314_v27 = vld [vmem:[#allocation8_spill] sm:$0xff]  ;;  %v2671_v12 = vld [vmem:[%s6219_s10 + $0x398] sm:$0xff] }
 0x308   : > { %v1906_v24 = vpop.f32.mrf.mxu0  ;;  %v2067_v58 = vpop.f32.mrf.mxu1  ;;  %2789 = vmatmul.mubr.f32.gmra.mxu0 %v2492_v20  ;;  %2934 = vmatmul.mubr.f32.gmra.mxu1 %v2494_v36  ;;  %v1346_v20 = vadd.f32 %v6314_v27, %v5490_v39  ;;  %v2639_v36 = vld [vmem:[%s6219_s10 + $0x298] sm:$0xff] }
 0x309   : > { %v2501_v25 = vmul.f32 %v1906_v24, %v1167_v3  ;;  %v2503_v33 = vmul.f32 %v2067_v58, %v1328_v22  ;;  %3863 = vmatpush3.msra.mxu0 %v2627_v4  ;;  %3943 = vmatpush3.msra.mxu1 %v2659_v53  ;;  %v6315_v43 = vld [vmem:[#allocation5_spill] sm:$0xff]  ;;  %v6316_v53 = vld [vmem:[#allocation6_spill] sm:$0xff] }
 0x30a   : > { %v1910_v9 = vpop.f32.mrf.mxu0  ;;  %v2071_v50 = vpop.f32.mrf.mxu1  ;;  %3864 = vmatprep.subr.mxu0 %v2642_v23  ;;  %3944 = vmatprep.subr.mxu1 %v2674_v38  ;;  %v1183_v4 = vadd.f32 %v6315_v43, %v5493_v60  ;;  %v1344_v3 = vadd.f32 %v6316_v53, %v5496_v44  ;;  %v2621_v43 = vld [vmem:[%s6219_s10 + $0x208] sm:$0xff] }
 0x30b   : > { %2793 = vmatprep.mubr.f32.mxu0 %v2501_v25  ;;  %2938 = vmatprep.mubr.f32.mxu1 %v2503_v33  ;;  %v2508_v18 = vmul.f32 %v1910_v9, %v1171_v48  ;;  %v2510_v49 = vmul.f32 %v2071_v50, %v1332_v30  ;;  %v2623_v33 = vld [vmem:[%s6219_s10 + $0x218] sm:$0xff]  ;;  %v6318_v50 = vld [vmem:[#allocation12_spill] sm:$0xff]  ;;  %v6327_v53 = vld [vmem:[#allocation19_spill] sm:$0xff] }
 0x30c   : > { %v1912_v51 = vpop.f32.mrf.mxu0  ;;  %v2073_v31 = vpop.f32.mrf.mxu1  ;;  %2794 = vmatmul.mubr.f32.gmra.mxu0 %v2500_v8  ;;  %2939 = vmatmul.mubr.f32.gmra.mxu1 %v2502_v46  ;;  %v2655_v8 = vld [vmem:[%s6219_s10 + $0x318] sm:$0xff]  ;;  %v6317_v46 = vld [vmem:[#allocation11_spill] sm:$0xff] }
 0x30d   : > { %v2509_v59 = vmul.f32 %v1912_v51, %v1173_v34  ;;  %v2511_v5 = vmul.f32 %v2073_v31, %v1334_v47  ;;  %3865 = vmatpush3.msra.mxu0 %v2626_v16  ;;  %3945 = vmatpush3.msra.mxu1 %v2658_v17  ;;  %v1191_v9 = vadd.f32 %v6317_v46, %v5487_v41  ;;  %v2638_v17 = vld [vmem:[%s6219_s10 + $0x290] sm:$0xff]  ;;  %v6319_v47 = vld [vmem:[#allocation9_spill] sm:$0xff]  ;;  %v6321_v31 = vld [vmem:[#allocation75_spill] sm:$0xff] }
 0x30e   : > { %v1916_v19 = vpop.f32.mrf.mxu0  ;;  %v2077_v6 = vpop.f32.mrf.mxu1  ;;  %3866 = vmatprep.subr.mxu0 %v2641_v13  ;;  %3946 = vmatprep.subr.mxu1 %v2673_v54  ;;  %v1352_v16 = vadd.f32 %v6318_v50, %v5490_v39  ;;  %v2670_v34 = vld [vmem:[%s6219_s10 + $0x390] sm:$0xff]  ;;  %v1189_v13 = vadd.f32 %v6319_v47, %v5493_v60  ;;  %v6320_v54 = vld [vmem:[#allocation10_spill] sm:$0xff]  ;;  %v6331_v47 = vld [vmem:[#allocation23_spill] sm:$0xff] }
 0x30f   : > { %2798 = vmatprep.mubr.f32.mxu0 %v2509_v59  ;;  %2943 = vmatprep.mubr.f32.mxu1 %v2511_v5  ;;  %v2516_v2 = vmul.f32 %v1916_v19, %v1177_v14  ;;  %v2518_v37 = vmul.f32 %v2077_v6, %v1338_v7  ;;  %v1350_v48 = vadd.f32 %v6320_v54, %v5496_v44  ;;  %v973_v59 = vsub.s32 4, %v6321_v31  ;;  %v2669_v7 = vld [vmem:[%s6219_s10 + $0x388] sm:$0xff]  ;;  %v6332_v54 = vld [vmem:[#allocation24_spill] sm:$0xff] }
 0x310   : > { %v1918_v35 = vpop.f32.mrf.mxu0  ;;  %v2079_v55 = vpop.f32.mrf.mxu1  ;;  %2799 = vmatmul.mubr.f32.gmra.mxu0 %v2508_v18  ;;  %2944 = vmatmul.mubr.f32.gmra.mxu1 %v2510_v49  ;;  %v977_v49 = vsub.s32 5, %v6321_v31  ;;  %v985_v14 = vsub.s32 7, %v6321_v31 }
 0x311   : > { %v2517_v56 = vmul.f32 %v1918_v35, %v1179_v45  ;;  %v2519_v1 = vmul.f32 %v2079_v55, %v1340_v40  ;;  %3867 = vmatpush3.msra.mxu0 %v2625_v29  ;;  %3947 = vmatpush3.msra.mxu1 %v2657_v32  ;;  %v2622_v45 = vld [vmem:[%s6219_s10 + $0x210] sm:$0xff]  ;;  %v6322_v40 = vld [vmem:[#allocation15_spill] sm:$0xff]  ;;  %v6324_v35 = vld [vmem:[#allocation13_spill] sm:$0xff] }
 0x312   : > { %v1922_v62 = vpop.f32.mrf.mxu0  ;;  %v2083_v28 = vpop.f32.mrf.mxu1  ;;  %3868 = vmatprep.subr.mxu0 %v2640_v0  ;;  %3948 = vmatprep.subr.mxu1 %v2672_v21  ;;  %v1197_v0 = vadd.f32 %v6322_v40, %v5487_v41  ;;  %v6323_v21 = vld [vmem:[#allocation16_spill] sm:$0xff]  ;;  %v1195_v55 = vadd.f32 %v6324_v35, %v5493_v60  ;;  %v6337_v35 = vld [vmem:[#allocation25_spill] sm:$0xff] }
 0x313   : > { %2803 = vmatprep.mubr.f32.mxu0 %v2517_v56  ;;  %2948 = vmatprep.mubr.f32.mxu1 %v2519_v1  ;;  %v2524_v57 = vmul.f32 %v1922_v62, %v1183_v4  ;;  %v2526_v24 = vmul.f32 %v2083_v28, %v1344_v3  ;;  %v1358_v61 = vadd.f32 %v6323_v21, %v5490_v39  ;;  %v6325_v56 = vld [vmem:[#allocation14_spill] sm:$0xff]  ;;  %v2653_v4 = vld [vmem:[%s6219_s10 + $0x308] sm:$0xff] }
 0x314   : > { %v1924_v22 = vpop.f32.mrf.mxu0  ;;  %v2085_v23 = vpop.f32.mrf.mxu1  ;;  %2804 = vmatmul.mubr.f32.gmra.mxu0 %v2516_v2  ;;  %2949 = vmatmul.mubr.f32.gmra.mxu1 %v2518_v37  ;;  %v1356_v1 = vadd.f32 %v6325_v56, %v5496_v44  ;;  %v981_v2 = vsub.s32 6, %v6321_v31  ;;  %v6326_v28 = vld [vmem:[#allocation82_spill] sm:$0xff]  ;;  %v1203_v3 = vadd.f32 %v6327_v53, %v5487_v41  ;;  %v6333_v31 = vld [vmem:[#allocation21_spill] sm:$0xff] }
 0x315   : > { %v2525_v38 = vmul.f32 %v1924_v22, %v1185_v11  ;;  %v2527_v52 = vmul.f32 %v2085_v23, %v1346_v20  ;;  %3869 = vmatpush3.msra.mxu0 %v2624_v26  ;;  %3949 = vmatpush3.msra.mxu1 %v2656_v10  ;;  %v5803_v26 = vrot.slane %v6326_v28, %v973_v59  ;;  %v6328_v22 = vld [vmem:[#allocation20_spill] sm:$0xff]  ;;  %v6330_v41 = vld [vmem:[#allocation18_spill] sm:$0xff]  ;;  %v3271_v53 = vld [vmem:[%s5514_s30 + $0x38] sm:$0xff] }
 0x316   : > { %v1928_v58 = vpop.f32.mrf.mxu0  ;;  %v2089_v25 = vpop.f32.mrf.mxu1  ;;  %3870 = vmatprep.subr.mxu0 %v2639_v36  ;;  %3950 = vmatprep.subr.mxu1 %v2671_v12  ;;  %v5806_v11 = vrot.slane %v6326_v28, %v977_v49  ;;  %v1364_v23 = vadd.f32 %v6328_v22, %v5490_v39  ;;  %v5832_v39 = vrot.slane %v6326_v28, %v981_v2  ;;  %v6338_v56 = vld [vmem:[#allocation26_spill] sm:$0xff]  ;;  %v6341_v22 = vld [vmem:[#allocation29_spill] sm:$0xff] }
 0x317   : > { %2808 = vmatprep.mubr.f32.mxu0 %v2525_v38  ;;  %2953 = vmatprep.mubr.f32.mxu1 %v2527_v52  ;;  %v2532_v19 = vmul.f32 %v1928_v58, %v1189_v13  ;;  %v2534_v6 = vmul.f32 %v2089_v25, %v1350_v48  ;;  %v5819_v38 = vrot.slane %v6326_v28, %v985_v14  ;;  %v2636_v52 = vld [vmem:[%s6219_s10 + $0x280] sm:$0xff] }
 0x318   : > { %v1930_v30 = vpop.f32.mrf.mxu0  ;;  %v2091_v51 = vpop.f32.mrf.mxu1  ;;  %2809 = vmatmul.mubr.f32.gmra.mxu0 %v2524_v57  ;;  %2954 = vmatmul.mubr.f32.gmra.mxu1 %v2526_v24  ;;  %v2668_v57 = vld [vmem:[%s6219_s10 + $0x380] sm:$0xff]  ;;  %v6329_v24 = vld [vmem:[#allocation17_spill] sm:$0xff]  ;;  %v1362_v25 = vadd.f32 %v6330_v41, %v5496_v44  ;;  %v1435_v13 = vadd.f32 %v6331_v47, %v5806_v11  ;;  %v1433_v59 = vadd.f32 %v6333_v31, %v5803_v26 }
 0x319   : > { %v2533_v5 = vmul.f32 %v1930_v30, %v1191_v9  ;;  %v2535_v18 = vmul.f32 %v2091_v51, %v1352_v16  ;;  %3871 = vmatpush3.msra.mxu0 %v2623_v33  ;;  %3951 = vmatpush3.msra.mxu1 %v2655_v8  ;;  %v1201_v58 = vadd.f32 %v6329_v24, %v5493_v60  ;;  %v2620_v44 = vld [vmem:[%s6219_s10 + $0x200] sm:$0xff]  ;;  %v3265_v30 = vld [vmem:[%s5514_s30 + $0x8] sm:$0xff]  ;;  %v3267_v51 = vld [vmem:[%s5514_s30 + $0x18] sm:$0xff] }
 0x31a   : > { %v1934_v29 = vpop.f32.mrf.mxu0  ;;  %v2095_v32 = vpop.f32.mrf.mxu1  ;;  %3872 = vmatprep.subr.mxu0 %v2638_v17  ;;  %3952 = vmatprep.subr.mxu1 %v2670_v34  ;;  %v2652_v34 = vld [vmem:[%s6219_s10 + $0x300] sm:$0xff]  ;;  %v1596_v48 = vadd.f32 %v6332_v54, %v5819_v38  ;;  %v6345_v47 = vld [vmem:[#allocation33_spill] sm:$0xff] }
 0x31b   : > { %2813 = vmatprep.mubr.f32.mxu0 %v2533_v5  ;;  %2958 = vmatprep.mubr.f32.mxu1 %v2535_v18  ;;  %v2540_v27 = vmul.f32 %v1934_v29, %v1195_v55  ;;  %v2542_v20 = vmul.f32 %v2095_v32, %v1356_v1  ;;  %v6334_v5 = vld [vmem:[#allocation22_spill] sm:$0xff]  ;;  %v1439_v55 = vadd.f32 %v6337_v35, %v5803_v26 }
 0x31c   : > { %v1936_v37 = vpop.f32.mrf.mxu0  ;;  %v2097_v62 = vpop.f32.mrf.mxu1  ;;  %2814 = vmatmul.mubr.f32.gmra.mxu0 %v2532_v19  ;;  %2959 = vmatmul.mubr.f32.gmra.mxu1 %v2534_v6  ;;  %v1594_v18 = vadd.f32 %v6334_v5, %v5832_v39  ;;  %v1600_v1 = vadd.f32 %v6338_v56, %v5832_v39  ;;  %v6346_v54 = vld [vmem:[#allocation34_spill] sm:$0xff] }
 0x31d   : > { %v2541_v10 = vmul.f32 %v1936_v37, %v1197_v0  ;;  %v2543_v42 = vmul.f32 %v2097_v62, %v1358_v61  ;;  %3873 = vmatpush3.msra.mxu0 %v2622_v45  ;;  %3953 = vmatpush3.msra.mxu1 %v2654_v63  ;;  %v6335_v0 = vld [vmem:[#allocation27_spill] sm:$0xff]  ;;  %v6336_v61 = vld [vmem:[#allocation28_spill] sm:$0xff] }
 0x31e   : > { %v1940_v36 = vpop.f32.mrf.mxu0  ;;  %v2101_v12 = vpop.f32.mrf.mxu1  ;;  %3874 = vmatprep.subr.mxu0 %v2637_v15  ;;  %3954 = vmatprep.subr.mxu1 %v2669_v7  ;;  %v1441_v21 = vadd.f32 %v6335_v0, %v5806_v11  ;;  %v1602_v14 = vadd.f32 %v6336_v61, %v5819_v38  ;;  %v3269_v15 = vld [vmem:[%s5514_s30 + $0x28] sm:$0xff]  ;;  %v3268_v7 = vld [vmem:[%s5514_s30 + $0x20] sm:$0xff]  ;;  %v6349_v0 = vld [vmem:[#allocation37_spill] sm:$0xff] }
 0x31f   : > { %2818 = vmatprep.mubr.f32.mxu0 %v2541_v10  ;;  %2963 = vmatprep.mubr.f32.mxu1 %v2543_v42  ;;  %v2548_v50 = vmul.f32 %v1940_v36, %v1201_v58  ;;  %v2550_v16 = vmul.f32 %v2101_v12, %v1362_v25  ;;  %v6339_v36 = vld [vmem:[#allocation31_spill] sm:$0xff]  ;;  %v6350_v61 = vld [vmem:[#allocation38_spill] sm:$0xff] }
 0x320   : > { %v1942_v33 = vpop.f32.mrf.mxu0  ;;  %v2103_v8 = vpop.f32.mrf.mxu1  ;;  %2819 = vmatmul.mubr.f32.gmra.mxu0 %v2540_v27  ;;  %2964 = vmatmul.mubr.f32.gmra.mxu1 %v2542_v20  ;;  %v1447_v12 = vadd.f32 %v6339_v36, %v5806_v11  ;;  %v6353_v36 = vld [vmem:[#allocation41_spill] sm:$0xff] }
 0x321   : > { %v2549_v46 = vmul.f32 %v1942_v33, %v1203_v3  ;;  %v2551_v9 = vmul.f32 %v2103_v8, %v1364_v23  ;;  %3875 = vmatpush3.msra.mxu0 %v2621_v43  ;;  %3955 = vmatpush3.msra.mxu1 %v2653_v4  ;;  %v6340_v43 = vld [vmem:[#allocation32_spill] sm:$0xff]  ;;  %v1445_v23 = vadd.f32 %v6341_v22, %v5803_v26 }
 0x322   : > { %v2172_v17 = vpop.f32.mrf.mxu0  ;;  %v2333_v60 = vpop.f32.mrf.mxu1  ;;  %3876 = vmatprep.subr.mxu0 %v2636_v52  ;;  %3956 = vmatprep.subr.mxu1 %v2668_v57  ;;  %v1608_v4 = vadd.f32 %v6340_v43, %v5819_v38  ;;  %v3270_v3 = vld [vmem:[%s5514_s30 + $0x30] sm:$0xff]  ;;  %v6342_v52 = vld [vmem:[#allocation30_spill] sm:$0xff] }
 0x323   : > { %2823 = vmatprep.mubr.f32.mxu0 %v2549_v46  ;;  %2968 = vmatprep.mubr.f32.mxu1 %v2551_v9  ;;  %v2432_v32 = vmul.f32 %v2172_v17, %v1433_v59  ;;  %v2434_v45 = vmul.f32 %v2333_v60, %v1594_v18  ;;  %v1606_v57 = vadd.f32 %v6342_v52, %v5832_v39  ;;  %v6344_v17 = vld [vmem:[#allocation36_spill] sm:$0xff]  ;;  %v6354_v43 = vld [vmem:[#allocation42_spill] sm:$0xff] }
 0x324   : > { %v2174_v49 = vpop.f32.mrf.mxu0  ;;  %v2335_v19 = vpop.f32.mrf.mxu1  ;;  %2824 = vmatmul.mubr.f32.gmra.mxu0 %v2548_v50  ;;  %2969 = vmatmul.mubr.f32.gmra.mxu1 %v2550_v16  ;;  %v6343_v50 = vld [vmem:[#allocation35_spill] sm:$0xff]  ;;  %v1614_v60 = vadd.f32 %v6344_v17, %v5819_v38  ;;  %v6358_v17 = vld [vmem:[#allocation46_spill] sm:$0xff] }
 0x325   : > { %v2433_v6 = vmul.f32 %v2174_v49, %v1435_v13  ;;  %v2435_v29 = vmul.f32 %v2335_v19, %v1596_v48  ;;  %3877 = vmatpush3.msra.mxu0 %v2620_v44  ;;  %3957 = vmatpush3.msra.mxu1 %v2652_v34  ;;  %v1453_v16 = vadd.f32 %v6343_v50, %v5806_v11  ;;  %v3273_v44 = vld [vmem:[%s5514_s30 + $0x48] sm:$0xff]  ;;  %v3272_v34 = vld [vmem:[%s5514_s30 + $0x40] sm:$0xff]  ;;  %v6357_v50 = vld [vmem:[#allocation45_spill] sm:$0xff] }
 0x326   : > { %v2178_v63 = vpop.f32.mrf.mxu0  ;;  %v2339_v40 = vpop.f32.mrf.mxu1  ;;  %3287 = vperm.xlu0 %4074, %v3265_v30   ;;  %3297 = vperm.xlu1 %4075, %v3267_v51   ;;  %v1451_v13 = vadd.f32 %v6345_v47, %v5803_v26  ;;  %v1612_v48 = vadd.f32 %v6346_v54, %v5832_v39 }
 0x327   : > { %3038 = vmatprep.mubr.f32.mxu0 %v2433_v6  ;;  %3183 = vmatprep.mubr.f32.mxu1 %v2435_v29  ;;  %v2440_v10 = vmul.f32 %v2178_v63, %v1439_v55  ;;  %v2442_v42 = vmul.f32 %v2339_v40, %v1600_v1  ;;  %v6347_v6 = vld [vmem:[#allocation39_spill] sm:$0xff]  ;;  %v3275_v63 = vld [vmem:[%s5514_s30 + $0x58] sm:$0xff]  ;;  %v3274_v40 = vld [vmem:[%s5514_s30 + $0x50] sm:$0xff] }
 0x328   : > { %v2180_v2 = vpop.f32.mrf.mxu0  ;;  %v2341_v37 = vpop.f32.mrf.mxu1  ;;  %3039 = vmatmul.mubr.f32.vlgmr.msra.gmra.mxu0 %v2432_v32  ;;  %3184 = vmatmul.mubr.f32.vlgmr.msra.gmra.mxu1 %v2434_v45  ;;  %v1459_v29 = vadd.f32 %v6347_v6, %v5806_v11  ;;  %v6348_v32 = vld [vmem:[#allocation40_spill] sm:$0xff]  ;;  %v6362_v6 = vld [vmem:[#allocation50_spill] sm:$0xff] }
 0x329   : > { %v2441_v62 = vmul.f32 %v2180_v2, %v1441_v21  ;;  %v2443_v28 = vmul.f32 %v2341_v37, %v1602_v14  ;;  %v1620_v45 = vadd.f32 %v6348_v32, %v5819_v38  ;;  %v1457_v21 = vadd.f32 %v6349_v0, %v5803_v26 }
 0x32a   : > { %v2184_v27 = vpop.f32.mrf.mxu0  ;;  %v2345_v20 = vpop.f32.mrf.mxu1  ;;  %3307 = vperm.xlu1 %4075, %v3269_v15   ;;  %3302 = vperm.xlu0 %4074, %v3268_v7   ;;  %v1618_v14 = vadd.f32 %v6350_v61, %v5832_v39 }
 0x32b   : > { %3043 = vmatprep.mubr.f32.mxu0 %v2441_v62  ;;  %3188 = vmatprep.mubr.f32.mxu1 %v2443_v28  ;;  %v2448_v33 = vmul.f32 %v2184_v27, %v1445_v23  ;;  %v2450_v8 = vmul.f32 %v2345_v20, %v1606_v57  ;;  %v6351_v62 = vld [vmem:[#allocation43_spill] sm:$0xff]  ;;  %v3276_v20 = vld [vmem:[%s5514_s30 + $0x60] sm:$0xff] }
 0x32c   : > { %v2186_v24 = vpop.f32.mrf.mxu0  ;;  %v2347_v58 = vpop.f32.mrf.mxu1  ;;  %3044 = vmatmul.mubr.f32.gmra.mxu0 %v2440_v10  ;;  %3189 = vmatmul.mubr.f32.gmra.mxu1 %v2442_v42  ;;  %v1465_v28 = vadd.f32 %v6351_v62, %v5806_v11  ;;  %v6352_v10 = vld [vmem:[#allocation44_spill] sm:$0xff]  ;;  %v3277_v27 = vld [vmem:[%s5514_s30 + $0x68] sm:$0xff] }
 0x32d   : > { %v2449_v41 = vmul.f32 %v2186_v24, %v1447_v12  ;;  %v2451_v25 = vmul.f32 %v2347_v58, %v1608_v4  ;;  %v1626_v42 = vadd.f32 %v6352_v10, %v5819_v38  ;;  %v1463_v12 = vadd.f32 %v6353_v36, %v5803_v26 }
 0x32e   : > { %v2190_v46 = vpop.f32.mrf.mxu0  ;;  %v2351_v9 = vpop.f32.mrf.mxu1  ;;  %3317 = vperm.xlu1 %4075, %v3271_v53   ;;  %3312 = vperm.xlu0 %4074, %v3270_v3   ;;  %v1624_v4 = vadd.f32 %v6354_v43, %v5832_v39  ;;  %v6367_v43 = vld [vmem:[#allocation59_spill] sm:$0xff] }
 0x32f   : > { %3048 = vmatprep.mubr.f32.mxu0 %v2449_v41  ;;  %3193 = vmatprep.mubr.f32.mxu1 %v2451_v25  ;;  %v2456_v5 = vmul.f32 %v2190_v46, %v1451_v13  ;;  %v2458_v18 = vmul.f32 %v2351_v9, %v1612_v48  ;;  %v6355_v41 = vld [vmem:[#allocation47_spill] sm:$0xff]  ;;  %v3279_v46 = vld [vmem:[%s5514_s30 + $0x78] sm:$0xff]  ;;  %v3278_v9 = vld [vmem:[%s5514_s30 + $0x70] sm:$0xff] }
 0x330   : > { %v2192_v30 = vpop.f32.mrf.mxu0  ;;  %v2353_v51 = vpop.f32.mrf.mxu1  ;;  %3049 = vmatmul.mubr.f32.gmra.mxu0 %v2448_v33  ;;  %3194 = vmatmul.mubr.f32.gmra.mxu1 %v2450_v8  ;;  %v1471_v25 = vadd.f32 %v6355_v41, %v5806_v11  ;;  %v6356_v33 = vld [vmem:[#allocation48_spill] sm:$0xff] }
 0x331   : > { %v2457_v31 = vmul.f32 %v2192_v30, %v1453_v16  ;;  %v2459_v59 = vmul.f32 %v2353_v51, %v1614_v60  ;;  %v1632_v8 = vadd.f32 %v6356_v33, %v5819_v38  ;;  %v1469_v16 = vadd.f32 %v6357_v50, %v5803_v26  ;;  %v6371_v50 = vld [vmem:[#allocation63_spill] sm:$0xff] }
 0x332   : > { %v2196_v49 = vpop.f32.mrf.mxu0  ;;  %v2357_v19 = vpop.f32.mrf.mxu1  ;;  %3327 = vperm.xlu1 %4075, %v3273_v44   ;;  %3322 = vperm.xlu0 %4074, %v3272_v34   ;;  %v1630_v60 = vadd.f32 %v6358_v17, %v5832_v39  ;;  %v6372_v17 = vld [vmem:[#allocation64_spill] sm:$0xff] }
 0x333   : > { %3053 = vmatprep.mubr.f32.mxu0 %v2457_v31  ;;  %3198 = vmatprep.mubr.f32.mxu1 %v2459_v59  ;;  %v2464_v56 = vmul.f32 %v2196_v49, %v1457_v21  ;;  %v2466_v1 = vmul.f32 %v2357_v19, %v1618_v14  ;;  %v6359_v31 = vld [vmem:[#allocation51_spill] sm:$0xff]  ;;  %v6361_v49 = vld [vmem:[#allocation49_spill] sm:$0xff] }
 0x334   : > { %v2198_v15 = vpop.f32.mrf.mxu0  ;;  %v2359_v7 = vpop.f32.mrf.mxu1  ;;  %3054 = vmatmul.mubr.f32.gmra.mxu0 %v2456_v5  ;;  %3199 = vmatmul.mubr.f32.gmra.mxu1 %v2458_v18  ;;  %v1477_v59 = vadd.f32 %v6359_v31, %v5806_v11  ;;  %v6360_v5 = vld [vmem:[#allocation52_spill] sm:$0xff]  ;;  %v1475_v19 = vadd.f32 %v6361_v49, %v5803_v26  ;;  %v6375_v49 = vld [vmem:[#allocation67_spill] sm:$0xff] }
 0x335   : > { %v2465_v35 = vmul.f32 %v2198_v15, %v1459_v29  ;;  %v2467_v55 = vmul.f32 %v2359_v7, %v1620_v45  ;;  %v1638_v18 = vadd.f32 %v6360_v5, %v5819_v38  ;;  %v1636_v29 = vadd.f32 %v6362_v6, %v5832_v39  ;;  %v6363_v15 = vld [vmem:[#allocation55_spill] sm:$0xff]  ;;  %v6376_v6 = vld [vmem:[#allocation68_spill] sm:$0xff] }
 0x336   : > { %v2202_v2 = vpop.f32.mrf.mxu0  ;;  %v2363_v37 = vpop.f32.mrf.mxu1  ;;  %3337 = vperm.xlu1 %4075, %v3275_v63   ;;  %3332 = vperm.xlu0 %4074, %v3274_v40   ;;  %v1483_v7 = vadd.f32 %v6363_v15, %v5806_v11 }
 0x337   : > { %3058 = vmatprep.mubr.f32.mxu0 %v2465_v35  ;;  %3203 = vmatprep.mubr.f32.mxu1 %v2467_v55  ;;  %v2472_v52 = vmul.f32 %v2202_v2, %v1463_v12  ;;  %v2474_v57 = vmul.f32 %v2363_v37, %v1624_v4  ;;  %v6364_v35 = vld [vmem:[#allocation56_spill] sm:$0xff]  ;;  %v6366_v2 = vld [vmem:[#allocation54_spill] sm:$0xff]  ;;  %v1489_v4 = vadd.f32 %v6367_v43, %v5806_v11 }
 0x338   : > { %v2204_v53 = vpop.f32.mrf.mxu0  ;;  %v2365_v3 = vpop.f32.mrf.mxu1  ;;  %3059 = vmatmul.mubr.f32.gmra.mxu0 %v2464_v56  ;;  %3204 = vmatmul.mubr.f32.gmra.mxu1 %v2466_v1  ;;  %v1644_v55 = vadd.f32 %v6364_v35, %v5819_v38  ;;  %v6365_v56 = vld [vmem:[#allocation53_spill] sm:$0xff]  ;;  %v1642_v37 = vadd.f32 %v6366_v2, %v5832_v39  ;;  %v6380_v2 = vld [vmem:[#allocation72_spill] sm:$0xff] }
 0x339   : > { %v2473_v22 = vmul.f32 %v2204_v53, %v1465_v28  ;;  %v2475_v23 = vmul.f32 %v2365_v3, %v1626_v42  ;;  %v1481_v1 = vadd.f32 %v6365_v56, %v5803_v26  ;;  %v6368_v53 = vld [vmem:[#allocation60_spill] sm:$0xff]  ;;  %v6379_v56 = vld [vmem:[#allocation71_spill] sm:$0xff] }
 0x33a   : > { %v2208_v24 = vpop.f32.mrf.mxu0  ;;  %v2369_v58 = vpop.f32.mrf.mxu1  ;;  %3347 = vperm.xlu1 %4075, %v3277_v27   ;;  %3342 = vperm.xlu0 %4074, %v3276_v20   ;;  %v1650_v3 = vadd.f32 %v6368_v53, %v5819_v38 }
 0x33b   : > { %3063 = vmatprep.mubr.f32.mxu0 %v2473_v22  ;;  %3208 = vmatprep.mubr.f32.mxu1 %v2475_v23  ;;  %v2480_v54 = vmul.f32 %v2208_v24, %v1469_v16  ;;  %v2482_v48 = vmul.f32 %v2369_v58, %v1630_v60  ;;  %v6369_v22 = vld [vmem:[#allocation57_spill] sm:$0xff]  ;;  %v1495_v16 = vadd.f32 %v6371_v50, %v5806_v11 }
 0x33c   : > { %v2210_v44 = vpop.f32.mrf.mxu0  ;;  %v2371_v34 = vpop.f32.mrf.mxu1  ;;  %3064 = vmatmul.mubr.f32.gmra.mxu0 %v2472_v52  ;;  %3209 = vmatmul.mubr.f32.gmra.mxu1 %v2474_v57  ;;  %v1487_v23 = vadd.f32 %v6369_v22, %v5803_v26  ;;  %v6370_v52 = vld [vmem:[#allocation58_spill] sm:$0xff]  ;;  %v1656_v60 = vadd.f32 %v6372_v17, %v5819_v38  ;;  %v6383_v22 = vld [vmem:[#allocation76_spill] sm:$0xff] }
 0x33d   : > { %v2481_v47 = vmul.f32 %v2210_v44, %v1471_v25  ;;  %v2483_v13 = vmul.f32 %v2371_v34, %v1632_v8  ;;  %v1648_v57 = vadd.f32 %v6370_v52, %v5832_v39  ;;  %v6373_v44 = vld [vmem:[#allocation61_spill] sm:$0xff] }
 0x33e   : > { %v2214_v30 = vpop.f32.mrf.mxu0  ;;  %v2375_v51 = vpop.f32.mrf.mxu1  ;;  %3357 = vperm.xlu1 %4075, %v3279_v46   ;;  %3352 = vperm.xlu0 %4074, %v3278_v9   ;;  %v1493_v34 = vadd.f32 %v6373_v44, %v5803_v26  ;;  %v6384_v52 = vld [vmem:[#allocation77_spill] sm:$0xff]  ;;  %v6387_v44 = vld [vmem:[#allocation80_spill] sm:$0xff] }
 0x33f   : > { %3068 = vmatprep.mubr.f32.mxu0 %v2481_v47  ;;  %3213 = vmatprep.mubr.f32.mxu1 %v2483_v13  ;;  %v2488_v0 = vmul.f32 %v2214_v30, %v1475_v19  ;;  %v2490_v21 = vmul.f32 %v2375_v51, %v1636_v29  ;;  %v6374_v47 = vld [vmem:[#allocation62_spill] sm:$0xff]  ;;  %v1501_v19 = vadd.f32 %v6375_v49, %v5806_v11 }
 0x340   : > { %v2216_v32 = vpop.f32.mrf.mxu0  ;;  %v2377_v45 = vpop.f32.mrf.mxu1  ;;  %3069 = vmatmul.mubr.f32.gmra.mxu0 %v2480_v54  ;;  %3214 = vmatmul.mubr.f32.gmra.mxu1 %v2482_v48  ;;  %v1654_v13 = vadd.f32 %v6374_v47, %v5832_v39  ;;  %v1662_v29 = vadd.f32 %v6376_v6, %v5819_v38  ;;  %v6388_v47 = vld [vmem:[#allocation81_spill] sm:$0xff] }
 0x341   : > { %v2489_v63 = vmul.f32 %v2216_v32, %v1477_v59  ;;  %v2491_v40 = vmul.f32 %v2377_v45, %v1638_v18  ;;  %v6377_v32 = vld [vmem:[#allocation65_spill] sm:$0xff] }
 0x342   : > { %v2220_v61 = vpop.f32.mrf.mxu0  ;;  %v2381_v14 = vpop.f32.mrf.mxu1  ;;  %v1499_v45 = vadd.f32 %v6377_v32, %v5803_v26  ;;  %v6391_v32 = vld [vmem:[#allocation85_spill] sm:$0xff] }
 0x343   : > { %3073 = vmatprep.mubr.f32.mxu0 %v2489_v63  ;;  %3218 = vmatprep.mubr.f32.mxu1 %v2491_v40  ;;  %v2496_v27 = vmul.f32 %v2220_v61, %v1481_v1  ;;  %v2498_v20 = vmul.f32 %v2381_v14, %v1642_v37  ;;  %v6378_v63 = vld [vmem:[#allocation66_spill] sm:$0xff]  ;;  %v1507_v1 = vadd.f32 %v6379_v56, %v5806_v11 }
 0x344   : > { %v2222_v62 = vpop.f32.mrf.mxu0  ;;  %v2383_v28 = vpop.f32.mrf.mxu1  ;;  %3074 = vmatmul.mubr.f32.gmra.mxu0 %v2488_v0  ;;  %3219 = vmatmul.mubr.f32.gmra.mxu1 %v2490_v21  ;;  %v1660_v40 = vadd.f32 %v6378_v63, %v5832_v39  ;;  %v1668_v37 = vadd.f32 %v6380_v2, %v5819_v38  ;;  %v6392_v63 = vld [vmem:[#allocation86_spill] sm:$0xff] }
 0x345   : > { %v2497_v10 = vmul.f32 %v2222_v62, %v1483_v7  ;;  %v2499_v42 = vmul.f32 %v2383_v28, %v1644_v55  ;;  %v6381_v62 = vld [vmem:[#allocation69_spill] sm:$0xff] }
 0x346   : > { %v2226_v36 = vpop.f32.mrf.mxu0  ;;  %v2387_v12 = vpop.f32.mrf.mxu1  ;;  %v1505_v28 = vadd.f32 %v6381_v62, %v5803_v26 }
 0x347   : > { %3078 = vmatprep.mubr.f32.mxu0 %v2497_v10  ;;  %3223 = vmatprep.mubr.f32.mxu1 %v2499_v42  ;;  %v2504_v33 = vmul.f32 %v2226_v36, %v1487_v23  ;;  %v2506_v8 = vmul.f32 %v2387_v12, %v1648_v57  ;;  %v6382_v10 = vld [vmem:[#allocation70_spill] sm:$0xff]  ;;  %v1513_v23 = vadd.f32 %v6383_v22, %v5806_v11 }
 0x348   : > { %v2228_v24 = vpop.f32.mrf.mxu0  ;;  %v2389_v58 = vpop.f32.mrf.mxu1  ;;  %3079 = vmatmul.mubr.f32.gmra.mxu0 %v2496_v27  ;;  %3224 = vmatmul.mubr.f32.gmra.mxu1 %v2498_v20  ;;  %v1666_v42 = vadd.f32 %v6382_v10, %v5832_v39  ;;  %v1674_v57 = vadd.f32 %v6384_v52, %v5819_v38 }
 0x349   : > { %v2505_v41 = vmul.f32 %v2228_v24, %v1489_v4  ;;  %v2507_v25 = vmul.f32 %v2389_v58, %v1650_v3  ;;  %v6385_v24 = vld [vmem:[#allocation73_spill] sm:$0xff] }
 0x34a   : > { %v2232_v46 = vpop.f32.mrf.mxu0  ;;  %v2393_v9 = vpop.f32.mrf.mxu1  ;;  %v1511_v58 = vadd.f32 %v6385_v24, %v5803_v26 }
 0x34b   : > { %3083 = vmatprep.mubr.f32.mxu0 %v2505_v41  ;;  %3228 = vmatprep.mubr.f32.mxu1 %v2507_v25  ;;  %v2512_v31 = vmul.f32 %v2232_v46, %v1493_v34  ;;  %v2514_v59 = vmul.f32 %v2393_v9, %v1654_v13  ;;  %v6386_v41 = vld [vmem:[#allocation74_spill] sm:$0xff]  ;;  %v1519_v34 = vadd.f32 %v6387_v44, %v5806_v11 }
 0x34c   : > { %v2234_v54 = vpop.f32.mrf.mxu0  ;;  %v2395_v48 = vpop.f32.mrf.mxu1  ;;  %3084 = vmatmul.mubr.f32.gmra.mxu0 %v2504_v33  ;;  %3229 = vmatmul.mubr.f32.gmra.mxu1 %v2506_v8  ;;  %v1672_v25 = vadd.f32 %v6386_v41, %v5832_v39  ;;  %v1680_v13 = vadd.f32 %v6388_v47, %v5819_v38 }
 0x34d   : > { %v2513_v30 = vmul.f32 %v2234_v54, %v1495_v16  ;;  %v2515_v51 = vmul.f32 %v2395_v48, %v1656_v60  ;;  %v6389_v54 = vld [vmem:[#allocation78_spill] sm:$0xff] }
 0x34e   : > { %v2238_v5 = vpop.f32.mrf.mxu0  ;;  %v2399_v18 = vpop.f32.mrf.mxu1  ;;  %v1517_v48 = vadd.f32 %v6389_v54, %v5803_v26 }
 0x34f   : > { %3088 = vmatprep.mubr.f32.mxu0 %v2513_v30  ;;  %3233 = vmatprep.mubr.f32.mxu1 %v2515_v51  ;;  %v2520_v15 = vmul.f32 %v2238_v5, %v1499_v45  ;;  %v2522_v7 = vmul.f32 %v2399_v18, %v1660_v40  ;;  %v6390_v30 = vld [vmem:[#allocation79_spill] sm:$0xff]  ;;  %v1525_v45 = vadd.f32 %v6391_v32, %v5806_v11 }
 0x350   : > { %v2240_v0 = vpop.f32.mrf.mxu0  ;;  %v2401_v21 = vpop.f32.mrf.mxu1  ;;  %3089 = vmatmul.mubr.f32.gmra.mxu0 %v2512_v31  ;;  %3234 = vmatmul.mubr.f32.gmra.mxu1 %v2514_v59  ;;  %v1678_v51 = vadd.f32 %v6390_v30, %v5832_v39  ;;  %v1686_v40 = vadd.f32 %v6392_v63, %v5819_v38 }
 0x351   : > { %v2521_v61 = vmul.f32 %v2240_v0, %v1501_v19  ;;  %v2523_v14 = vmul.f32 %v2401_v21, %v1662_v29  ;;  %v6393_v0 = vld [vmem:[#allocation83_spill] sm:$0xff] }
 0x352   : > { %v2244_v35 = vpop.f32.mrf.mxu0  ;;  %v2405_v55 = vpop.f32.mrf.mxu1  ;;  %v1523_v21 = vadd.f32 %v6393_v0, %v5803_v26 }
 0x353   : > { %3093 = vmatprep.mubr.f32.mxu0 %v2521_v61  ;;  %3238 = vmatprep.mubr.f32.mxu1 %v2523_v14  ;;  %v2528_v43 = vmul.f32 %v2244_v35, %v1505_v28  ;;  %v2530_v4 = vmul.f32 %v2405_v55, %v1666_v42  ;;  %v6394_v61 = vld [vmem:[#allocation84_spill] sm:$0xff] }
 0x354   : > { %v2246_v27 = vpop.f32.mrf.mxu0  ;;  %v2407_v20 = vpop.f32.mrf.mxu1  ;;  %3094 = vmatmul.mubr.f32.gmra.mxu0 %v2520_v15  ;;  %3239 = vmatmul.mubr.f32.gmra.mxu1 %v2522_v7  ;;  %v1684_v14 = vadd.f32 %v6394_v61, %v5832_v39 }
 0x355   : > { %v2529_v36 = vmul.f32 %v2246_v27, %v1507_v1  ;;  %v2531_v12 = vmul.f32 %v2407_v20, %v1668_v37 }
 0x356   : > { %v2250_v53 = vpop.f32.mrf.mxu0  ;;  %v2411_v3 = vpop.f32.mrf.mxu1 }
 0x357   : > { %3098 = vmatprep.mubr.f32.mxu0 %v2529_v36  ;;  %3243 = vmatprep.mubr.f32.mxu1 %v2531_v12  ;;  %v2536_v50 = vmul.f32 %v2250_v53, %v1511_v58  ;;  %v2538_v16 = vmul.f32 %v2411_v3, %v1672_v25 }
 0x358   : > { %v2252_v33 = vpop.f32.mrf.mxu0  ;;  %v2413_v8 = vpop.f32.mrf.mxu1  ;;  %3099 = vmatmul.mubr.f32.gmra.mxu0 %v2528_v43  ;;  %3244 = vmatmul.mubr.f32.gmra.mxu1 %v2530_v4 }
 0x359   : > { %v2537_v46 = vmul.f32 %v2252_v33, %v1513_v23  ;;  %v2539_v9 = vmul.f32 %v2413_v8, %v1674_v57 }
 0x35a   : > { %v2256_v17 = vpop.f32.mrf.mxu0  ;;  %v2417_v60 = vpop.f32.mrf.mxu1 }
 0x35b   : > { %3103 = vmatprep.mubr.f32.mxu0 %v2537_v46  ;;  %3248 = vmatprep.mubr.f32.mxu1 %v2539_v9  ;;  %v2544_v49 = vmul.f32 %v2256_v17, %v1517_v48  ;;  %v2546_v19 = vmul.f32 %v2417_v60, %v1678_v51 }
 0x35c   : > { %v2258_v31 = vpop.f32.mrf.mxu0  ;;  %v2419_v59 = vpop.f32.mrf.mxu1  ;;  %3104 = vmatmul.mubr.f32.gmra.mxu0 %v2536_v50  ;;  %3249 = vmatmul.mubr.f32.gmra.mxu1 %v2538_v16 }
 0x35d   : > { %v2545_v5 = vmul.f32 %v2258_v31, %v1519_v34  ;;  %v2547_v18 = vmul.f32 %v2419_v59, %v1680_v13 }
 0x35e   : > { %v2262_v6 = vpop.f32.mrf.mxu0  ;;  %v2423_v29 = vpop.f32.mrf.mxu1 }
 0x35f   : > { %3108 = vmatprep.mubr.f32.mxu0 %v2545_v5  ;;  %3253 = vmatprep.mubr.f32.mxu1 %v2547_v18  ;;  %v2552_v56 = vmul.f32 %v2262_v6, %v1523_v21  ;;  %v2554_v1 = vmul.f32 %v2423_v29, %v1684_v14 }
 0x360   : > { %v2264_v15 = vpop.f32.mrf.mxu0  ;;  %v2425_v7 = vpop.f32.mrf.mxu1  ;;  %3109 = vmatmul.mubr.f32.gmra.mxu0 %v2544_v49  ;;  %3254 = vmatmul.mubr.f32.gmra.mxu1 %v2546_v19 }
 0x361   : > { %v2553_v35 = vmul.f32 %v2264_v15, %v1525_v45  ;;  %v2555_v55 = vmul.f32 %v2425_v7, %v1686_v40 }
 0x363   : > { %3113 = vmatprep.mubr.f32.mxu0 %v2553_v35  ;;  %3258 = vmatprep.mubr.f32.mxu1 %v2555_v55 }
 0x364   : > { %3114 = vmatmul.mubr.f32.gmra.mxu0 %v2552_v56  ;;  %3259 = vmatmul.mubr.f32.gmra.mxu1 %v2554_v1 }
 0x3a8   : > { %v5982_v11 = vpop.f32.mrf.mxu0  ;;  %v5984_v38 = vpop.f32.mrf.mxu1 }
 0x3aa   : > { %v3719_v26 = vpop.f32.mrf.mxu0  ;;  %v3799_v2 = vpop.f32.mrf.mxu1 }
 0x3ac   : > { %v5986_v37 = vpop.f32.mrf.mxu0  ;;  %v5988_v39 = vpop.f32.mrf.mxu1 }
 0x3ae   : > { %v5990_v62 = vpop.f32.mrf.mxu0  ;;  %v5992_v28 = vpop.f32.mrf.mxu1 }
 0x3b0   : > { %v5994_v10 = vpop.f32.mrf.mxu0  ;;  %v5996_v42 = vpop.f32.mrf.mxu1 }
 0x3b2   : > { %v5998_v27 = vpop.f32.mrf.mxu0  ;;  %v6000_v20 = vpop.f32.mrf.mxu1 }
 0x3b4   : > { %v6002_v36 = vpop.f32.mrf.mxu0  ;;  %v6004_v12 = vpop.f32.mrf.mxu1 }
 0x3b6   : > { %v6006_v43 = vpop.f32.mrf.mxu0  ;;  %v6008_v4 = vpop.f32.mrf.mxu1 }
 0x3b8   : > { %v6010_v53 = vpop.f32.mrf.mxu0  ;;  %v6012_v3 = vpop.f32.mrf.mxu1 }
 0x3ba   : > { %v6014_v22 = vpop.f32.mrf.mxu0  ;;  %v6016_v23 = vpop.f32.mrf.mxu1 }
 0x3bc   : > { %v6018_v52 = vpop.f32.mrf.mxu0  ;;  %v6020_v57 = vpop.f32.mrf.mxu1 }
 0x3be   : > { %v6022_v24 = vpop.f32.mrf.mxu0  ;;  %v6024_v58 = vpop.f32.mrf.mxu1 }
 0x3c0   : > { %v6026_v41 = vpop.f32.mrf.mxu0  ;;  %v6028_v25 = vpop.f32.mrf.mxu1 }
 0x3c2   : > { %v6030_v33 = vpop.f32.mrf.mxu0  ;;  %v6032_v8 = vpop.f32.mrf.mxu1 }
 0x3c4   : > { %v6034_v46 = vpop.f32.mrf.mxu0  ;;  %v6036_v9 = vpop.f32.mrf.mxu1 }
 0x3c6   : > { %v6038_v50 = vpop.f32.mrf.mxu0  ;;  %v6040_v16 = vpop.f32.mrf.mxu1 }
 0x3c8   : > { %v6042_v17 = vpop.f32.mrf.mxu0  ;;  %v6044_v60 = vpop.f32.mrf.mxu1 }
 0x3ca   : > { %v6046_v44 = vpop.f32.mrf.mxu0  ;;  %v6048_v34 = vpop.f32.mrf.mxu1 }
 0x3cc   : > { %v6050_v47 = vpop.f32.mrf.mxu0  ;;  %v6052_v13 = vpop.f32.mrf.mxu1 }
 0x3ce   : > { %v6054_v54 = vpop.f32.mrf.mxu0  ;;  %v6056_v48 = vpop.f32.mrf.mxu1 }
 0x3d0   : > { %v6058_v30 = vpop.f32.mrf.mxu0  ;;  %v6060_v51 = vpop.f32.mrf.mxu1 }
 0x3d2   : > { %v6062_v31 = vpop.f32.mrf.mxu0  ;;  %v6064_v59 = vpop.f32.mrf.mxu1 }
 0x3d4   : > { %v6066_v5 = vpop.f32.mrf.mxu0  ;;  %v6068_v18 = vpop.f32.mrf.mxu1 }
 0x3d6   : > { %v6070_v49 = vpop.f32.mrf.mxu0  ;;  %v6072_v19 = vpop.f32.mrf.mxu1 }
 0x3d8   : > { %v6074_v6 = vpop.f32.mrf.mxu0  ;;  %v6076_v29 = vpop.f32.mrf.mxu1 }
 0x3d9   : > { %6395 = vst [vmem:[#allocation4_spill] sm:$0xff] %v6076_v29 }
 0x3da   : > { %v6078_v32 = vpop.f32.mrf.mxu0  ;;  %v6080_v45 = vpop.f32.mrf.mxu1 }
 0x3db   : > { %6396 = vst [vmem:[#allocation2_spill] sm:$0xff] %v6078_v32  ;;  %6397 = vst [vmem:[#allocation3_spill] sm:$0xff] %v6080_v45 }
 0x3dc   : > { %v6082_v63 = vpop.f32.mrf.mxu0  ;;  %v6084_v40 = vpop.f32.mrf.mxu1 }
 0x3dd   : > { %6398 = vst [vmem:[#allocation7_spill] sm:$0xff] %v6082_v63  ;;  %6399 = vst [vmem:[#allocation8_spill] sm:$0xff] %v6084_v40  ;;  %v3720_v40 = vadd.f32 %v3719_v26, %v5982_v11  ;;  %v3806_v26 = vadd.f32 %v6000_v20, %v5996_v42  ;;  %v3729_v20 = vadd.f32 %v6006_v43, %v6002_v36 }
 0x3de   : > { %v6086_v0 = vpop.f32.mrf.mxu0  ;;  %v6088_v21 = vpop.f32.mrf.mxu1  ;;  %v3812_v36 = vadd.f32 %v6016_v23, %v6012_v3  ;;  %v3815_v3 = vadd.f32 %v6024_v58, %v6020_v57 }
 0x3df   : > { %6400 = vst [vmem:[#allocation5_spill] sm:$0xff] %v6086_v0  ;;  %6401 = vst [vmem:[#allocation6_spill] sm:$0xff] %v6088_v21  ;;  %v3800_v21 = vadd.f32 %v3799_v2, %v5984_v38  ;;  %v3726_v38 = vadd.f32 %v5998_v27, %v5994_v10 }
 0x3e0   : > { %v6090_v61 = vpop.f32.mrf.mxu0  ;;  %v6092_v14 = vpop.f32.mrf.mxu1 }
 0x3e1   : > { %6402 = vst [vmem:[#allocation11_spill] sm:$0xff] %v6090_v61  ;;  %6403 = vst [vmem:[#allocation12_spill] sm:$0xff] %v6092_v14  ;;  %v2896_v45 = vadd.f32 %v3800_v21, %v3720_v40  ;;  %v2906_v27 = vadd.f32 %v3806_v26, %v3726_v38 }
 0x3e2   : > { %v6094_v15 = vpop.f32.mrf.mxu0  ;;  %v6096_v7 = vpop.f32.mrf.mxu1 }
 0x3e3   : > { %6404 = vst [vmem:[#allocation9_spill] sm:$0xff] %v6094_v15  ;;  %6405 = vst [vmem:[#allocation10_spill] sm:$0xff] %v6096_v7  ;;  %v3723_v7 = vadd.f32 %v5990_v62, %v5986_v37 }
 0x3e4   : > { %v6098_v35 = vpop.f32.mrf.mxu0  ;;  %v6100_v55 = vpop.f32.mrf.mxu1 }
 0x3e5   : > { %6406 = vst [vmem:[#allocation75_spill] sm:$0xff] %v6098_v35  ;;  %6407 = vst [vmem:[#allocation15_spill] sm:$0xff] %v6100_v55  ;;  %v3803_v55 = vadd.f32 %v5992_v28, %v5988_v39 }
 0x3e6   : > { %v6102_v56 = vpop.f32.mrf.mxu0  ;;  %v6104_v1 = vpop.f32.mrf.mxu1 }
 0x3e7   : > { %6408 = vst [vmem:[#allocation16_spill] sm:$0xff] %v6102_v56  ;;  %6409 = vst [vmem:[#allocation13_spill] sm:$0xff] %v6104_v1  ;;  %v3283_v56 = vpop.permute.xlu0 %3282  ;;  %v2901_v21 = vadd.f32 %v3803_v55, %v3723_v7  ;;  %v3293_v55 = vpop.permute.xlu1 %3292 }
 0x3e8   : > { %v3878_v0 = vpop.f32.mrf.mxu0  ;;  %v3958_v61 = vpop.f32.mrf.mxu1 }
 0x3ea   : > { %v3879_v63 = vpop.f32.mrf.mxu0  ;;  %v3959_v14 = vpop.f32.mrf.mxu1 }
 0x3eb   : > { %v3880_v35 = vadd.f32 %v3879_v63, %v3878_v0  ;;  %v3960_v11 = vadd.f32 %v3959_v14, %v3958_v61  ;;  %v3288_v10 = vpop.permute.xlu0 %3287 }
 0x3ec   : > { %v3881_v15 = vpop.f32.mrf.mxu0  ;;  %v3961_v1 = vpop.f32.mrf.mxu1 }
 0x3ed   : > { %v3041_v29 = vadd.f32 %v3880_v35, %v2896_v45 }
 0x3ee   : > { %v3882_v2 = vpop.f32.mrf.mxu0  ;;  %v3962_v40 = vpop.f32.mrf.mxu1 }
 0x3ef   : > { %v3883_v32 = vadd.f32 %v3882_v2, %v3881_v15  ;;  %v3186_v37 = vadd.f32 %v3960_v11, %v3041_v29  ;;  %v3963_v45 = vadd.f32 %v3962_v40, %v3961_v1  ;;  %v3809_v29 = vadd.f32 %v6008_v4, %v6004_v12  ;;  %v3303_v57 = vpop.permute.xlu0 %3302 }
 0x3f0   : > { %v3884_v39 = vpop.f32.mrf.mxu0  ;;  %v3964_v62 = vpop.f32.mrf.mxu1  ;;  %v3732_v1 = vadd.f32 %v6014_v22, %v6010_v53  ;;  %v3735_v53 = vadd.f32 %v6022_v24, %v6018_v52  ;;  %v3818_v52 = vadd.f32 %v6032_v8, %v6028_v25  ;;  %v3741_v25 = vadd.f32 %v6038_v50, %v6034_v46 }
 0x3f1   : > { %v3046_v28 = vadd.f32 %v3883_v32, %v2901_v21  ;;  %v3360_v63 = vmul.f32 %v3283_v56, %v3186_v37  ;;  %v2911_v4 = vadd.f32 %v3809_v29, %v3729_v20  ;;  %v3298_v22 = vpop.permute.xlu1 %3297  ;;  %v3738_v20 = vadd.f32 %v6030_v33, %v6026_v41 }
 0x3f2   : > { %v3885_v0 = vpop.f32.mrf.mxu0  ;;  %v3965_v42 = vpop.f32.mrf.mxu1  ;;  %v3821_v33 = vadd.f32 %v6040_v16, %v6036_v9  ;;  %v3824_v46 = vadd.f32 %v6048_v34, %v6044_v60  ;;  %v3747_v60 = vadd.f32 %v6054_v54, %v6050_v47  ;;  %v3830_v47 = vadd.f32 %v6064_v59, %v6060_v51 }
 0x3f3   : > { %3376 = vst.msk [vmem:[%s6120_s27] sm:$0xff] %vm679_vm1, %v3360_v63  ;;  %v3886_v61 = vadd.f32 %v3885_v0, %v3884_v39  ;;  %v3191_v14 = vadd.f32 %v3963_v45, %v3046_v28  ;;  %v3966_v35 = vadd.f32 %v3965_v42, %v3964_v62  ;;  %v2916_v39 = vadd.f32 %v3812_v36, %v3732_v1  ;;  %v3313_v9 = vpop.permute.xlu0 %3312 }
 0x3f4   : > { %v3887_v15 = vpop.f32.mrf.mxu0  ;;  %v3967_v7 = vpop.f32.mrf.mxu1  ;;  %v3753_v51 = vadd.f32 %v6070_v49, %v6066_v5 }
 0x3f5   : > { %v3051_v32 = vadd.f32 %v3886_v61, %v2906_v27  ;;  %v3361_v56 = vmul.f32 %v3288_v10, %v3191_v14  ;;  %v2921_v61 = vadd.f32 %v3815_v3, %v3735_v53  ;;  %v3308_v8 = vpop.permute.xlu1 %3307 }
 0x3f6   : > { %v3888_v43 = vpop.f32.mrf.mxu0  ;;  %v3968_v12 = vpop.f32.mrf.mxu1 }
 0x3f7   : > { %v3196_v11 = vadd.f32 %v3966_v35, %v3051_v32  ;;  %3377 = vst.msk [vmem:[%s6120_s27 + $0x8] sm:$0xff] %vm679_vm1, %v3361_v56  ;;  %v3889_v38 = vadd.f32 %v3888_v43, %v3887_v15  ;;  %v3969_v37 = vadd.f32 %v3968_v12, %v3967_v7  ;;  %v2926_v56 = vadd.f32 %v3818_v52, %v3738_v20 }
 0x3f8   : > { %v3890_v26 = vpop.f32.mrf.mxu0  ;;  %v3970_v2 = vpop.f32.mrf.mxu1  ;;  %v3750_v52 = vadd.f32 %v6062_v31, %v6058_v30  ;;  %v3833_v31 = vadd.f32 %v6072_v19, %v6068_v18 }
 0x3f9   : > { %v3362_v40 = vmul.f32 %v3293_v55, %v3196_v11  ;;  %v3056_v21 = vadd.f32 %v3889_v38, %v2911_v4  ;;  %v3318_v34 = vpop.permute.xlu1 %3317 }
 0x3fa   : > { %v3891_v62 = vpop.f32.mrf.mxu0  ;;  %v3971_v28 = vpop.f32.mrf.mxu1  ;;  %v2951_v18 = vadd.f32 %v3833_v31, %v3753_v51  ;;  %v6422_v51 = vld [vmem:[#allocation16_spill] sm:$0xff] }
 0x3fb   : > { %3378 = vst.msk [vmem:[%s6120_s27 + $0x10] sm:$0xff] %vm679_vm1, %v3362_v40  ;;  %v3201_v23 = vadd.f32 %v3969_v37, %v3056_v21  ;;  %v3892_v45 = vadd.f32 %v3891_v62, %v3890_v26  ;;  %v3972_v42 = vadd.f32 %v3971_v28, %v3970_v2  ;;  %v3744_v2 = vadd.f32 %v6046_v44, %v6042_v17 }
 0x3fc   : > { %v3893_v63 = vpop.f32.mrf.mxu0  ;;  %v3973_v10 = vpop.f32.mrf.mxu1  ;;  %v2931_v21 = vadd.f32 %v3821_v33, %v3741_v25  ;;  %v3827_v44 = vadd.f32 %v6056_v48, %v6052_v13 }
 0x3fd   : > { %v3363_v27 = vmul.f32 %v3298_v22, %v3201_v23  ;;  %v3061_v0 = vadd.f32 %v3892_v45, %v2916_v39  ;;  %v2936_v22 = vadd.f32 %v3824_v46, %v3744_v2  ;;  %v3323_v48 = vpop.permute.xlu0 %3322  ;;  %v3328_v59 = vpop.permute.xlu1 %3327 }
 0x3fe   : > { %v3894_v24 = vpop.f32.mrf.mxu0  ;;  %v3974_v29 = vpop.f32.mrf.mxu1  ;;  %v2941_v13 = vadd.f32 %v3827_v44, %v3747_v60 }
 0x3ff   : > { %3379 = vst.msk [vmem:[%s6120_s27 + $0x18] sm:$0xff] %vm679_vm1, %v3363_v27  ;;  %v3206_v58 = vadd.f32 %v3972_v42, %v3061_v0  ;;  %v3895_v14 = vadd.f32 %v3894_v24, %v3893_v63  ;;  %v3975_v55 = vadd.f32 %v3974_v29, %v3973_v10 }
 0x400   : > { %v3896_v15 = vpop.f32.mrf.mxu0  ;;  %v3976_v7 = vpop.f32.mrf.mxu1 }
 0x401   : > { %v3364_v32 = vmul.f32 %v3303_v57, %v3206_v58  ;;  %v3066_v35 = vadd.f32 %v3895_v14, %v2921_v61  ;;  %v3333_v19 = vpop.permute.xlu0 %3332 }
 0x402   : > { %v3897_v1 = vpop.f32.mrf.mxu0  ;;  %v3977_v41 = vpop.f32.mrf.mxu1 }
 0x403   : > { %3380 = vst.msk [vmem:[%s6120_s27 + $0x20] sm:$0xff] %vm679_vm1, %v3364_v32  ;;  %v3211_v36 = vadd.f32 %v3975_v55, %v3066_v35  ;;  %v3898_v43 = vadd.f32 %v3897_v1, %v3896_v15  ;;  %v3978_v26 = vadd.f32 %v3977_v41, %v3976_v7  ;;  %v2946_v32 = vadd.f32 %v3830_v47, %v3750_v52 }
 0x404   : > { %v3899_v12 = vpop.f32.mrf.mxu0  ;;  %v3979_v4 = vpop.f32.mrf.mxu1 }
 0x405   : > { %v3365_v11 = vmul.f32 %v3308_v8, %v3211_v36  ;;  %v3071_v38 = vadd.f32 %v3898_v43, %v2926_v56  ;;  %v6410_v36 = vld [vmem:[#allocation2_spill] sm:$0xff] }
 0x406   : > { %v3900_v50 = vpop.f32.mrf.mxu0  ;;  %v3980_v40 = vpop.f32.mrf.mxu1  ;;  %v3756_v43 = vadd.f32 %v6410_v36, %v6074_v6 }
 0x407   : > { %3381 = vst.msk [vmem:[%s6120_s27 + $0x28] sm:$0xff] %vm679_vm1, %v3365_v11  ;;  %v3216_v16 = vadd.f32 %v3978_v26, %v3071_v38  ;;  %v3901_v37 = vadd.f32 %v3900_v50, %v3899_v12  ;;  %v3981_v3 = vadd.f32 %v3980_v40, %v3979_v4  ;;  %v6411_v12 = vld [vmem:[#allocation4_spill] sm:$0xff]  ;;  %v6412_v4 = vld [vmem:[#allocation3_spill] sm:$0xff] }
 0x408   : > { %v3902_v39 = vpop.f32.mrf.mxu0  ;;  %v3982_v62 = vpop.f32.mrf.mxu1  ;;  %v3836_v5 = vadd.f32 %v6412_v4, %v6411_v12 }
 0x409   : > { %v3366_v28 = vmul.f32 %v3313_v9, %v3216_v16  ;;  %v3076_v53 = vadd.f32 %v3901_v37, %v2931_v21  ;;  %v6413_v37 = vld [vmem:[#allocation7_spill] sm:$0xff] }
 0x40a   : > { %v3903_v23 = vpop.f32.mrf.mxu0  ;;  %v3983_v17 = vpop.f32.mrf.mxu1  ;;  %v2956_v9 = vadd.f32 %v3836_v5, %v3756_v43 }
 0x40b   : > { %3382 = vst.msk [vmem:[%s6120_s27 + $0x30] sm:$0xff] %vm679_vm1, %v3366_v28  ;;  %v3221_v45 = vadd.f32 %v3981_v3, %v3076_v53  ;;  %v3904_v63 = vadd.f32 %v3903_v23, %v3902_v39  ;;  %v3984_v20 = vadd.f32 %v3983_v17, %v3982_v62  ;;  %v6414_v39 = vld [vmem:[#allocation5_spill] sm:$0xff]  ;;  %v6415_v28 = vld [vmem:[#allocation8_spill] sm:$0xff]  ;;  %v6416_v53 = vld [vmem:[#allocation6_spill] sm:$0xff] }
 0x40c   : > { %v3905_v10 = vpop.f32.mrf.mxu0  ;;  %v3985_v27 = vpop.f32.mrf.mxu1  ;;  %v3759_v62 = vadd.f32 %v6414_v39, %v6413_v37  ;;  %v3839_v3 = vadd.f32 %v6416_v53, %v6415_v28 }
 0x40d   : > { %v3367_v0 = vmul.f32 %v3318_v34, %v3221_v45  ;;  %v3081_v42 = vadd.f32 %v3904_v63, %v2936_v22  ;;  %v3338_v22 = vpop.permute.xlu1 %3337 }
 0x40e   : > { %v3906_v54 = vpop.f32.mrf.mxu0  ;;  %v3986_v24 = vpop.f32.mrf.mxu1 }
 0x40f   : > { %3383 = vst.msk [vmem:[%s6120_s27 + $0x38] sm:$0xff] %vm679_vm1, %v3367_v0  ;;  %v3226_v29 = vadd.f32 %v3984_v20, %v3081_v42  ;;  %v3907_v61 = vadd.f32 %v3906_v54, %v3905_v10  ;;  %v3987_v7 = vadd.f32 %v3986_v24, %v3985_v27  ;;  %v6417_v10 = vld [vmem:[#allocation11_spill] sm:$0xff]  ;;  %v6418_v27 = vld [vmem:[#allocation9_spill] sm:$0xff]  ;;  %v6419_v42 = vld [vmem:[#allocation12_spill] sm:$0xff]  ;;  %v2961_v24 = vadd.f32 %v3839_v3, %v3759_v62 }
 0x410   : > { %v3908_v57 = vpop.f32.mrf.mxu0  ;;  %v3988_v58 = vpop.f32.mrf.mxu1  ;;  %v3762_v0 = vadd.f32 %v6418_v27, %v6417_v10  ;;  %v6420_v20 = vld [vmem:[#allocation10_spill] sm:$0xff] }
 0x411   : > { %v3368_v14 = vmul.f32 %v3323_v48, %v3226_v29  ;;  %v3086_v15 = vadd.f32 %v3907_v61, %v2941_v13  ;;  %v3842_v52 = vadd.f32 %v6420_v20, %v6419_v42  ;;  %v3343_v13 = vpop.permute.xlu0 %3342 }
 0x412   : > { %v3909_v35 = vpop.f32.mrf.mxu0  ;;  %v3989_v30 = vpop.f32.mrf.mxu1 }
 0x413   : > { %3384 = vst.msk [vmem:[%s6120_s27 + $0x40] sm:$0xff] %vm679_vm1, %v3368_v14  ;;  %v3231_v55 = vadd.f32 %v3987_v7, %v3086_v15  ;;  %v3910_v56 = vadd.f32 %v3909_v35, %v3908_v57  ;;  %v3990_v8 = vadd.f32 %v3989_v30, %v3988_v58  ;;  %v2966_v7 = vadd.f32 %v3842_v52, %v3762_v0  ;;  %v6421_v30 = vld [vmem:[#allocation75_spill] sm:$0xff] }
 0x414   : > { %v3911_v1 = vpop.f32.mrf.mxu0  ;;  %v3991_v41 = vpop.f32.mrf.mxu1  ;;  %v3765_v31 = vadd.f32 %v6422_v51, %v6421_v30 }
 0x415   : > { %v3369_v25 = vmul.f32 %v3328_v59, %v3231_v55  ;;  %v3091_v33 = vadd.f32 %v3910_v56, %v2946_v32  ;;  %v6423_v59 = vld [vmem:[#allocation15_spill] sm:$0xff]  ;;  %v6424_v55 = vld [vmem:[#allocation13_spill] sm:$0xff] }
 0x416   : > { %v3912_v49 = vpop.f32.mrf.mxu0  ;;  %v3992_v11 = vpop.f32.mrf.mxu1  ;;  %v3845_v56 = vadd.f32 %v6424_v55, %v6423_v59 }
 0x417   : > { %3385 = vst.msk [vmem:[%s6120_s27 + $0x48] sm:$0xff] %vm679_vm1, %v3369_v25  ;;  %v3236_v38 = vadd.f32 %v3990_v8, %v3091_v33  ;;  %v3913_v26 = vadd.f32 %v3912_v49, %v3911_v1  ;;  %v3993_v21 = vadd.f32 %v3992_v11, %v3991_v41  ;;  %v3348_v1 = vpop.permute.xlu1 %3347 }
 0x418   : > { %v3914_v2 = vpop.f32.mrf.mxu0  ;;  %v3994_v46 = vpop.f32.mrf.mxu1  ;;  %v2971_v49 = vadd.f32 %v3845_v56, %v3765_v31 }
 0x419   : > { %v3370_v50 = vmul.f32 %v3333_v19, %v3236_v38  ;;  %v3096_v40 = vadd.f32 %v3913_v26, %v2951_v18  ;;  %v3353_v19 = vpop.permute.xlu0 %3352 }
 0x41a   : > { %v3915_v16 = vpop.f32.mrf.mxu0  ;;  %v3995_v6 = vpop.f32.mrf.mxu1 }
 0x41b   : > { %3386 = vst.msk [vmem:[%s6120_s27 + $0x50] sm:$0xff] %vm679_vm1, %v3370_v50  ;;  %v3241_v23 = vadd.f32 %v3993_v21, %v3096_v40  ;;  %v3916_v17 = vadd.f32 %v3915_v16, %v3914_v2  ;;  %v3996_v63 = vadd.f32 %v3995_v6, %v3994_v46  ;;  %v3358_v50 = vpop.permute.xlu1 %3357 }
 0x41c   : > { %v3917_v60 = vpop.f32.mrf.mxu0  ;;  %v3997_v44 = vpop.f32.mrf.mxu1 }
 0x41d   : > { %v3371_v34 = vmul.f32 %v3338_v22, %v3241_v23  ;;  %v3101_v45 = vadd.f32 %v3916_v17, %v2956_v9 }
 0x41e   : > { %v3918_v47 = vpop.f32.mrf.mxu0  ;;  %v3998_v54 = vpop.f32.mrf.mxu1 }
 0x41f   : > { %3387 = vst.msk [vmem:[%s6120_s27 + $0x58] sm:$0xff] %vm679_vm1, %v3371_v34  ;;  %v3246_v48 = vadd.f32 %v3996_v63, %v3101_v45  ;;  %v3919_v29 = vadd.f32 %v3918_v47, %v3917_v60  ;;  %v3999_v15 = vadd.f32 %v3998_v54, %v3997_v44 }
 0x420   : > { %v3920_v61 = vpop.f32.mrf.mxu0  ;;  %v4000_v57 = vpop.f32.mrf.mxu1 }
 0x421   : > { %v3372_v58 = vmul.f32 %v3343_v13, %v3246_v48  ;;  %v3106_v14 = vadd.f32 %v3919_v29, %v2961_v24 }
 0x422   : > { %v3921_v32 = vpop.f32.mrf.mxu0  ;;  %v4001_v35 = vpop.f32.mrf.mxu1 }
 0x423   : > { %3388 = vst.msk [vmem:[%s6120_s27 + $0x60] sm:$0xff] %vm679_vm1, %v3372_v58  ;;  %v3251_v41 = vadd.f32 %v3999_v15, %v3106_v14  ;;  %v3922_v25 = vadd.f32 %v3921_v32, %v3920_v61  ;;  %v4002_v12 = vadd.f32 %v4001_v35, %v4000_v57 }
 0x424   : > { %v3923_v33 = vpop.f32.mrf.mxu0  ;;  %v4003_v8 = vpop.f32.mrf.mxu1 }
 0x425   : > { %v3373_v36 = vmul.f32 %v3348_v1, %v3251_v41  ;;  %v3111_v43 = vadd.f32 %v3922_v25, %v2966_v7 }
 0x426   : > { %v3924_v4 = vpop.f32.mrf.mxu0  ;;  %v4004_v5 = vpop.f32.mrf.mxu1 }
 0x427   : > { %3389 = vst.msk [vmem:[%s6120_s27 + $0x68] sm:$0xff] %vm679_vm1, %v3373_v36  ;;  %v3256_v11 = vadd.f32 %v4002_v12, %v3111_v43  ;;  %v3925_v18 = vadd.f32 %v3924_v4, %v3923_v33  ;;  %v4005_v2 = vadd.f32 %v4004_v5, %v4003_v8 }
 0x429   : > { %v3374_v38 = vmul.f32 %v3353_v19, %v3256_v11  ;;  %v3116_v26 = vadd.f32 %v3925_v18, %v2971_v49 }
 0x42b   : > { %3390 = vst.msk [vmem:[%s6120_s27 + $0x70] sm:$0xff] %vm679_vm1, %v3374_v38  ;;  %v3261_v46 = vadd.f32 %v4005_v2, %v3116_v26 }
 0x42d   : > { %v3375_v40 = vmul.f32 %v3358_v50, %v3261_v46 }
 0x42f   : > { %3391 = vst.msk [vmem:[%s6120_s27 + $0x78] sm:$0xff] %vm679_vm1, %v3375_v40 }
 0x430 PF: > { %s21_s17 = sadd.s32 1, %s4082_s17  }
 0x431   : > { %p18_p4 = scmp.ge.s32.totalorder %s21_s17, 4  }
 0x433   :  { %20 = sbr.rel (!%p18_p4) target bundleno = 1 (0x1), region = 100 }

</bundles_post_ra>
